<compile_context>
chip_gen: v7x
topology: tpu7x:2x2x1
jax: 0.10.0
libtpu: 0.0.40
codegen_flags: <defaults>
</compile_context>

<pallas_src>
import jax
import jax.numpy as jnp
from jax.experimental import pallas as pl
from jax.experimental.pallas import tpu as pltpu


def fire_deconv_kernel(x_mid_ref, x_top_ref, x_bot_ref,
                       wsq_ref, bsq_ref, wdec_ref, bdec_ref,
                       wexp_ref, bexp_ref,
                       out_ref, xs2, cw):
    f32, bf16 = jnp.float32, jnp.bfloat16
    tHp2, Wp1, Csq2 = xs2.shape                 # Csq2 = 2 * Csq
    tH, W, Csq = tHp2 - 2, Wp1 - 1, Csq2 // 2
    Ctot = bexp_ref.shape[-1]
    Cin = x_mid_ref.shape[-1]
    h = pl.program_id(1)
    n_h = pl.num_programs(1)

    # ---- squeeze 1x1 + ReLU: ONE fused dot over [top halo; mid; bottom halo] --
    x_all = jnp.concatenate([x_top_ref[0], x_mid_ref[0], x_bot_ref[0]], axis=0)
    xs = jnp.dot(x_all.reshape(tHp2 * W, Cin), wsq_ref[...],
                 preferred_element_type=f32)
    xs = jnp.maximum(xs + bsq_ref[...], 0.0).reshape(tHp2, W, Csq).astype(bf16)

    # ---- staggered deconv LHS:  xs2[:, c, :] = [xs[c-1] | xs[c]], c in [0, W] --
    # built with two stores (no lane concat); xs[-1]=xs[W]=0 is the deconv's
    # implicit W boundary (only valid input columns contribute).
    xs2[:, 1:W + 1, 0:Csq] = xs
    xs2[:, 0:W, Csq:Csq2] = xs
    xs2[:, 0:1, 0:Csq] = jnp.zeros((tHp2, 1, Csq), bf16)            # xs[-1] = 0
    xs2[:, W:W + 1, Csq:Csq2] = jnp.zeros((tHp2, 1, Csq), bf16)     # xs[W]  = 0

    # ---- ConvTranspose2d (1,4), stride (1,2), pad (0,1) + ReLU ----------------
    #   S[c] = [ odd[c-1] | even[c] ] = [xs[c-1] | xs[c]] @ [[w2 w3],[w0 w1]]
    # one dense (K=2Csq, N=2Csq) dot -> no zero blocks on the MXU.
    s = jnp.dot(xs2[...].reshape(tHp2 * Wp1, Csq2), wdec_ref[...],
                preferred_element_type=f32)
    s = jnp.maximum(s + bdec_ref[...], 0.0).reshape(tHp2, Wp1, Csq2).astype(bf16)

    # ---- expand column window:  cw[:, c, :] = [S[c] | S[c+1]] -----------------
    #   = [ odd[c-1] | even[c] | odd[c] | even[c+1] ]   (Csq lanes each)
    cw[:, :, 0:Csq2] = s[:, 0:W, :]
    cw[:, :, Csq2:2 * Csq2] = s[:, 1:W + 1, :]
    # 3x3's W zero padding: odd[-1] and even[W] are padding columns, not deconv
    # outputs -> force them to zero after bias+ReLU.
    cw[:, 0:1, 0:Csq] = jnp.zeros((tHp2, 1, Csq), bf16)
    cw[:, W - 1:W, 3 * Csq:4 * Csq] = jnp.zeros((tHp2, 1, Csq), bf16)

    # 3x3's H zero padding at the true image boundary: kill the halo rows.
    # (Pairs with the clamped halo index_maps in the wrapper — keep both.)
    @pl.when(h == 0)
    def _():
        cw[0:1, :, :] = jnp.zeros((1, W, 2 * Csq2), bf16)

    @pl.when(h == n_h - 1)
    def _():
        cw[tH + 1:tH + 2, :, :] = jnp.zeros((1, W, 2 * Csq2), bf16)

    # ---- expand: ex1x1 folded into the ex3x3 centre tap -----------------------
    # even output column 2c   uses lanes [0   : 3Csq] = [odd[c-1], even[c], odd[c]]
    # odd  output column 2c+1 uses lanes [Csq : 4Csq] = [even[c],  odd[c],  even[c+1]]
    # both parities share the same (3, 3Csq, Ctot) weights -> 6 dense dots.
    m = tH * W
    acc_e = jnp.zeros((m, Ctot), f32)
    acc_o = jnp.zeros((m, Ctot), f32)
    for kh in range(3):                                # static, unrolled
        wk = wexp_ref[kh]                              # (3Csq, Ctot)
        acc_e = acc_e + jnp.dot(
            cw[kh:kh + tH, :, 0:3 * Csq].reshape(m, 3 * Csq), wk,
            preferred_element_type=f32)
        acc_o = acc_o + jnp.dot(
            cw[kh:kh + tH, :, Csq:4 * Csq].reshape(m, 3 * Csq), wk,
            preferred_element_type=f32)

    bexp = bexp_ref[...]
    y_e = jnp.maximum(acc_e + bexp, 0.0).reshape(tH, W, Ctot)
    y_o = jnp.maximum(acc_o + bexp, 0.0).reshape(tH, W, Ctot)

    # lane layout per W position: [even column (Ctot) | odd column (Ctot)];
    # the wrapper's reshape (W, 2Ctot) -> (2W, Ctot) interleaves them for free.
    out_ref[0, :, :, 0:Ctot] = y_e.astype(out_ref.dtype)
    out_ref[0, :, :, Ctot:2 * Ctot] = y_o.astype(out_ref.dtype)


def _largest_divisor_tile(H, tile_h):
    tH = 1
    for d in range(1, min(H, tile_h) + 1):
        if H % d == 0:
            tH = d
    return tH


def _vmem_limit_bytes(est):
    cap = 64 * 2 ** 20                       # conservative default: v7x per-core
    try:
        cap = int(getattr(pltpu.get_tpu_info(), "vmem_capacity_bytes", cap) or cap)
    except Exception:
        pass
    # never request the full physical VMEM (leave headroom for Mosaic scratch):
    # ~48 MiB on v7x, ~96 MiB on v5e/v6e.
    return int(min(int(0.75 * cap), max(32 * 2 ** 20, 4 * est)))


def fire_deconv_nhwc(x_nhwc, params, *, tile_h=16):
    """FireDeconv forward, NHWC in / NHWC out (bf16): (N,H,W,Cin) -> (N,H,2W,C1+C3)."""
    w_sq, b_sq, w_de, b_de, w_e1, b_e1, w_e3, b_e3 = params
    N, H, W, Cin = x_nhwc.shape
    Csq = w_sq.shape[0]
    C1, C3 = w_e1.shape[0], w_e3.shape[0]
    Ctot = C1 + C3
    f32, bf16 = jnp.float32, jnp.bfloat16

    tH = _largest_divisor_tile(H, tile_h)
    nH = H // tH

    x = x_nhwc.astype(bf16)

    # ---- weight re-layout / fusion (tiny, done once in plain JAX) -------------
    wsq = jnp.transpose(w_sq[:, :, 0, 0], (1, 0)).astype(bf16)        # (Cin, Csq)
    bsq = b_sq.reshape(1, Csq).astype(f32)

    wde = jnp.transpose(w_de[:, :, 0, :], (2, 0, 1))                  # (4, ci, co)
    # staggered deconv RHS (fully dense):
    #   [xs[c-1] | xs[c]] @ [[w2, w3], [w0, w1]] = [odd[c-1] | even[c]]
    wdec = jnp.concatenate(
        [jnp.concatenate([wde[2], wde[3]], axis=1),
         jnp.concatenate([wde[0], wde[1]], axis=1)], axis=0).astype(bf16)
    bdec = jnp.concatenate([b_de, b_de]).reshape(1, 2 * Csq).astype(f32)

    we1 = jnp.transpose(w_e1[:, :, 0, 0], (1, 0))                     # (Csq, C1)
    we3 = jnp.transpose(w_e3, (2, 3, 1, 0))                           # (3,3,ci,co)
    z1 = jnp.zeros((Csq, C1), f32)
    # one shared expand RHS per kh: rows = [side tap kw0; centre tap kw1(+1x1); side tap kw2]
    wexp = jnp.stack([
        jnp.concatenate([
            jnp.concatenate([z1, we3[kh, 0]], axis=1),
            jnp.concatenate([we1 if kh == 1 else z1, we3[kh, 1]], axis=1),
            jnp.concatenate([z1, we3[kh, 2]], axis=1)], axis=0)
        for kh in range(3)], axis=0).astype(bf16)                     # (3, 3Csq, Ctot)
    bexp = jnp.concatenate([b_e1, b_e3]).reshape(1, Ctot).astype(f32)

    # ---- explicit VMEM budget (blocks + scratch + in-kernel temporaries) ------
    est = (2 * (tH * W * Cin * 2 + 2 * W * Cin * 2        # double-buffered x blocks
                + tH * W * 2 * Ctot * 2)                  # bf16 output block
           + 2 * ((Cin * Csq + 4 * Csq * Csq + 9 * Csq * Ctot) * 2
                  + (Csq + 2 * Csq + Ctot) * 4)           # weights / biases
           + (tH + 2) * (W + 1) * 2 * Csq * 2             # xs2 scratch (bf16)
           + (tH + 2) * W * 4 * Csq * 2                   # cw scratch (bf16)
           + (tH + 2) * W * (Cin + Csq) * 2               # x_all + xs temporaries
           + (tH + 2) * (W + 1) * 2 * Csq * 6             # deconv acc (f32) + S (bf16)
           + tH * W * (2 * Ctot * 4 + 6 * Csq * 2 + 2 * Ctot * 2))  # expand temporaries
    vmem_limit = _vmem_limit_bytes(est)

    def full(a):
        nd = a.ndim
        return pl.BlockSpec(a.shape, lambda n, hh, _nd=nd: (0,) * _nd)

    out = pl.pallas_call(
        fire_deconv_kernel,
        grid=(N, nH),
        in_specs=[
            pl.BlockSpec((1, tH, W, Cin), lambda n, hh: (n, hh, 0, 0)),
            # 1-row halos (block size 1 along H => block index == row index),
            # clamped at the image boundary; the kernel zeroes them there.
            pl.BlockSpec((1, 1, W, Cin),
                         lambda n, hh: (n, jnp.maximum(hh * tH - 1, 0), 0, 0)),
            pl.BlockSpec((1, 1, W, Cin),
                         lambda n, hh: (n, jnp.minimum(hh * tH + tH, H - 1), 0, 0)),
            full(wsq), full(bsq), full(wdec), full(bdec), full(wexp), full(bexp),
        ],
        out_specs=pl.BlockSpec((1, tH, W, 2 * Ctot), lambda n, hh: (n, hh, 0, 0)),
        out_shape=jax.ShapeDtypeStruct((N, H, W, 2 * Ctot), bf16),
        scratch_shapes=[
            pltpu.VMEM((tH + 2, W + 1, 2 * Csq), bf16),   # staggered deconv LHS
            pltpu.VMEM((tH + 2, W, 4 * Csq), bf16),       # expand column window
        ],
        compiler_params=pltpu.CompilerParams(
            dimension_semantics=("parallel", "parallel"),
            vmem_limit_bytes=vmem_limit),
    )(x, x, x, wsq, bsq, wdec, bdec, wexp, bexp)

    # (N, H, W, [even Ctot | odd Ctot]) -> (N, H, 2W, Ctot): contiguous reshape.
    return out.reshape(N, H, 2 * W, Ctot)


def fire_deconv(x_nchw, params, *, tile_h=16):
    """NCHW wrapper matching the PyTorch module; keep the model NHWC to drop the
    two full-tensor transposes and call fire_deconv_nhwc directly."""
    x = jnp.transpose(x_nchw, (0, 2, 3, 1)).astype(jnp.bfloat16)
    out = fire_deconv_nhwc(x, params, tile_h=tile_h)
    return jnp.transpose(out, (0, 3, 1, 2))               # bf16 NCHW


def fire_deconv_ref(x, params):
    """Pure-JAX reference with PyTorch semantics (NCHW, f32)."""
    w_sq, b_sq, w_de, b_de, w_e1, b_e1, w_e3, b_e3 = params

    def conv(x, w, b, pad):
        y = jax.lax.conv_general_dilated(
            x, w, window_strides=(1, 1),
            padding=((pad, pad), (pad, pad)),
            dimension_numbers=('NCHW', 'OIHW', 'NCHW'))
        return jax.nn.relu(y + b[None, :, None, None])

    def deconv(x, w, b, stride, pad):
        kh, kw = w.shape[2], w.shape[3]
        w_conv = jnp.transpose(w[:, :, ::-1, ::-1], (1, 0, 2, 3))     # flip -> OIHW
        y = jax.lax.conv_general_dilated(
            x, w_conv, window_strides=(1, 1),
            padding=((kh - 1 - pad[0],) * 2, (kw - 1 - pad[1],) * 2),
            lhs_dilation=stride,
            dimension_numbers=('NCHW', 'OIHW', 'NCHW'))
        return jax.nn.relu(y + b[None, :, None, None])

    x = conv(x, w_sq, b_sq, 0)
    x = deconv(x, w_de, b_de, (1, 2), (0, 1))
    return jnp.concatenate([conv(x, w_e1, b_e1, 0), conv(x, w_e3, b_e3, 1)],
                           axis=1)


if __name__ == "__main__":
    key = jax.random.PRNGKey(0)
    N, Cin, H, W = 2, 4, 16, 16
    Csq, C1, C3 = 4, 8, 8
    ks = jax.random.split(key, 9)

    def q(a):
        # Snap to the bf16 grid so the bf16 kernel and the f32 reference see
        # identical inputs/weights; remaining error = bf16 intermediates/output.
        return a.astype(jnp.bfloat16).astype(jnp.float32)

    x = q(jax.random.normal(ks[0], (N, Cin, H, W), jnp.float32))
    params = (
        q(0.2 * jax.random.normal(ks[1], (Csq, Cin, 1, 1), jnp.float32)),  # sq1x1 w
        0.1 * jax.random.normal(ks[2], (Csq,), jnp.float32),               # sq1x1 b
        q(0.2 * jax.random.normal(ks[3], (Csq, Csq, 1, 4), jnp.float32)),  # deconv w
        0.1 * jax.random.normal(ks[4], (Csq,), jnp.float32),               # deconv b
        q(0.2 * jax.random.normal(ks[5], (C1, Csq, 1, 1), jnp.float32)),   # ex1x1 w
        0.1 * jax.random.normal(ks[6], (C1,), jnp.float32),                # ex1x1 b
        q(0.2 * jax.random.normal(ks[7], (C3, Csq, 3, 3), jnp.float32)),   # ex3x3 w
        0.1 * jax.random.normal(ks[8], (C3,), jnp.float32),                # ex3x3 b
    )

    ref = jax.block_until_ready(fire_deconv_ref(x, params))

    # tile_h=8 exercises the halo seam (H=16 -> 2 H-tiles); tile_h=16 is one tile.
    for th in (8, 16):
        out = jax.block_until_ready(fire_deconv(x, params, tile_h=th))
        assert out.shape == (N, C1 + C3, H, 2 * W), out.shape
        out_f32 = out.astype(jnp.float32)
        err = float(jnp.max(jnp.abs(out_f32 - ref)))
        assert jnp.allclose(out_f32, ref, atol=4e-2, rtol=4e-2), (th, err)

    print("KERNEL_OK")
</pallas_src>

<mosaic_0001>
module attributes {stable_mosaic.version = 11 : i64} {
  func.func @fire_deconv_kernel(%arg0: i32, %arg1: i32, %arg2: memref<1x8x16x4xbf16, #tpu.memory_space<vmem>>, %arg3: memref<1x1x16x4xbf16, #tpu.memory_space<vmem>>, %arg4: memref<1x1x16x4xbf16, #tpu.memory_space<vmem>>, %arg5: memref<4x4xbf16, #tpu.memory_space<vmem>>, %arg6: memref<1x4xf32, #tpu.memory_space<vmem>>, %arg7: memref<8x8xbf16, #tpu.memory_space<vmem>>, %arg8: memref<1x8xf32, #tpu.memory_space<vmem>>, %arg9: memref<3x12x16xbf16, #tpu.memory_space<vmem>>, %arg10: memref<1x16xf32, #tpu.memory_space<vmem>>, %arg11: memref<1x8x16x32xbf16, #tpu.memory_space<vmem>>, %arg12: memref<10x17x8xbf16, #tpu.memory_space<vmem>>, %arg13: memref<10x16x16xbf16, #tpu.memory_space<vmem>>) attributes {dimension_semantics = [#tpu.dimension_semantics<parallel>, #tpu.dimension_semantics<parallel>], iteration_bounds = array<i64: 2, 2>, scalar_prefetch = 0 : i64, scratch_operands = 2 : i64, tpu.core_type = #tpu.core_type<tc>, window_params = [{transform_indices = @transform_0, window_bounds = array<i64: 1, 8, 16, 4>}, {transform_indices = @transform_1, window_bounds = array<i64: 1, 1, 16, 4>}, {transform_indices = @transform_2, window_bounds = array<i64: 1, 1, 16, 4>}, {pipeline_mode = #tpu.pipeline_mode<synchronous>, transform_indices = @transform_3, window_bounds = array<i64: 4, 4>}, {pipeline_mode = #tpu.pipeline_mode<synchronous>, transform_indices = @transform_4, window_bounds = array<i64: 1, 4>}, {pipeline_mode = #tpu.pipeline_mode<synchronous>, transform_indices = @transform_5, window_bounds = array<i64: 8, 8>}, {pipeline_mode = #tpu.pipeline_mode<synchronous>, transform_indices = @transform_6, window_bounds = array<i64: 1, 8>}, {pipeline_mode = #tpu.pipeline_mode<synchronous>, transform_indices = @transform_7, window_bounds = array<i64: 3, 12, 16>}, {pipeline_mode = #tpu.pipeline_mode<synchronous>, transform_indices = @transform_8, window_bounds = array<i64: 1, 16>}, {transform_indices = @transform_9, window_bounds = array<i64: 1, 8, 16, 32>}]} {
    %c0 = arith.constant 0 : index
    %c0_0 = arith.constant 0 : index
    %c0_1 = arith.constant 0 : index
    %c0_2 = arith.constant 0 : index
    %0 = vector.load %arg3[%c0, %c0_0, %c0_1, %c0_2] : memref<1x1x16x4xbf16, #tpu.memory_space<vmem>>, vector<1x1x16x4xbf16>
    %1 = vector.shape_cast %0 : vector<1x1x16x4xbf16> to vector<1x16x4xbf16>
    %c0_3 = arith.constant 0 : index
    %c0_4 = arith.constant 0 : index
    %c0_5 = arith.constant 0 : index
    %c0_6 = arith.constant 0 : index
    %2 = vector.load %arg2[%c0_3, %c0_4, %c0_5, %c0_6] : memref<1x8x16x4xbf16, #tpu.memory_space<vmem>>, vector<1x8x16x4xbf16>
    %3 = vector.shape_cast %2 : vector<1x8x16x4xbf16> to vector<8x16x4xbf16>
    %c0_7 = arith.constant 0 : index
    %c0_8 = arith.constant 0 : index
    %c0_9 = arith.constant 0 : index
    %c0_10 = arith.constant 0 : index
    %4 = vector.load %arg4[%c0_7, %c0_8, %c0_9, %c0_10] : memref<1x1x16x4xbf16, #tpu.memory_space<vmem>>, vector<1x1x16x4xbf16>
    %5 = vector.shape_cast %4 : vector<1x1x16x4xbf16> to vector<1x16x4xbf16>
    %6 = tpu.concatenate %1, %3, %5 in 0 : vector<1x16x4xbf16>, vector<8x16x4xbf16>, vector<1x16x4xbf16> -> vector<10x16x4xbf16>
    %7 = vector.shape_cast %6 : vector<10x16x4xbf16> to vector<160x4xbf16>
    %c0_11 = arith.constant 0 : index
    %c0_12 = arith.constant 0 : index
    %8 = vector.load %arg5[%c0_11, %c0_12] : memref<4x4xbf16, #tpu.memory_space<vmem>>, vector<4x4xbf16>
    %cst = arith.constant dense<0.000000e+00> : vector<160x4xf32>
    %9 = tpu.matmul %7, %8, %cst {dimension_numbers = #tpu.dot_dimension_numbers<[1], [0], [0], [1], [0, 0, 1, 1], [], []>} : vector<160x4xbf16>, vector<4x4xbf16>, vector<160x4xf32> -> vector<160x4xf32>
    %c0_13 = arith.constant 0 : index
    %c0_14 = arith.constant 0 : index
    %10 = vector.load %arg6[%c0_13, %c0_14] : memref<1x4xf32, #tpu.memory_space<vmem>>, vector<1x4xf32>
    %11 = vector.broadcast %10 : vector<1x4xf32> to vector<160x4xf32>
    %12 = arith.addf %9, %11 : vector<160x4xf32>
    %cst_15 = arith.constant 0.000000e+00 : f32
    %13 = vector.broadcast %cst_15 : f32 to vector<160x4xf32>
    %14 = arith.maximumf %12, %13 : vector<160x4xf32>
    %15 = vector.shape_cast %14 : vector<160x4xf32> to vector<10x16x4xf32>
    %16 = arith.truncf %15 : vector<10x16x4xf32> to vector<10x16x4xbf16>
    %c0_16 = arith.constant 0 : index
    %c1 = arith.constant 1 : index
    %c0_17 = arith.constant 0 : index
    %17 = vector.load %arg12[%c0_16, %c1, %c0_17] : memref<10x17x8xbf16, #tpu.memory_space<vmem>>, vector<10x16x4xbf16>
    tpu.vector_store %arg12[%c0_16, %c1, %c0_17], %16 {strides = array<i32>} : memref<10x17x8xbf16, #tpu.memory_space<vmem>>, vector<10x16x4xbf16>,
    %c0_18 = arith.constant 0 : index
    %c0_19 = arith.constant 0 : index
    %c4 = arith.constant 4 : index
    %18 = vector.load %arg12[%c0_18, %c0_19, %c4] : memref<10x17x8xbf16, #tpu.memory_space<vmem>>, vector<10x16x4xbf16>
    tpu.vector_store %arg12[%c0_18, %c0_19, %c4], %16 {strides = array<i32>} : memref<10x17x8xbf16, #tpu.memory_space<vmem>>, vector<10x16x4xbf16>,
    %cst_20 = arith.constant 0.000000e+00 : bf16
    %19 = vector.broadcast %cst_20 : bf16 to vector<10x1x4xbf16>
    %c0_21 = arith.constant 0 : index
    %c0_22 = arith.constant 0 : index
    %c0_23 = arith.constant 0 : index
    %20 = vector.load %arg12[%c0_21, %c0_22, %c0_23] : memref<10x17x8xbf16, #tpu.memory_space<vmem>>, vector<10x1x4xbf16>
    tpu.vector_store %arg12[%c0_21, %c0_22, %c0_23], %19 {strides = array<i32>} : memref<10x17x8xbf16, #tpu.memory_space<vmem>>, vector<10x1x4xbf16>,
    %cst_24 = arith.constant 0.000000e+00 : bf16
    %21 = vector.broadcast %cst_24 : bf16 to vector<10x1x4xbf16>
    %c0_25 = arith.constant 0 : index
    %c16 = arith.constant 16 : index
    %c4_26 = arith.constant 4 : index
    %22 = vector.load %arg12[%c0_25, %c16, %c4_26] : memref<10x17x8xbf16, #tpu.memory_space<vmem>>, vector<10x1x4xbf16>
    tpu.vector_store %arg12[%c0_25, %c16, %c4_26], %21 {strides = array<i32>} : memref<10x17x8xbf16, #tpu.memory_space<vmem>>, vector<10x1x4xbf16>,
    %c0_27 = arith.constant 0 : index
    %c0_28 = arith.constant 0 : index
    %c0_29 = arith.constant 0 : index
    %23 = vector.load %arg12[%c0_27, %c0_28, %c0_29] : memref<10x17x8xbf16, #tpu.memory_space<vmem>>, vector<10x17x8xbf16>
    %24 = vector.shape_cast %23 : vector<10x17x8xbf16> to vector<170x8xbf16>
    %c0_30 = arith.constant 0 : index
    %c0_31 = arith.constant 0 : index
    %25 = vector.load %arg7[%c0_30, %c0_31] : memref<8x8xbf16, #tpu.memory_space<vmem>>, vector<8x8xbf16>
    %cst_32 = arith.constant dense<0.000000e+00> : vector<170x8xf32>
    %26 = tpu.matmul %24, %25, %cst_32 {dimension_numbers = #tpu.dot_dimension_numbers<[1], [0], [0], [1], [0, 0, 1, 1], [], []>} : vector<170x8xbf16>, vector<8x8xbf16>, vector<170x8xf32> -> vector<170x8xf32>
    %c0_33 = arith.constant 0 : index
    %c0_34 = arith.constant 0 : index
    %27 = vector.load %arg8[%c0_33, %c0_34] : memref<1x8xf32, #tpu.memory_space<vmem>>, vector<1x8xf32>
    %28 = vector.broadcast %27 : vector<1x8xf32> to vector<170x8xf32>
    %29 = arith.addf %26, %28 : vector<170x8xf32>
    %cst_35 = arith.constant 0.000000e+00 : f32
    %30 = vector.broadcast %cst_35 : f32 to vector<170x8xf32>
    %31 = arith.maximumf %29, %30 : vector<170x8xf32>
    %32 = vector.shape_cast %31 : vector<170x8xf32> to vector<10x17x8xf32>
    %33 = arith.truncf %32 : vector<10x17x8xf32> to vector<10x17x8xbf16>
    %34 = vector.extract_strided_slice %33 {offsets = [0, 0, 0], sizes = [10, 16, 8], strides = [1, 1, 1]} : vector<10x17x8xbf16> to vector<10x16x8xbf16>
    %c0_36 = arith.constant 0 : index
    %c0_37 = arith.constant 0 : index
    %c0_38 = arith.constant 0 : index
    %35 = vector.load %arg13[%c0_36, %c0_37, %c0_38] : memref<10x16x16xbf16, #tpu.memory_space<vmem>>, vector<10x16x8xbf16>
    tpu.vector_store %arg13[%c0_36, %c0_37, %c0_38], %34 {strides = array<i32>} : memref<10x16x16xbf16, #tpu.memory_space<vmem>>, vector<10x16x8xbf16>,
    %36 = vector.extract_strided_slice %33 {offsets = [0, 1, 0], sizes = [10, 16, 8], strides = [1, 1, 1]} : vector<10x17x8xbf16> to vector<10x16x8xbf16>
    %c0_39 = arith.constant 0 : index
    %c0_40 = arith.constant 0 : index
    %c8 = arith.constant 8 : index
    %37 = vector.load %arg13[%c0_39, %c0_40, %c8] : memref<10x16x16xbf16, #tpu.memory_space<vmem>>, vector<10x16x8xbf16>
    tpu.vector_store %arg13[%c0_39, %c0_40, %c8], %36 {strides = array<i32>} : memref<10x16x16xbf16, #tpu.memory_space<vmem>>, vector<10x16x8xbf16>,
    %cst_41 = arith.constant 0.000000e+00 : bf16
    %38 = vector.broadcast %cst_41 : bf16 to vector<10x1x4xbf16>
    %c0_42 = arith.constant 0 : index
    %c0_43 = arith.constant 0 : index
    %c0_44 = arith.constant 0 : index
    %39 = vector.load %arg13[%c0_42, %c0_43, %c0_44] : memref<10x16x16xbf16, #tpu.memory_space<vmem>>, vector<10x1x4xbf16>
    tpu.vector_store %arg13[%c0_42, %c0_43, %c0_44], %38 {strides = array<i32>} : memref<10x16x16xbf16, #tpu.memory_space<vmem>>, vector<10x1x4xbf16>,
    %cst_45 = arith.constant 0.000000e+00 : bf16
    %40 = vector.broadcast %cst_45 : bf16 to vector<10x1x4xbf16>
    %c0_46 = arith.constant 0 : index
    %c15 = arith.constant 15 : index
    %c12 = arith.constant 12 : index
    %41 = vector.load %arg13[%c0_46, %c15, %c12] : memref<10x16x16xbf16, #tpu.memory_space<vmem>>, vector<10x1x4xbf16>
    tpu.vector_store %arg13[%c0_46, %c15, %c12], %40 {strides = array<i32>} : memref<10x16x16xbf16, #tpu.memory_space<vmem>>, vector<10x1x4xbf16>,
    %c0_i32 = arith.constant 0 : i32
    %42 = arith.cmpi eq, %arg1, %c0_i32 : i32
    %43 = arith.extui %42 : i1 to i32
    %c0_i32_47 = arith.constant 0 : i32
    %44 = arith.cmpi ne, %43, %c0_i32_47 : i32
    scf.if %44 {
      %cst_95 = arith.constant 0.000000e+00 : bf16
      %99 = vector.broadcast %cst_95 : bf16 to vector<1x16x16xbf16>
      %c0_96 = arith.constant 0 : index
      %c0_97 = arith.constant 0 : index
      %c0_98 = arith.constant 0 : index
      %100 = vector.load %arg13[%c0_96, %c0_97, %c0_98] : memref<10x16x16xbf16, #tpu.memory_space<vmem>>, vector<1x16x16xbf16>
      tpu.vector_store %arg13[%c0_96, %c0_97, %c0_98], %99 {strides = array<i32>} : memref<10x16x16xbf16, #tpu.memory_space<vmem>>, vector<1x16x16xbf16>,
    } else {
    }
    %c1_i32 = arith.constant 1 : i32
    %45 = arith.cmpi eq, %arg1, %c1_i32 : i32
    %46 = arith.extui %45 : i1 to i32
    %c0_i32_48 = arith.constant 0 : i32
    %47 = arith.cmpi ne, %46, %c0_i32_48 : i32
    scf.if %47 {
      %cst_95 = arith.constant 0.000000e+00 : bf16
      %99 = vector.broadcast %cst_95 : bf16 to vector<1x16x16xbf16>
      %c9 = arith.constant 9 : index
      %c0_96 = arith.constant 0 : index
      %c0_97 = arith.constant 0 : index
      %100 = vector.load %arg13[%c9, %c0_96, %c0_97] : memref<10x16x16xbf16, #tpu.memory_space<vmem>>, vector<1x16x16xbf16>
      tpu.vector_store %arg13[%c9, %c0_96, %c0_97], %99 {strides = array<i32>} : memref<10x16x16xbf16, #tpu.memory_space<vmem>>, vector<1x16x16xbf16>,
    } else {
    }
    %cst_49 = arith.constant 0.000000e+00 : f32
    %48 = vector.broadcast %cst_49 : f32 to vector<128x16xf32>
    %cst_50 = arith.constant 0.000000e+00 : f32
    %49 = vector.broadcast %cst_50 : f32 to vector<128x16xf32>
    %c0_51 = arith.constant 0 : index
    %c0_52 = arith.constant 0 : index
    %c0_53 = arith.constant 0 : index
    %50 = vector.load %arg9[%c0_51, %c0_52, %c0_53] : memref<3x12x16xbf16, #tpu.memory_space<vmem>>, vector<1x12x16xbf16>
    %51 = vector.shape_cast %50 : vector<1x12x16xbf16> to vector<12x16xbf16>
    %c0_54 = arith.constant 0 : index
    %c0_55 = arith.constant 0 : index
    %c0_56 = arith.constant 0 : index
    %52 = vector.load %arg13[%c0_54, %c0_55, %c0_56] : memref<10x16x16xbf16, #tpu.memory_space<vmem>>, vector<8x16x12xbf16>
    %53 = vector.shape_cast %52 : vector<8x16x12xbf16> to vector<128x12xbf16>
    %cst_57 = arith.constant dense<0.000000e+00> : vector<128x16xf32>
    %54 = tpu.matmul %53, %51, %cst_57 {dimension_numbers = #tpu.dot_dimension_numbers<[1], [0], [0], [1], [0, 0, 1, 1], [], []>} : vector<128x12xbf16>, vector<12x16xbf16>, vector<128x16xf32> -> vector<128x16xf32>
    %55 = arith.addf %48, %54 : vector<128x16xf32>
    %c0_58 = arith.constant 0 : index
    %c0_59 = arith.constant 0 : index
    %c4_60 = arith.constant 4 : index
    %56 = vector.load %arg13[%c0_58, %c0_59, %c4_60] : memref<10x16x16xbf16, #tpu.memory_space<vmem>>, vector<8x16x12xbf16>
    %57 = vector.shape_cast %56 : vector<8x16x12xbf16> to vector<128x12xbf16>
    %cst_61 = arith.constant dense<0.000000e+00> : vector<128x16xf32>
    %58 = tpu.matmul %57, %51, %cst_61 {dimension_numbers = #tpu.dot_dimension_numbers<[1], [0], [0], [1], [0, 0, 1, 1], [], []>} : vector<128x12xbf16>, vector<12x16xbf16>, vector<128x16xf32> -> vector<128x16xf32>
    %59 = arith.addf %49, %58 : vector<128x16xf32>
    %c1_62 = arith.constant 1 : index
    %c0_63 = arith.constant 0 : index
    %c0_64 = arith.constant 0 : index
    %60 = vector.load %arg9[%c1_62, %c0_63, %c0_64] : memref<3x12x16xbf16, #tpu.memory_space<vmem>>, vector<1x12x16xbf16>
    %61 = vector.shape_cast %60 : vector<1x12x16xbf16> to vector<12x16xbf16>
    %c1_65 = arith.constant 1 : index
    %c0_66 = arith.constant 0 : index
    %c0_67 = arith.constant 0 : index
    %62 = vector.load %arg13[%c1_65, %c0_66, %c0_67] : memref<10x16x16xbf16, #tpu.memory_space<vmem>>, vector<8x16x12xbf16>
    %63 = vector.shape_cast %62 : vector<8x16x12xbf16> to vector<128x12xbf16>
    %cst_68 = arith.constant dense<0.000000e+00> : vector<128x16xf32>
    %64 = tpu.matmul %63, %61, %cst_68 {dimension_numbers = #tpu.dot_dimension_numbers<[1], [0], [0], [1], [0, 0, 1, 1], [], []>} : vector<128x12xbf16>, vector<12x16xbf16>, vector<128x16xf32> -> vector<128x16xf32>
    %65 = arith.addf %55, %64 : vector<128x16xf32>
    %c1_69 = arith.constant 1 : index
    %c0_70 = arith.constant 0 : index
    %c4_71 = arith.constant 4 : index
    %66 = vector.load %arg13[%c1_69, %c0_70, %c4_71] : memref<10x16x16xbf16, #tpu.memory_space<vmem>>, vector<8x16x12xbf16>
    %67 = vector.shape_cast %66 : vector<8x16x12xbf16> to vector<128x12xbf16>
    %cst_72 = arith.constant dense<0.000000e+00> : vector<128x16xf32>
    %68 = tpu.matmul %67, %61, %cst_72 {dimension_numbers = #tpu.dot_dimension_numbers<[1], [0], [0], [1], [0, 0, 1, 1], [], []>} : vector<128x12xbf16>, vector<12x16xbf16>, vector<128x16xf32> -> vector<128x16xf32>
    %69 = arith.addf %59, %68 : vector<128x16xf32>
    %c2 = arith.constant 2 : index
    %c0_73 = arith.constant 0 : index
    %c0_74 = arith.constant 0 : index
    %70 = vector.load %arg9[%c2, %c0_73, %c0_74] : memref<3x12x16xbf16, #tpu.memory_space<vmem>>, vector<1x12x16xbf16>
    %71 = vector.shape_cast %70 : vector<1x12x16xbf16> to vector<12x16xbf16>
    %c2_75 = arith.constant 2 : index
    %c0_76 = arith.constant 0 : index
    %c0_77 = arith.constant 0 : index
    %72 = vector.load %arg13[%c2_75, %c0_76, %c0_77] : memref<10x16x16xbf16, #tpu.memory_space<vmem>>, vector<8x16x12xbf16>
    %73 = vector.shape_cast %72 : vector<8x16x12xbf16> to vector<128x12xbf16>
    %cst_78 = arith.constant dense<0.000000e+00> : vector<128x16xf32>
    %74 = tpu.matmul %73, %71, %cst_78 {dimension_numbers = #tpu.dot_dimension_numbers<[1], [0], [0], [1], [0, 0, 1, 1], [], []>} : vector<128x12xbf16>, vector<12x16xbf16>, vector<128x16xf32> -> vector<128x16xf32>
    %75 = arith.addf %65, %74 : vector<128x16xf32>
    %c2_79 = arith.constant 2 : index
    %c0_80 = arith.constant 0 : index
    %c4_81 = arith.constant 4 : index
    %76 = vector.load %arg13[%c2_79, %c0_80, %c4_81] : memref<10x16x16xbf16, #tpu.memory_space<vmem>>, vector<8x16x12xbf16>
    %77 = vector.shape_cast %76 : vector<8x16x12xbf16> to vector<128x12xbf16>
    %cst_82 = arith.constant dense<0.000000e+00> : vector<128x16xf32>
    %78 = tpu.matmul %77, %71, %cst_82 {dimension_numbers = #tpu.dot_dimension_numbers<[1], [0], [0], [1], [0, 0, 1, 1], [], []>} : vector<128x12xbf16>, vector<12x16xbf16>, vector<128x16xf32> -> vector<128x16xf32>
    %79 = arith.addf %69, %78 : vector<128x16xf32>
    %c0_83 = arith.constant 0 : index
    %c0_84 = arith.constant 0 : index
    %80 = vector.load %arg10[%c0_83, %c0_84] : memref<1x16xf32, #tpu.memory_space<vmem>>, vector<1x16xf32>
    %81 = vector.broadcast %80 : vector<1x16xf32> to vector<128x16xf32>
    %82 = arith.addf %75, %81 : vector<128x16xf32>
    %cst_85 = arith.constant 0.000000e+00 : f32
    %83 = vector.broadcast %cst_85 : f32 to vector<128x16xf32>
    %84 = arith.maximumf %82, %83 : vector<128x16xf32>
    %85 = vector.shape_cast %84 : vector<128x16xf32> to vector<8x16x16xf32>
    %86 = vector.broadcast %80 : vector<1x16xf32> to vector<128x16xf32>
    %87 = arith.addf %79, %86 : vector<128x16xf32>
    %cst_86 = arith.constant 0.000000e+00 : f32
    %88 = vector.broadcast %cst_86 : f32 to vector<128x16xf32>
    %89 = arith.maximumf %87, %88 : vector<128x16xf32>
    %90 = vector.shape_cast %89 : vector<128x16xf32> to vector<8x16x16xf32>
    %91 = arith.truncf %85 : vector<8x16x16xf32> to vector<8x16x16xbf16>
    %c0_87 = arith.constant 0 : index
    %c0_88 = arith.constant 0 : index
    %c0_89 = arith.constant 0 : index
    %c0_90 = arith.constant 0 : index
    %92 = vector.load %arg11[%c0_87, %c0_88, %c0_89, %c0_90] : memref<1x8x16x32xbf16, #tpu.memory_space<vmem>>, vector<1x8x16x16xbf16>
    %93 = vector.shape_cast %92 : vector<1x8x16x16xbf16> to vector<8x16x16xbf16>
    %94 = vector.shape_cast %91 : vector<8x16x16xbf16> to vector<1x8x16x16xbf16>
    tpu.vector_store %arg11[%c0_87, %c0_88, %c0_89, %c0_90], %94 {strides = array<i32>} : memref<1x8x16x32xbf16, #tpu.memory_space<vmem>>, vector<1x8x16x16xbf16>,
    %95 = arith.truncf %90 : vector<8x16x16xf32> to vector<8x16x16xbf16>
    %c0_91 = arith.constant 0 : index
    %c0_92 = arith.constant 0 : index
    %c0_93 = arith.constant 0 : index
    %c16_94 = arith.constant 16 : index
    %96 = vector.load %arg11[%c0_91, %c0_92, %c0_93, %c16_94] : memref<1x8x16x32xbf16, #tpu.memory_space<vmem>>, vector<1x8x16x16xbf16>
    %97 = vector.shape_cast %96 : vector<1x8x16x16xbf16> to vector<8x16x16xbf16>
    %98 = vector.shape_cast %95 : vector<8x16x16xbf16> to vector<1x8x16x16xbf16>
    tpu.vector_store %arg11[%c0_91, %c0_92, %c0_93, %c16_94], %98 {strides = array<i32>} : memref<1x8x16x32xbf16, #tpu.memory_space<vmem>>, vector<1x8x16x16xbf16>,
    return
  }
  func.func @transform_0(%arg0: i32, %arg1: i32) -> (i32, i32, i32, i32) {
    %c0_i32 = arith.constant 0 : i32
    %c0_i32_0 = arith.constant 0 : i32
    %c0_i32_1 = arith.constant 0 : i32
    return %arg0, %arg1, %c0_i32, %c0_i32_0 : i32, i32, i32, i32
  }
  func.func @transform_1(%arg0: i32, %arg1: i32) -> (i32, i32, i32, i32) {
    %c8_i32 = arith.constant 8 : i32
    %0 = arith.muli %arg1, %c8_i32 : i32
    %c1_i32 = arith.constant 1 : i32
    %1 = arith.subi %0, %c1_i32 : i32
    %c0_i32 = arith.constant 0 : i32
    %2 = arith.maxsi %1, %c0_i32 : i32
    %c0_i32_0 = arith.constant 0 : i32
    %c0_i32_1 = arith.constant 0 : i32
    %c0_i32_2 = arith.constant 0 : i32
    return %arg0, %2, %c0_i32_0, %c0_i32_1 : i32, i32, i32, i32
  }
  func.func @transform_2(%arg0: i32, %arg1: i32) -> (i32, i32, i32, i32) {
    %c8_i32 = arith.constant 8 : i32
    %0 = arith.muli %arg1, %c8_i32 : i32
    %c8_i32_0 = arith.constant 8 : i32
    %1 = arith.addi %0, %c8_i32_0 : i32
    %c15_i32 = arith.constant 15 : i32
    %2 = arith.minsi %1, %c15_i32 : i32
    %c0_i32 = arith.constant 0 : i32
    %c0_i32_1 = arith.constant 0 : i32
    %c0_i32_2 = arith.constant 0 : i32
    return %arg0, %2, %c0_i32, %c0_i32_1 : i32, i32, i32, i32
  }
  func.func @transform_3(%arg0: i32, %arg1: i32) -> (i32, i32) {
    %c0_i32 = arith.constant 0 : i32
    %c0_i32_0 = arith.constant 0 : i32
    %c0_i32_1 = arith.constant 0 : i32
    return %c0_i32, %c0_i32_0 : i32, i32
  }
  func.func @transform_4(%arg0: i32, %arg1: i32) -> (i32, i32) {
    %c0_i32 = arith.constant 0 : i32
    %c0_i32_0 = arith.constant 0 : i32
    %c0_i32_1 = arith.constant 0 : i32
    return %c0_i32, %c0_i32_0 : i32, i32
  }
  func.func @transform_5(%arg0: i32, %arg1: i32) -> (i32, i32) {
    %c0_i32 = arith.constant 0 : i32
    %c0_i32_0 = arith.constant 0 : i32
    %c0_i32_1 = arith.constant 0 : i32
    return %c0_i32, %c0_i32_0 : i32, i32
  }
  func.func @transform_6(%arg0: i32, %arg1: i32) -> (i32, i32) {
    %c0_i32 = arith.constant 0 : i32
    %c0_i32_0 = arith.constant 0 : i32
    %c0_i32_1 = arith.constant 0 : i32
    return %c0_i32, %c0_i32_0 : i32, i32
  }
  func.func @transform_7(%arg0: i32, %arg1: i32) -> (i32, i32, i32) {
    %c0_i32 = arith.constant 0 : i32
    %c0_i32_0 = arith.constant 0 : i32
    %c0_i32_1 = arith.constant 0 : i32
    %c0_i32_2 = arith.constant 0 : i32
    return %c0_i32, %c0_i32_0, %c0_i32_1 : i32, i32, i32
  }
  func.func @transform_8(%arg0: i32, %arg1: i32) -> (i32, i32) {
    %c0_i32 = arith.constant 0 : i32
    %c0_i32_0 = arith.constant 0 : i32
    %c0_i32_1 = arith.constant 0 : i32
    return %c0_i32, %c0_i32_0 : i32, i32
  }
  func.func @transform_9(%arg0: i32, %arg1: i32) -> (i32, i32, i32, i32) {
    %c0_i32 = arith.constant 0 : i32
    %c0_i32_0 = arith.constant 0 : i32
    %c0_i32_1 = arith.constant 0 : i32
    return %arg0, %arg1, %c0_i32, %c0_i32_0 : i32, i32, i32, i32
  }
}

</mosaic_0001>

<bundles_post_ra>
// kernel: tpu_custom_call.1
= control target key start
LH: loop header
LB: loop body
LE: loop exit
PB: predicated region body
PF: predicated region fallthrough
CT: control target
= control target key end

     0   :  { %s9248_s0 = inlined_call_operand.vmem [shape: bf16[2,16,16,4], index: 0, kind: input, shape index: {}]   ;;  %s9249_s1 = inlined_call_operand.vmem [shape: bf16[2,16,16,4], index: 1, kind: input, shape index: {}]   ;;  %s9250_s2 = inlined_call_operand.vmem [shape: bf16[2,16,16,4], index: 2, kind: input, shape index: {}]   ;;  %s9251_s3 = inlined_call_operand.vmem [shape: bf16[4,4], index: 3, kind: input, shape index: {}]   ;;  %s9252_s4 = inlined_call_operand.vmem [shape: f32[1,4], index: 4, kind: input, shape index: {}]   ;;  %s9253_s5 = inlined_call_operand.vmem [shape: bf16[8,8], index: 5, kind: input, shape index: {}]   ;;  %s9254_s6 = inlined_call_operand.vmem [shape: f32[1,8], index: 6, kind: input, shape index: {}]   ;;  %s9255_s7 = inlined_call_operand.vmem [shape: bf16[3,12,16], index: 7, kind: input, shape index: {}]   ;;  %s9256_s8 = inlined_call_operand.vmem [shape: f32[1,16], index: 8, kind: input, shape index: {}]   ;;  %s9257_s9 = inlined_call_operand.hbm [shape: bf16[2,16,16,32], index: 9, kind: output, shape index: {}]  }
   0x1   :  { %9270 = sst [smem:[#allocation19_spill]] %s9251_s3 }
   0x2   :  { %14 = vsyncpa [#allocation5], 0 }
   0x3   :  { %16 = vsyncpa [#allocation5 + $0x1], 0  ;;  %s7578_s30 = smov 0   ;;  %s7580_s10 = smov 0  }
   0x4   :  { %s7582_s11 = smov 0   ;;  %s7584_s12 = smov 0  }
   0x5   :  { %s7586_s13 = smov 0   ;;  %s7588_s14 = smov 0  }
   0x6   :  { %s7590_s15 = smov 0   ;;  %s7592_s16 = smov 0  }
   0x7 LB: > { %9271 = sst [smem:[#allocation7_spill]] %s7487_s30  ;;  %s6661_s17 = sadd.s32 4294967295, %s7515_s16   ;;  %s7515_s16 = sphi %s7592_s16, %s22_s16   ;;  %s7511_s15 = sphi %s7590_s15, %s9329_s15   ;;  %s7507_s14 = sphi %s7588_s14, %s9328_s14   ;;  %s7503_s13 = sphi %s7586_s13, %s9327_s13   ;;  %s7499_s12 = sphi %s7584_s12, %s9326_s12   ;;  %s7495_s11 = sphi %s7582_s11, %s9325_s11   ;;  %s7491_s10 = sphi %s7580_s10, %s9331_s10   ;;  %s7487_s30 = sphi %s7578_s30, %s9330_s30  }
   0x8   : > { %9272 = sst [smem:[#allocation8_spill]] %s7495_s11  ;;  %s6662_s18 = sadd.s32 4294967294, %s7515_s16  }
   0x9   : > { %9273 = sst [smem:[#allocation9_spill]] %s7507_s14  ;;  %s31_s19 = sadd.s32 1, %s7507_s14 }
   0xa   : > { %9274 = sst [smem:[#allocation10_spill]] %s7511_s15  ;;  %p32_p0 = scmp.ge.s32.totalorder %s31_s19, 2 }
   0xb   : > { %s34_s20 = sadd.s32 1, %s7511_s15  ;;  %p279_p1 = scmp.ne.s32.totalorder %s7495_s11, %s7491_s10 }
   0xc   : > { %p280_p2 = scmp.eq.s32.totalorder %s6661_s17, 3  ;;  %s9333_s19 = smov (%p32_p0, %s31_s19), 0 }
   0xd   : > { %9275 = sst [smem:[#allocation11_spill]] %s9333_s19  ;;  %s9335_s20 = smov (!%p32_p0, %s34_s20), %s7511_s15 }
   0xe   : > { %s265_s21 = ssub.s32 %s7507_s14, %s9333_s19  ;;  %p7629_p3 = por %p280_p2, %p279_p1 }
   0xf   : > { %p36_p4 = scmp.ge.s32.totalorder %s9335_s20, 2  ;;  %p285_p5 = scmp.ne.s32.totalorder %s7491_s10, %s7487_s30 }
  0x10   : > { %p286_p6 = scmp.eq.s32.totalorder %s6662_s18, 3  ;;  %p6671_p7 = scmp.ge.s32.totalorder %s7515_s16, 1 }
  0x11   : > { %s9337_s20 = smov (%p36_p4, %s9335_s20), 0  ;;  %p376_p9 = scmp.lt.s32.totalorder %s7515_s16, 5 }
  0x12   : > { %9277 = sst [smem:[#allocation12_spill]] %s9337_s20  ;;  %p7638_p8 = por %p286_p6, %p285_p5 }
  0x13   : > { %s264_s24 = ssub.s32 %s7511_s15, %s9337_s20  ;;  %s269_s25 = sadd.s32 1, %s7495_s11 }
  0x14   : > { %s9278_s23 = scalar_select %p7638_p8, 1, 0 }
  0x15   : > { %s266_s26 = sor.u32 %s265_s21, %s264_s24  ;;  %p377_p10 = pnand %p6671_p7, %p376_p9 }
  0x16   : > { %9279 = sst [smem:[#allocation13_spill]] %s9278_s23  ;;  %p267_p11 = scmp.eq.s32.totalorder %s266_s26, 0 }
  0x17   : > { %380 = sbr.rel (%p377_p10) target bundleno = 1511 (0x5e7), region = 56 }
  0x18   : > { %s7647_s27 = scalar_select %p267_p11, %s7495_s11, %s269_s25  }
  0x1a   : > { %9280 = sst [smem:[#allocation14_spill]] %s7647_s27 }
  0x1e   : > { %s9262_s28 = sand.u32 1, %s7491_s10   ;;  %s9281_s3 = sld [smem:[#allocation19_spill]]  ;;  %vm599_vm0 = vcmask 1041408   ;;  %vm568_vm1 = vcmask 31744   ;;  %v7682_v12 = vld [vmem:[%s9252_s4] ss:$0 sm:$0xff] }
  0x1f   : > { %s6673_s18 = sshll.u32 %s7499_s12, 3  ;;  %s7656_s20 = sshll.u32 %s9262_s28, 6  ;;  %vm796_vm2 = vsmask.f32 256  ;;  %vm1007_vm3 = vcmask 24576   ;;  %vm999_vm4 = vcmask 27648  }
  0x20   : > { %p444_p12 = scmp.lt.s32.totalorder %s7503_s13, 1  ;;  %p446_p13 = scmp.lt.s32.totalorder %s6673_s18, 15  ;;  %vm1000_vm5 = vsmask.f32 7938  ;;  %vm797_vm6 = vsmask.f32 4368  ;;  %vm7716_vm8 = vmand %vm1007_vm3, %vm796_vm2 }
  0x21   : > { %s6678_s26 = sadd.s32 4294967295, %s6673_s18  ;;  %s472_s17 = sadd.s32 8, %s6673_s18  ;;  %vm1186_vm7 = vcmask 57376   ;;  %v9282_v51 = vmov 0  ;;  %v1016_v52 = vld [vmem:[#allocation2 + $0x14] sm:$0x1]  ;;  %vm7728_vm9 = vmand %vm999_vm4, %vm1000_vm5 }
  0x22   : > { %s445_s21 = scalar_select %p444_p12, %s7503_s13, 1  ;;  %v9283_v51 = vsel %vm7716_vm8, 4294967295, %v9282_v51  ;;  %v1009_v57 = vld [vmem:[#allocation2 + $0x8] sm:$0x1]  ;;  %vm7754_vm10 = vmor %vm796_vm2, %vm797_vm6  ;;  %vm2724_vm12 = vcmask 1043456   ;;  %vm7519_vm13 = vmmov 0  }
  0x23   : > { %s447_s24 = scalar_select %p446_p13, %s6673_s18, 15  ;;  %9284 = vst [vmem:[#allocation15_spill] sm:$0xff] %v9283_v51  ;;  %vm7765_vm11 = vmand %vm1186_vm7, %vm796_vm2  ;;  %vm1135_vm14 = vcmask 60448   ;;  %vm2690_vm15 = vcmask 64512   ;;  %vm5316_vm2 = vcmask 130151  }
  0x24   : > { %v510_v0 = vld [vmem:[%s9281_s3] sm:$0x3]  ;;  %s6675_s25 = sshll.u32 %s445_s21, 5  ;;  %p456_p0 = scmp.gt.s32.totalorder %s6678_s26, 0  ;;  %vm5317_vm3 = vsmask.f32 7966 }
  0x25   : > { %7319 = vmatprep.subr.msk.bf16.mxu0 %vm599_vm0, %v510_v0  ;;  %v601_v1 = vsel %vm599_vm0, %v510_v0, 0  ;;  %s6674_s19 = sshll.u32 %s447_s24, 1  ;;  %p6679_p1 = scmp.lt.s32.totalorder %s6678_s26, 15  ;;  %vm5124_vm0 = vsmask.f32 7424 }
  0x26   : > { %7078 = vmatpush3.bf16.msra.mxu0 %v601_v1  ;;  %s450_s15 = sadd.s32 %s6675_s25, %s6674_s19  ;;  %p473_p2 = scmp.lt.s32.totalorder %s472_s17, 15  ;;  %v1002_v1 = vld [vmem:[#allocation2] sm:$0xf] }
  0x27   : > { %s6676_s29 = sshll.u32 %s450_s15, 2  ;;  %s9339_s26 = smov (!%p456_p0, %s6678_s26), 0 }
  0x28   : > { %s452_s28 = scalar_lea.vmem %s9248_s0, %s6676_s29  ;;  %s9341_s17 = smov (!%p473_p2, %s472_s17), 15 }
  0x29   : > { %s9343_s26 = smov (!%p6679_p1, %s9339_s26), 15  ;;  %s9345_s17 = smov (!%p473_p2, %s9341_s17), 15  ;;  %v7408_v2 = vld [vmem:[%s452_s28] sm:$0xff]   ;;  %v7409_v3 = vld [vmem:[%s452_s28 + $0x8] sm:$0xff]   ;;  %v7410_v5 = vld [vmem:[%s452_s28 + $0x10] sm:$0xff]  }
  0x2a   : > { %s6684_s27 = sshll.u32 %s9343_s26, 1  ;;  %s6691_s23 = sshll.u32 %s9345_s17, 1  ;;  %v7411_v6 = vld [vmem:[%s452_s28 + $0x18] sm:$0xff]   ;;  %v7412_v7 = vld [vmem:[%s452_s28 + $0x20] sm:$0xff]   ;;  %v7413_v8 = vld [vmem:[%s452_s28 + $0x28] sm:$0xff]  }
  0x2b   : > { %s464_s11 = sadd.s32 %s6684_s27, %s6675_s25  ;;  %s481_s24 = sadd.s32 %s6691_s23, %s6675_s25  ;;  %v7414_v9 = vld [vmem:[%s452_s28 + $0x30] sm:$0xff]   ;;  %v7415_v10 = vld [vmem:[%s452_s28 + $0x38] sm:$0xff]  }
  0x2c   : > { %s6686_s21 = sshll.u32 %s464_s11, 2  ;;  %s6693_s18 = sshll.u32 %s481_s24, 2 }
  0x2d   : > { %s466_s15 = scalar_lea.vmem %s9249_s1, %s6686_s21  ;;  %s483_s29 = scalar_lea.vmem %s9250_s2, %s6693_s18 }
  0x2e   : > { %v7407_v4 = vld [vmem:[%s466_s15] sm:$0xff]   ;;  %s7517_s23 = smov 4   ;;  %s7521_s24 = smov 8  }
  0x2f   : > { %7079 = vmatprep.mubr.msk.bf16.mxu0 %vm568_vm1, %v7407_v4  ;;  %v7416_v11 = vld [vmem:[%s483_s29] sm:$0xff]   ;;  %s8956_s19 = scalar_lea.vmem [#allocation4], %s7656_s20  ;;  %p6848_p4 = scmp.ne.s32.totalorder %s7499_s12, 0 }
  0x30   : > { %7080 = vmatmul.mubr.msk.bf16.vlgmr.msra.gmra.mrb[0].mxu0 %vm568_vm1, %v7408_v2  ;;  %vm5353_vm5 = vcmask (!%p6848_p4), 130048  }
  0x31   : > { %7083 = vmatprep.mubr.msk.bf16.mxu0 %vm568_vm1, %v7409_v3 }
  0x38   : > { %7084 = vmatmul.mubr.msk.bf16.gmra.mrb[4].mxu0 %vm568_vm1, %v7410_v5 }
  0x39   : > { %7087 = vmatprep.mubr.msk.bf16.mxu0 %vm568_vm1, %v7411_v6  ;;  %v1012_v6 = vld [vmem:[#allocation2 + $0xc] sm:$0xf] }
  0x40   : > { %7088 = vmatmul.mubr.msk.bf16.gmra.mrb[8].mxu0 %vm568_vm1, %v7412_v7 }
  0x41   : > { %7091 = vmatprep.mubr.msk.bf16.mxu0 %vm568_vm1, %v7413_v8 }
  0x48   : > { %7092 = vmatmul.mubr.msk.bf16.gmra.mrb[12].mxu0 %vm568_vm1, %v7414_v9 }
  0x49   : > { %7095 = vmatprep.mubr.msk.bf16.mxu0 %vm568_vm1, %v7415_v10 }
  0x50   : > { %7096 = vmatmul.mubr.msk.bf16.gmra.mrb[16].mxu0 %vm568_vm1, %v7416_v11  ;;  %vm5275_vm1 = vcmask 130112  }
 0x103   : > { %v7081_v13 = vpop.f32.mrb[0].mxu0 }
 0x104   : > { %v646_v14 = vadd.f32 %v7081_v13, %v7682_v12  ;;  %v637_v15 = vpop.f32.mrb[1].mxu0 }
 0x105   : > { %v638_v16 = vadd.f32 %v7682_v12, %v637_v15  ;;  %v7082_v17 = vpop.f32.mrb[2].mxu0 }
 0x106   : > { %v718_v18 = vmax.f32 %v646_v14, 0.0  ;;  %v649_v19 = vadd.f32 %v7082_v17, %v7682_v12  ;;  %v640_v20 = vpop.f32.mrb[3].mxu0 }
 0x107   : > { %v716_v21 = vmax.f32 %v638_v16, 0.0  ;;  %v641_v22 = vadd.f32 %v7682_v12, %v640_v20 }
 0x108   : > { %v7688_v23 = vpack.c.bf16 %v718_v18, %v718_v18  ;;  %v719_v24 = vmax.f32 %v649_v19, 0.0 }
 0x109   : > { %v7690_v25 = vpack.c.bf16 %v716_v21, %v716_v21  ;;  %v717_v26 = vmax.f32 %v641_v22, 0.0 }
 0x10a   : > { %v817_v27 = vshrl.u32 %v7688_v23, 16  ;;  %v7693_v28 = vpack.c.bf16 %v719_v24, %v719_v24  ;;  %v820_v29 = vshll.u32 %v7688_v23, 16 }
 0x10b   : > { %v800_v30 = vshrl.u32 %v7690_v25, 16  ;;  %v803_v31 = vshll.u32 %v7690_v25, 16  ;;  %v7698_v32 = vpack.c.bf16 %v717_v26, %v717_v26  ;;  %v7085_v33 = vpop.f32.mrb[4].mxu0 }
 0x10c   : > { %v7700_v34 = vrot.slane %v817_v27, 7  ;;  %v825_v35 = vshrl.u32 %v7693_v28, 16  ;;  %v828_v36 = vshll.u32 %v7693_v28, 16  ;;  %v662_v37 = vadd.f32 %v7085_v33, %v7682_v12  ;;  %v653_v38 = vpop.f32.mrb[5].mxu0 }
 0x10d   : > { %v7705_v39 = vrot.slane %v800_v30, 7  ;;  %v808_v40 = vshrl.u32 %v7698_v32, 16  ;;  %v811_v41 = vshll.u32 %v7698_v32, 16  ;;  %v654_v42 = vadd.f32 %v7682_v12, %v653_v38  ;;  %v7086_v43 = vpop.f32.mrb[6].mxu0 }
 0x10e   : > { %v822_v44 = vor.u32 %v820_v29, %v7700_v34  ;;  %v823_v45 = vrot.slane %v7700_v34, 4  ;;  %v827_v46 = vrot.slane %v825_v35, 7  ;;  %v722_v47 = vmax.f32 %v662_v37, 0.0  ;;  %v656_v48 = vpop.f32.mrb[7].mxu0 }
 0x10f   : > { %v805_v49 = vor.u32 %v803_v31, %v7705_v39  ;;  %v806_v50 = vrot.slane %v7705_v39, 4  ;;  %v810_v53 = vrot.slane %v808_v40, 7  ;;  %v720_v54 = vmax.f32 %v654_v42, 0.0  ;;  %v1026_v31 = vld [vmem:[#allocation2 + $0x24] sm:$0xf] }
 0x110   : > { %v7720_v55 = vor.u32 %v828_v36, %v827_v46  ;;  %v832_v56 = vrot.slane %v827_v46, 4  ;;  %v6953_v58 = vpack.c.bf16 %v722_v47, %v722_v47  ;;  %v665_v59 = vadd.f32 %v7086_v43, %v7682_v12  ;;  %v1030_v46 = vld [vmem:[#allocation2 + $0x2c] sm:$0x1] }
 0x111   : > { %v813_v60 = vor.u32 %v811_v41, %v810_v53  ;;  %v815_v61 = vrot.slane %v810_v53, 4  ;;  %v7723_v62 = vpack.c.bf16 %v720_v54, %v720_v54  ;;  %v657_v63 = vadd.f32 %v7682_v12, %v656_v48 }
 0x112   : > { %v1017_v2 = vsel %vm7716_vm8, %v832_v56, %v1016_v52  ;;  %v851_v3 = vshrl.u32 %v6953_v58, 16  ;;  %v854_v4 = vshll.u32 %v6953_v58, 16  ;;  %v723_v5 = vmax.f32 %v665_v59, 0.0  ;;  %1087 = vrot.lane.b32.xlu0 %v6953_v58, %s7517_s23 }
 0x113   : > { %1018 = vst [vmem:[#allocation2 + $0x14] sm:$0x1] %v1017_v2  ;;  %v1010_v7 = vsel %vm7716_vm8, %v815_v61, %v1009_v57  ;;  %v834_v8 = vshrl.u32 %v7723_v62, 16  ;;  %v837_v9 = vshll.u32 %v7723_v62, 16  ;;  %v721_v10 = vmax.f32 %v657_v63, 0.0  ;;  %v7089_v11 = vpop.f32.mrb[8].mxu0 }
 0x114   : > { %1011 = vst [vmem:[#allocation2 + $0x8] sm:$0x1] %v1010_v7  ;;  %v7739_v13 = vrot.slane %v851_v3, 7  ;;  %v6954_v14 = vpack.c.bf16 %v723_v5, %v723_v5  ;;  %v678_v15 = vadd.f32 %v7089_v11, %v7682_v12  ;;  %v669_v16 = vpop.f32.mrb[9].mxu0  ;;  %v1003_v17 = vsel %vm7728_vm9, %v805_v49, %v1002_v1  ;;  %v1023_v57 = vld [vmem:[#allocation2 + $0x20] sm:$0x1] }
 0x115   : > { %v7744_v18 = vrot.slane %v834_v8, 7  ;;  %v6952_v19 = vpack.c.bf16 %v721_v10, %v721_v10  ;;  %v670_v20 = vadd.f32 %v7682_v12, %v669_v16  ;;  %v7090_v21 = vpop.f32.mrb[10].mxu0  ;;  %1004 = vst [vmem:[#allocation2] sm:$0xf] %v1003_v17  ;;  %v1013_v22 = vsel %vm7728_vm9, %v822_v44, %v1012_v6 }
 0x116   : > { %v856_v24 = vor.u32 %v854_v4, %v7739_v13  ;;  %v857_v26 = vrot.slane %v7739_v13, 4  ;;  %v859_v27 = vshrl.u32 %v6954_v14, 16  ;;  %v862_v29 = vshll.u32 %v6954_v14, 16  ;;  %1089 = vrot.lane.b32.xlu0 %v6954_v14, %s7517_s23  ;;  %v672_v30 = vpop.f32.mrb[11].mxu0  ;;  %1014 = vst [vmem:[#allocation2 + $0xc] sm:$0xf] %v1013_v22 }
 0x117   : > { %v7759_v35 = vor.u32 %v837_v9, %v7744_v18  ;;  %v840_v36 = vrot.slane %v7744_v18, 4  ;;  %v842_v37 = vshrl.u32 %v6952_v19, 16  ;;  %v845_v38 = vshll.u32 %v6952_v19, 16  ;;  %1085 = vrot.lane.b32.xlu1 %v6952_v19, %s7517_s23 }
 0x118   : > { %v861_v41 = vrot.slane %v859_v27, 7  ;;  %v726_v42 = vmax.f32 %v678_v15, 0.0  ;;  %v724_v43 = vmax.f32 %v670_v20, 0.0  ;;  %v681_v44 = vadd.f32 %v7090_v21, %v7682_v12 }
 0x119   : > { %v844_v47 = vrot.slane %v842_v37, 7  ;;  %v673_v48 = vadd.f32 %v7682_v12, %v672_v30  ;;  %v1027_v49 = vsel %vm7728_vm9, %v856_v24, %v1026_v31  ;;  %v814_v52 = vsel %vm7754_vm10, %v806_v50, %v813_v60 }
 0x11a   : > { %v1191_v53 = vld [vmem:[#allocation2 + $0x14] sm:$0x1]  ;;  %v7777_v54 = vor.u32 %v862_v29, %v861_v41  ;;  %v866_v56 = vrot.slane %v861_v41, 4  ;;  %v6957_v58 = vpack.c.bf16 %v726_v42, %v726_v42  ;;  %v6955_v59 = vpack.c.bf16 %v724_v43, %v724_v43  ;;  %1028 = vst [vmem:[#allocation2 + $0x24] sm:$0xf] %v1027_v49 }
 0x11b   : > { %1006 = vst.msk [vmem:[#allocation2 + $0x4] sm:$0xf] %vm999_vm4, %v814_v52  ;;  %v1192_v61 = vsel %vm7765_vm11, 0, %v1191_v53  ;;  %v1188_v63 = vld [vmem:[#allocation2 + $0x8] sm:$0x1]  ;;  %v7782_v1 = vor.u32 %v845_v38, %v844_v47  ;;  %v849_v39 = vrot.slane %v844_v47, 4 }
 0x11c   : > { %v727_v2 = vmax.f32 %v681_v44, 0.0  ;;  %v7093_v3 = vpop.f32.mrb[12].mxu0  ;;  %1193 = vst [vmem:[#allocation2 + $0x14] sm:$0x1] %v1192_v61  ;;  %v1189_v50 = vsel %vm7765_vm11, 0, %v1188_v63  ;;  %v1031_v60 = vsel %vm7716_vm8, %v866_v56, %v1030_v46  ;;  %v885_v4 = vshrl.u32 %v6957_v58, 16  ;;  %1095 = vrot.lane.b32.xlu0 %v6957_v58, %s7517_s23  ;;  %1091 = vrot.lane.b32.xlu1 %v6955_v59, %s7517_s23 }
 0x11d   : > { %v888_v5 = vshll.u32 %v6957_v58, 16  ;;  %v685_v6 = vpop.f32.mrb[13].mxu0  ;;  %1190 = vst [vmem:[#allocation2 + $0x8] sm:$0x1] %v1189_v50  ;;  %1032 = vst [vmem:[#allocation2 + $0x2c] sm:$0x1] %v1031_v60  ;;  %v1024_v7 = vsel %vm7716_vm8, %v849_v39, %v1023_v57  ;;  %v694_v16 = vadd.f32 %v7093_v3, %v7682_v12 }
 0x11e   : > { %v868_v8 = vshrl.u32 %v6955_v59, 16  ;;  %v871_v9 = vshll.u32 %v6955_v59, 16  ;;  %v6958_v10 = vpack.c.bf16 %v727_v2, %v727_v2  ;;  %v7094_v11 = vpop.f32.mrb[14].mxu0  ;;  %1025 = vst [vmem:[#allocation2 + $0x20] sm:$0x1] %v1024_v7  ;;  %v7792_v14 = vrot.slane %v885_v4, 7 }
 0x11f   : > { %v725_v15 = vmax.f32 %v673_v48, 0.0  ;;  %v686_v17 = vadd.f32 %v7682_v12, %v685_v6  ;;  %v688_v19 = vpop.f32.mrb[15].mxu0  ;;  %v697_v24 = vadd.f32 %v7094_v11, %v7682_v12  ;;  %v730_v31 = vmax.f32 %v694_v16, 0.0  ;;  %v1044_v43 = vld [vmem:[#allocation2 + $0x44] sm:$0x1] }
 0x120   : > { %v7796_v20 = vrot.slane %v868_v8, 7  ;;  %v893_v21 = vshrl.u32 %v6958_v10, 16  ;;  %v896_v22 = vshll.u32 %v6958_v10, 16  ;;  %v7800_v27 = vor.u32 %v888_v5, %v7792_v14  ;;  %v1037_v53 = vld [vmem:[#allocation2 + $0x38] sm:$0x1] }
 0x121   : > { %v891_v29 = vrot.slane %v7792_v14, 4  ;;  %v6956_v30 = vpack.c.bf16 %v725_v15, %v725_v15  ;;  %v728_v42 = vmax.f32 %v686_v17, 0.0  ;;  %v6961_v47 = vpack.c.bf16 %v730_v31, %v730_v31 }
 0x122   : > { %v7804_v37 = vor.u32 %v871_v9, %v7796_v20  ;;  %v874_v38 = vrot.slane %v7796_v20, 4  ;;  %v895_v41 = vrot.slane %v893_v21, 7  ;;  %v731_v48 = vmax.f32 %v697_v24, 0.0  ;;  %v1068_v20 = vld [vmem:[#allocation2 + $0x6c] sm:$0xf] }
 0x123   : > { %v876_v44 = vshrl.u32 %v6956_v30, 16  ;;  %v879_v46 = vshll.u32 %v6956_v30, 16  ;;  %1093 = vrot.lane.b32.xlu1 %v6956_v30, %s7517_s23  ;;  %v6959_v56 = vpack.c.bf16 %v728_v42, %v728_v42  ;;  %v689_v57 = vadd.f32 %v7682_v12, %v688_v19  ;;  %v7097_v58 = vpop.f32.mrb[16].mxu0 }
 0x124   : > { %v7808_v49 = vor.u32 %v896_v22, %v895_v41  ;;  %v900_v52 = vrot.slane %v895_v41, 4  ;;  %v1197_v59 = vld [vmem:[#allocation2 + $0x2c] sm:$0x1]  ;;  %v919_v63 = vshrl.u32 %v6961_v47, 16  ;;  %v922_v39 = vshll.u32 %v6961_v47, 16  ;;  %v701_v3 = vpop.f32.mrb[17].mxu0 }
 0x125   : > { %v878_v61 = vrot.slane %v876_v44, 7  ;;  %v7811_v2 = vpack.c.bf16 %v731_v48, %v731_v48  ;;  %v1198_v50 = vsel %vm7765_vm11, 0, %v1197_v59  ;;  %v1194_v60 = vld [vmem:[#allocation2 + $0x20] sm:$0x1]  ;;  %v902_v5 = vshrl.u32 %v6959_v56, 16  ;;  %1099 = vrot.lane.b32.xlu0 %v6959_v56, %s7517_s23  ;;  %v7098_v7 = vpop.f32.mrb[18].mxu0 }
 0x126   : > { %v1045_v4 = vsel %vm7716_vm8, %v900_v52, %v1044_v43  ;;  %v905_v6 = vshll.u32 %v6959_v56, 16  ;;  %1199 = vst [vmem:[#allocation2 + $0x2c] sm:$0x1] %v1198_v50  ;;  %v1195_v8 = vsel %vm7765_vm11, 0, %v1194_v60  ;;  %v7822_v15 = vrot.slane %v919_v63, 7  ;;  %v704_v16 = vpop.f32.mrb[19].mxu0 }
 0x127   : > { %1046 = vst [vmem:[#allocation2 + $0x44] sm:$0x1] %v1045_v4  ;;  %v7820_v9 = vor.u32 %v879_v46, %v878_v61  ;;  %v883_v11 = vrot.slane %v878_v61, 4  ;;  %1097 = vrot.lane.b32.xlu1 %v6958_v10, %s7517_s23  ;;  %1196 = vst [vmem:[#allocation2 + $0x20] sm:$0x1] %v1195_v8  ;;  %v7825_v17 = vrot.slane %v902_v5, 7  ;;  %v710_v41 = vadd.f32 %v7097_v58, %v7682_v12 }
 0x128   : > { %v927_v19 = vshrl.u32 %v7811_v2, 16  ;;  %v930_v21 = vshll.u32 %v7811_v2, 16  ;;  %v729_v22 = vmax.f32 %v689_v57, 0.0  ;;  %v7832_v30 = vor.u32 %v922_v39, %v7822_v15  ;;  %v1058_v46 = vld [vmem:[#allocation2 + $0x5c] sm:$0x1] }
 0x129   : > { %v1038_v24 = vsel %vm7716_vm8, %v883_v11, %v1037_v53  ;;  %v925_v31 = vrot.slane %v7822_v15, 4  ;;  %v7837_v10 = vor.u32 %v905_v6, %v7825_v17  ;;  %v908_v42 = vrot.slane %v7825_v17, 4  ;;  %1103 = vrot.lane.b32.xlu0 %v6961_v47, %s7517_s23  ;;  %v1040_v6 = vld [vmem:[#allocation2 + $0x3c] sm:$0xf]  ;;  %v1051_v8 = vld [vmem:[#allocation2 + $0x50] sm:$0x1] }
 0x12a   : > { %1039 = vst [vmem:[#allocation2 + $0x38] sm:$0x1] %v1038_v24  ;;  %v929_v43 = vrot.slane %v927_v19, 7  ;;  %v6960_v44 = vpack.c.bf16 %v729_v22, %v729_v22  ;;  %v734_v48 = vmax.f32 %v710_v41, 0.0  ;;  %v702_v52 = vadd.f32 %v7682_v12, %v701_v3 }
 0x12b   : > { %v713_v53 = vadd.f32 %v7098_v7, %v7682_v12  ;;  %v705_v56 = vadd.f32 %v7682_v12, %v704_v16  ;;  %v848_v12 = vsel %vm7754_vm10, %v840_v36, %v7782_v1  ;;  %v865_v5 = vsel %vm7754_vm10, %v857_v26, %v7777_v54  ;;  %v1033_v26 = vld [vmem:[#allocation2 + $0x30] sm:$0xf] }
 0x12c   : > { %v7844_v57 = vor.u32 %v930_v21, %v929_v43  ;;  %v934_v58 = vrot.slane %v929_v43, 4  ;;  %v910_v59 = vshrl.u32 %v6960_v44, 16  ;;  %v913_v61 = vshll.u32 %v6960_v44, 16  ;;  %1101 = vrot.lane.b32.xlu1 %v6960_v44, %s7517_s23  ;;  %1022 = vst.msk [vmem:[#allocation2 + $0x1c] sm:$0xf] %vm999_vm4, %v848_v12 }
 0x12d   : > { %v6965_v63 = vpack.c.bf16 %v734_v48, %v734_v48  ;;  %v732_v39 = vmax.f32 %v702_v52, 0.0  ;;  %v735_v50 = vmax.f32 %v713_v53, 0.0  ;;  %v733_v60 = vmax.f32 %v705_v56, 0.0  ;;  %1075 = vrot.lane.b32.xlu0 %v7690_v25, %s7517_s23  ;;  %1029 = vst.msk [vmem:[#allocation2 + $0x28] sm:$0xf] %vm999_vm4, %v865_v5 }
 0x12e   : > { %v1203_v47 = vld [vmem:[#allocation2 + $0x44] sm:$0x1]  ;;  %v1059_v4 = vsel %vm7716_vm8, %v934_v58, %v1058_v46  ;;  %v912_v3 = vrot.slane %v910_v59, 7  ;;  %v1041_v24 = vsel %vm7728_vm9, %v7800_v27, %v1040_v6  ;;  %v1047_v48 = vld [vmem:[#allocation2 + $0x48] sm:$0xf]  ;;  %v7518_v17 = vmov 0.0  }
 0x12f   : > { %v1204_v7 = vsel %vm7765_vm11, 0, %v1203_v47  ;;  %1060 = vst [vmem:[#allocation2 + $0x5c] sm:$0x1] %v1059_v4  ;;  %v953_v11 = vshrl.u32 %v6965_v63, 16  ;;  %v956_v25 = vshll.u32 %v6965_v63, 16  ;;  %v6963_v16 = vpack.c.bf16 %v732_v39, %v732_v39  ;;  %7099 = vmatprep.subr.bf16.mxu0 %v7518_v17  ;;  %7253 = vmatprep.subr.bf16.mxu1 %v7518_v17 }
 0x130   : > { %1205 = vst [vmem:[#allocation2 + $0x44] sm:$0x1] %v1204_v7  ;;  %v915_v18 = vor.u32 %v913_v61, %v912_v3  ;;  %v917_v36 = vrot.slane %v912_v3, 4  ;;  %v7865_v13 = vpack.c.bf16 %v735_v50, %v735_v50  ;;  %v7867_v1 = vpack.c.bf16 %v733_v60, %v733_v60  ;;  %1042 = vst [vmem:[#allocation2 + $0x3c] sm:$0xf] %v1041_v24 }
 0x131   : > { %v1200_v54 = vld [vmem:[#allocation2 + $0x38] sm:$0x1]  ;;  %v7869_v19 = vrot.slane %v953_v11, 7  ;;  %v936_v21 = vshrl.u32 %v6963_v16, 16  ;;  %v939_v22 = vshll.u32 %v6963_v16, 16  ;;  %1107 = vrot.lane.b32.xlu1 %v6963_v16, %s7517_s23  ;;  %1105 = vrot.lane.b32.xlu0 %v7811_v2, %s7517_s23  ;;  %v1034_v2 = vsel %vm7728_vm9, %v7804_v37, %v1033_v26 }
 0x132   : > { %v1201_v41 = vsel %vm7765_vm11, 0, %v1200_v54  ;;  %v1052_v43 = vsel %vm7716_vm8, %v917_v36, %v1051_v8  ;;  %v961_v44 = vshrl.u32 %v7865_v13, 16  ;;  %v964_v46 = vshll.u32 %v7865_v13, 16  ;;  %v1054_v58 = vld [vmem:[#allocation2 + $0x54] sm:$0xf]  ;;  %7113 = vmatprep.mubr.msk.bf16.mxu1 %vm7519_vm13, %v7518_v17  ;;  %7101 = vmatprep.mubr.msk.bf16.mxu0 %vm7519_vm13, %v7518_v17 }
 0x133   : > { %1202 = vst [vmem:[#allocation2 + $0x38] sm:$0x1] %v1201_v41  ;;  %1053 = vst [vmem:[#allocation2 + $0x50] sm:$0x1] %v1052_v43  ;;  %v958_v52 = vor.u32 %v956_v25, %v7869_v19  ;;  %v959_v27 = vrot.slane %v7869_v19, 4  ;;  %v7885_v53 = vrot.slane %v936_v21, 7  ;;  %v882_v60 = vsel %vm7754_vm10, %v874_v38, %v7820_v9 }
 0x134   : > { %v944_v56 = vshrl.u32 %v7867_v1, 16  ;;  %v963_v59 = vrot.slane %v961_v44, 7  ;;  %v1072_v61 = vld [vmem:[#allocation2 + $0x74] sm:$0x1]  ;;  %v947_v39 = vshll.u32 %v7867_v1, 16  ;;  %v1048_v37 = vsel %vm7728_vm9, %v7837_v10, %v1047_v48 }
 0x135   : > { %v1065_v50 = vld [vmem:[#allocation2 + $0x68] sm:$0x1]  ;;  %v941_v47 = vor.u32 %v939_v22, %v7885_v53  ;;  %v942_v4 = vrot.slane %v7885_v53, 4  ;;  %1079 = vrot.lane.b32.xlu1 %v7688_v23, %s7517_s23  ;;  %1035 = vst [vmem:[#allocation2 + $0x30] sm:$0xf] %v1034_v2  ;;  %1111 = vrot.lane.b32.xlu0 %v6965_v63, %s7517_s23  ;;  %v899_v23 = vsel %vm7754_vm10, %v891_v29, %v7808_v49  ;;  %v1289_v36 = vlaneseq }
 0x136   : > { %v946_v3 = vrot.slane %v944_v56, 7  ;;  %1036 = vst.msk [vmem:[#allocation2 + $0x34] sm:$0xf] %vm999_vm4, %v882_v60  ;;  %v1061_v12 = vld [vmem:[#allocation2 + $0x60] sm:$0xf]  ;;  %v966_v6 = vor.u32 %v964_v46, %v963_v59  ;;  %v968_v38 = vrot.slane %v963_v59, 4  ;;  %v1055_v9 = vsel %vm7728_vm9, %v7832_v30, %v1054_v58 }
 0x137   : > { %v1209_v5 = vld [vmem:[#allocation2 + $0x5c] sm:$0x1]  ;;  %1049 = vst [vmem:[#allocation2 + $0x48] sm:$0xf] %v1048_v37  ;;  %v2068_v10 = vld [vmem:[%s9253_s5] sm:$0xf]  ;;  %v916_v14 = vsel %vm7754_vm10, %v908_v42, %v915_v18  ;;  %v1062_v30 = vsel %vm7728_vm9, %v941_v47, %v1061_v12  ;;  %v933_v25 = vsel %vm7754_vm10, %v925_v31, %v7844_v57  ;;  %v1069_v16 = vsel %vm7728_vm9, %v958_v52, %v1068_v20 }
 0x138   : > { %v1210_v7 = vsel %vm7765_vm11, 0, %v1209_v5  ;;  %v949_v8 = vor.u32 %v947_v39, %v946_v3  ;;  %v951_v63 = vrot.slane %v946_v3, 4  ;;  %1043 = vst.msk [vmem:[#allocation2 + $0x40] sm:$0xf] %vm999_vm4, %v899_v23  ;;  %1056 = vst [vmem:[#allocation2 + $0x54] sm:$0xf] %v1055_v9  ;;  %v1073_v49 = vsel %vm7716_vm8, %v968_v38, %v1072_v61 }
 0x139   : > { %v1019_v29 = vld [vmem:[#allocation2 + $0x18] sm:$0xf]  ;;  %1211 = vst [vmem:[#allocation2 + $0x5c] sm:$0x1] %v1210_v7  ;;  %1050 = vst.msk [vmem:[#allocation2 + $0x4c] sm:$0xf] %vm999_vm4, %v916_v14  ;;  %1077 = vrot.lane.b32.xlu1 %v7698_v32, %s7517_s23  ;;  %1081 = vrot.lane.b32.xlu0 %v7693_v28, %s7517_s23  ;;  %v831_v15 = vsel %vm7754_vm10, %v823_v45, %v7720_v55  ;;  %v967_v28 = vsel %vm7754_vm10, %v959_v27, %v966_v6 }
 0x13a   : > { %1074 = vst [vmem:[#allocation2 + $0x74] sm:$0x1] %v1073_v49  ;;  %v1066_v11 = vsel %vm7716_vm8, %v951_v63, %v1065_v50  ;;  %1063 = vst [vmem:[#allocation2 + $0x60] sm:$0xf] %v1062_v30  ;;  %v2726_v42 = vsel %vm2724_vm12, %v2068_v10, 0  ;;  %v1020_v32 = vsel %vm7728_vm9, %v7759_v35, %v1019_v29  ;;  %v950_v34 = vsel %vm7754_vm10, %v942_v4, %v949_v8 }
 0x13b   : > { %v1206_v18 = vld [vmem:[#allocation2 + $0x50] sm:$0x1]  ;;  %1067 = vst [vmem:[#allocation2 + $0x68] sm:$0x1] %v1066_v11  ;;  %7100 = vmatpush3.bf16.msra.mxu0 %v2726_v42  ;;  %1057 = vst.msk [vmem:[#allocation2 + $0x58] sm:$0xf] %vm999_vm4, %v933_v25  ;;  %7254 = vmatpush3.bf16.msra.mxu1 %v2726_v42 }
 0x13c   : > { %1070 = vst [vmem:[#allocation2 + $0x6c] sm:$0xf] %v1069_v16  ;;  %v1207_v31 = vsel %vm7765_vm11, 0, %v1206_v18  ;;  %1021 = vst [vmem:[#allocation2 + $0x18] sm:$0xf] %v1020_v32 }
 0x13d   : > { %1015 = vst.msk [vmem:[#allocation2 + $0x10] sm:$0xf] %vm999_vm4, %v831_v15  ;;  %1208 = vst [vmem:[#allocation2 + $0x50] sm:$0x1] %v1207_v31  ;;  %1083 = vrot.lane.b32.xlu1 %v7723_v62, %s7517_s23  ;;  %1109 = vrot.lane.b32.xlu0 %v7867_v1, %s7517_s23  ;;  %v7520_v62 = vmov 1966171168  }
 0x13e   : > { %1071 = vst.msk [vmem:[#allocation2 + $0x70] sm:$0xf] %vm999_vm4, %v967_v28  ;;  %1064 = vst.msk [vmem:[#allocation2 + $0x64] sm:$0xf] %vm999_vm4, %v950_v34  ;;  %v1287_v57 = vunpack.c.l.s4 %v7520_v62 }
 0x13f   : > { %v6743_v24 = vld.sshfl [vmem:[#allocation2 + $0x20] sm:$0x1 pattern:$0x75316420]  ;;  %vm8902_vm4 = vmand %vm5316_vm2, %vm5317_vm3 }
 0x140   : > { %v1288_v54 = vunpack.c.0.s8 %v1287_v57  ;;  %v6746_v43 = vld.sshfl [vmem:[#allocation2 + $0x2c] sm:$0x1 pattern:$0x75316420] }
 0x141   : > { %v1215_v45 = vld [vmem:[#allocation2 + $0x74] sm:$0x1]  ;;  %1113 = vrot.lane.b32.xlu1 %v7865_v13, %s7517_s23  ;;  %v1290_v13 = vshrl.u32 %v1289_v36, 7 }
 0x142   : > { %v1216_v55 = vsel %vm7765_vm11, 0, %v1215_v45  ;;  %v1212_v0 = vld [vmem:[#allocation2 + $0x68] sm:$0x1] }
 0x143   : > { %1217 = vst [vmem:[#allocation2 + $0x74] sm:$0x1] %v1216_v55  ;;  %v1213_v33 = vsel %vm7765_vm11, 0, %v1212_v0  ;;  %v7985_v41 = vsub.s32 %v1288_v54, %v1290_v13 }
 0x144   : > { %1214 = vst [vmem:[#allocation2 + $0x68] sm:$0x1] %v1213_v33  ;;  %v7987_v44 = vld.sshfl [vmem:[#allocation2 + $0x38] sm:$0x1 pattern:$0x75316420] }
 0x145   : > { %v7999_v39 = vld.sshfl [vmem:[#allocation2 + $0x44] sm:$0x1 pattern:$0x75316420]  ;;  %v1463_v60 = vrot.slane %v6743_v24, %v7985_v41  ;;  %v1525_v47 = vrot.slane %v6746_v43, %v7985_v41  ;;  %v1587_v4 = vrot.slane %v7987_v44, %v7985_v41 }
 0x146   : > { %v1649_v7 = vrot.slane %v7999_v39, %v7985_v41  ;;  %v8012_v8 = vld.sshfl [vmem:[#allocation2 + $0x14] sm:$0x1 pattern:$0x75316420] }
 0x147   : > { %v8018_v11 = vld.sshfl [vmem:[#allocation2 + $0x8] sm:$0x1 pattern:$0x75316420]  ;;  %v1401_v13 = vrot.slane %v8012_v8, %v7985_v41 }
 0x148   : > { %v8022_v15 = vld.sshfl [vmem:[#allocation2 + $0x5c] sm:$0x1 pattern:$0x75316420]  ;;  %v1339_v54 = vrot.slane %v8018_v11, %v7985_v41 }
 0x149   : > { %v8025_v45 = vld.sshfl [vmem:[#allocation2 + $0x50] sm:$0x1 pattern:$0x75316420]  ;;  %v1773_v24 = vrot.slane %v8022_v15, %v7985_v41 }
 0x14b   : > { %v8029_v57 = vld.sshfl [vmem:[#allocation2 + $0x68] sm:$0x1 pattern:$0x75316420] }
 0x184   : > { %v1088_v35 = vpop.permute.xlu0 %1087 }
 0x185   : > { %1142 = vst.msk [vmem:[#allocation2 + $0x24] sm:$0xf] %vm1135_vm14, %v1088_v35 }
 0x188   : > { %v1090_v1 = vpop.permute.xlu0 %1089 }
 0x189   : > { %v1086_v26 = vpop.permute.xlu1 %1085  ;;  %1143 = vst.msk [vmem:[#allocation2 + $0x28] sm:$0xf] %vm1135_vm14, %v1090_v1 }
 0x18a   : > { %1141 = vst.msk [vmem:[#allocation2 + $0x1c] sm:$0xf] %vm1135_vm14, %v1086_v26 }
 0x18c   : > { %v1165_v19 = vld [vmem:[#allocation2 + $0x24] sm:$0x1] }
 0x18d   : > { %v1166_v40 = vsel %vm7716_vm8, 0, %v1165_v19 }
 0x18e   : > { %1167 = vst [vmem:[#allocation2 + $0x24] sm:$0x1] %v1166_v40  ;;  %v1096_v21 = vpop.permute.xlu0 %1095  ;;  %v1092_v22 = vpop.permute.xlu1 %1091 }
 0x18f   : > { %1146 = vst.msk [vmem:[#allocation2 + $0x3c] sm:$0xf] %vm1135_vm14, %v1096_v21  ;;  %1144 = vst.msk [vmem:[#allocation2 + $0x30] sm:$0xf] %vm1135_vm14, %v1092_v22 }
 0x190   : > { %v6745_v46 = vld.sshfl [vmem:[#allocation2 + $0x28] sm:$0x33 pattern:$0x75316420] }
 0x191   : > { %v6742_v48 = vld.sshfl [vmem:[#allocation2 + $0x1c] sm:$0x33 pattern:$0x75316420]  ;;  %v1495_v52 = vcombine.high %v6745_v46, %v6745_v46  ;;  %v7990_v27 = vrot.slane %v6745_v46, %v7985_v41 }
 0x192   : > { %v1433_v53 = vcombine.high %v6742_v48, %v6742_v48  ;;  %v7993_v56 = vrot.slane %v6742_v48, %v7985_v41  ;;  %v1711_v48 = vrot.slane %v8025_v45, %v7985_v41 }
 0x193   : > { %v1509_v58 = vrot.slane %v1495_v52, %v7985_v41  ;;  %v1510_v59 = vcombine.high %v7990_v27, %v7990_v27  ;;  %v1958_v61 = vunpack.i.h.s16 %v7990_v27 }
 0x194   : > { %v1447_v2 = vrot.slane %v1433_v53, %v7985_v41  ;;  %v1448_v5 = vcombine.high %v7993_v56, %v7993_v56  ;;  %v1835_v53 = vrot.slane %v8029_v57, %v7985_v41 }
 0x195   : > { %v1094_v50 = vpop.permute.xlu1 %1093  ;;  %v6744_v3 = vld.sshfl [vmem:[#allocation2 + $0x24] sm:$0x33 pattern:$0x75316420]  ;;  %v1960_v37 = vunpack.i.h.s16 %v1509_v58  ;;  %v1511_v12 = vcombine.high %v1509_v58, %v1509_v58  ;;  %v1962_v20 = vunpack.i.h.s16 %v1510_v59  ;;  %v6780_v10 = vpack.i.b16 %v1509_v58, %v1958_v61 }
 0x196   : > { %1145 = vst.msk [vmem:[#allocation2 + $0x34] sm:$0xf] %vm1135_vm14, %v1094_v50  ;;  %v1171_v6 = vld [vmem:[#allocation2 + $0x3c] sm:$0x1]  ;;  %v1168_v38 = vld [vmem:[#allocation2 + $0x30] sm:$0x1]  ;;  %v1471_v23 = vcombine.high %v6744_v3, %v6744_v3  ;;  %v1478_v9 = vrot.slane %v6744_v3, %v7985_v41  ;;  %v1449_v31 = vcombine.high %v1447_v2, %v1447_v2  ;;  %v8027_v55 = vcombine.low %v1447_v2, %v1448_v5 }
 0x197   : > { %v1172_v63 = vsel %vm7716_vm8, 0, %v1171_v6  ;;  %v1169_v14 = vsel %vm7716_vm8, 0, %v1168_v38  ;;  %v1100_v29 = vpop.permute.xlu0 %1099  ;;  %v6781_v49 = vpack.i.b16 %v1510_v59, %v1960_v37  ;;  %v1964_v30 = vunpack.i.h.s16 %v1511_v12 }
 0x198   : > { %1173 = vst [vmem:[#allocation2 + $0x3c] sm:$0x1] %v1172_v63  ;;  %1170 = vst [vmem:[#allocation2 + $0x30] sm:$0x1] %v1169_v14  ;;  %v1485_v25 = vrot.slane %v1471_v23, %v7985_v41  ;;  %v1486_v16 = vcombine.high %v1478_v9, %v1478_v9  ;;  %v1950_v18 = vunpack.i.h.s16 %v1478_v9  ;;  %v6775_v32 = vpack.i.b16 %v1478_v9, %v1463_v60 }
 0x199   : > { %1148 = vst.msk [vmem:[#allocation2 + $0x48] sm:$0xf] %vm1135_vm14, %v1100_v29  ;;  %v1098_v42 = vpop.permute.xlu1 %1097  ;;  %v6782_v28 = vpack.i.b16 %v1511_v12, %v1962_v20  ;;  %v6783_v34 = vpack.i.b16 %v1525_v47, %v1964_v30  ;;  %v2311_v62 = vcombine.low %v6780_v10, %v6781_v49  ;;  %v2290_v52 = vrot.slane %v8027_v55, %v7985_v41 }
 0x19a   : > { %1147 = vst.msk [vmem:[#allocation2 + $0x40] sm:$0xf] %vm1135_vm14, %v1098_v42  ;;  %v1487_v0 = vcombine.high %v1485_v25, %v1485_v25  ;;  %v1952_v33 = vunpack.i.h.s16 %v1485_v25  ;;  %v1954_v35 = vunpack.i.h.s16 %v1486_v16  ;;  %v2308_v1 = vcombine.low %v1449_v31, %v6775_v32 }
 0x19b   : > { %v1104_v36 = vpop.permute.xlu0 %1103  ;;  %v2357_v26 = vcombine.low %v6782_v28, %v6783_v34  ;;  %v6776_v40 = vpack.i.b16 %v1485_v25, %v1950_v18  ;;  %v2339_v50 = vrot.slane %v2311_v62, %v7985_v41 }
 0x19c   : > { %1150 = vst.msk [vmem:[#allocation2 + $0x54] sm:$0xf] %vm1135_vm14, %v1104_v36  ;;  %v1956_v19 = vunpack.i.h.s16 %v1487_v0  ;;  %v6777_v21 = vpack.i.b16 %v1486_v16, %v1952_v33  ;;  %v6778_v58 = vpack.i.b16 %v1487_v0, %v1954_v35  ;;  %v2318_v47 = vrot.slane %v2308_v1, %v7985_v41 }
 0x19d   : > { %v6748_v22 = vld.sshfl [vmem:[#allocation2 + $0x34] sm:$0x33 pattern:$0x75316420]  ;;  %v2367_v20 = vrot.slane %v2357_v26, %v7985_v41 }
 0x19e   : > { %v1102_v43 = vpop.permute.xlu1 %1101  ;;  %v1557_v46 = vcombine.high %v6748_v22, %v6748_v22  ;;  %v6779_v59 = vpack.i.b16 %v7990_v27, %v1956_v19  ;;  %v2309_v61 = vcombine.low %v6776_v40, %v6777_v21  ;;  %v8049_v37 = vrot.slane %v6748_v22, %v7985_v41 }
 0x19f   : > { %1149 = vst.msk [vmem:[#allocation2 + $0x4c] sm:$0xf] %vm1135_vm14, %v1102_v43  ;;  %v1076_v60 = vpop.permute.xlu0 %1075  ;;  %v6747_v3 = vld.sshfl [vmem:[#allocation2 + $0x30] sm:$0x33 pattern:$0x75316420] }
 0x1a0   : > { %v1174_v2 = vld [vmem:[#allocation2 + $0x48] sm:$0x1]  ;;  %v8052_v12 = vrot.slane %v1557_v46, %v7985_v41  ;;  %1136 = vst.msk [vmem:[#allocation2] sm:$0xf] %vm1135_vm14, %v1076_v60  ;;  %v2310_v5 = vcombine.low %v6778_v58, %v6779_v59  ;;  %v2325_v6 = vrot.slane %v2309_v61, %v7985_v41  ;;  %v1533_v38 = vcombine.high %v6747_v3, %v6747_v3 }
 0x1a1   : > { %v1175_v27 = vsel %vm7716_vm8, 0, %v1174_v2  ;;  %v6750_v23 = vld.sshfl [vmem:[#allocation2 + $0x3c] sm:$0x33 pattern:$0x75316420]  ;;  %v1540_v9 = vrot.slane %v6747_v3, %v7985_v41 }
 0x1a2   : > { %1176 = vst [vmem:[#allocation2 + $0x48] sm:$0x1] %v1175_v27  ;;  %v2360_v10 = vcombine.low %v8049_v37, %v8052_v12  ;;  %v6751_v63 = vld.sshfl [vmem:[#allocation2 + $0x40] sm:$0x33 pattern:$0x75316420]  ;;  %v1595_v14 = vcombine.high %v6750_v23, %v6750_v23  ;;  %v1602_v29 = vrot.slane %v6750_v23, %v7985_v41  ;;  %v2332_v30 = vrot.slane %v2310_v5, %v7985_v41 }
 0x1a3   : > { %v1108_v49 = vpop.permute.xlu1 %1107  ;;  %v2340_v42 = vcombine.low %v2318_v47, %v2325_v6  ;;  %v1547_v25 = vrot.slane %v1533_v38, %v7985_v41  ;;  %v1619_v16 = vcombine.high %v6751_v63, %v6751_v63  ;;  %v1177_v18 = vld [vmem:[#allocation2 + $0x54] sm:$0x1]  ;;  %v1106_v32 = vpop.permute.xlu0 %1105  ;;  %v1626_v0 = vrot.slane %v6751_v63, %v7985_v41 }
 0x1a4   : > { %1152 = vst.msk [vmem:[#allocation2 + $0x60] sm:$0xf] %vm1135_vm14, %v1108_v49  ;;  %v2388_v31 = vrot.slane %v2360_v10, %v7985_v41  ;;  %v1609_v28 = vrot.slane %v1595_v14, %v7985_v41  ;;  %v1610_v34 = vcombine.high %v1602_v29, %v1602_v29  ;;  %v1178_v33 = vsel %vm7716_vm8, 0, %v1177_v18  ;;  %1151 = vst.msk [vmem:[#allocation2 + $0x58] sm:$0xf] %vm1135_vm14, %v1106_v32 }
 0x1a5   : > { %v2341_v35 = vcombine.low %v2332_v30, %v2339_v50  ;;  %v2348_v62 = vrot.slane %v2340_v42, %v7985_v41  ;;  %v2358_v36 = vcombine.low %v1540_v9, %v1547_v25  ;;  %1179 = vst [vmem:[#allocation2 + $0x54] sm:$0x1] %v1178_v33  ;;  %v6813_v1 = vcombine.high %v1540_v9, %v1547_v25 }
 0x1a6   : > { %v1611_v26 = vcombine.high %v1609_v28, %v1609_v28  ;;  %v8074_v19 = vrot.slane %v1619_v16, %v7985_v41  ;;  %v1984_v40 = vunpack.i.h.s16 %v1602_v29  ;;  %v1986_v46 = vunpack.i.h.s16 %v1609_v28  ;;  %v8097_v18 = vld.sshfl [vmem:[#allocation2 + $0x4c] sm:$0x33 pattern:$0x75316420] }
 0x1a7   : > { %v1080_v21 = vpop.permute.xlu1 %1079  ;;  %v2355_v22 = vrot.slane %v2341_v35, %v7985_v41  ;;  %v2374_v43 = vrot.slane %v2358_v36, %v7985_v41  ;;  %v1988_v58 = vunpack.i.h.s16 %v1610_v34  ;;  %v1156_v59 = vld [vmem:[#allocation2] sm:$0x1]  ;;  %v1112_v61 = vpop.permute.xlu0 %1111  ;;  %v2381_v50 = vrot.slane %v6813_v1, %v7985_v41 }
 0x1a8   : > { %1138 = vst.msk [vmem:[#allocation2 + $0xc] sm:$0xf] %vm1135_vm14, %v1080_v21  ;;  %v1990_v2 = vunpack.i.h.s16 %v1611_v26  ;;  %v1992_v60 = vunpack.i.h.s16 %v1626_v0  ;;  %v6784_v47 = vpack.i.b16 %v1602_v29, %v1587_v4  ;;  %v1157_v3 = vsel %vm7716_vm8, 0, %v1156_v59  ;;  %1154 = vst.msk [vmem:[#allocation2 + $0x6c] sm:$0xf] %vm1135_vm14, %v1112_v61 }
 0x1a9   : > { %v2356_v27 = vcombine.low %v2348_v62, %v2355_v22  ;;  %v2389_v5 = vcombine.low %v2367_v20, %v2374_v43  ;;  %v6785_v6 = vpack.i.b16 %v1609_v28, %v1984_v40  ;;  %1158 = vst [vmem:[#allocation2] sm:$0x1] %v1157_v3  ;;  %v2390_v38 = vcombine.low %v2381_v50, %v2388_v31  ;;  %v6753_v30 = vld.sshfl [vmem:[#allocation2 + $0x48] sm:$0x33 pattern:$0x75316420] }
 0x1aa   : > { %v6786_v23 = vpack.i.b16 %v1610_v34, %v1986_v46  ;;  %v6787_v9 = vpack.i.b16 %v1611_v26, %v1988_v58  ;;  %v6788_v10 = vpack.i.b16 %v1626_v0, %v1990_v2  ;;  %v6789_v4 = vpack.i.b16 %v8074_v19, %v1992_v60 }
 0x1ab   : > { %v1180_v63 = vld [vmem:[#allocation2 + $0x60] sm:$0x1]  ;;  %v1078_v14 = vpop.permute.xlu1 %1077  ;;  %7114 = vmatmul.mubr.msk.bf16.vlgmr.msra.gmra.mrb[0].mxu1 %vm2690_vm15, %v2356_v27  ;;  %v2397_v44 = vrot.slane %v2389_v5, %v7985_v41  ;;  %v6814_v29 = vcombine.high %v8049_v37, %v8052_v12  ;;  %v2407_v49 = vcombine.low %v6784_v47, %v6785_v6  ;;  %v1082_v42 = vpop.permute.xlu0 %1081  ;;  %v2404_v25 = vrot.slane %v2390_v38, %v7985_v41 }
 0x1ac   : > { %v1181_v20 = vsel %vm7716_vm8, 0, %v1180_v63  ;;  %1137 = vst.msk [vmem:[#allocation2 + $0x4] sm:$0xf] %vm1135_vm14, %v1078_v14  ;;  %7117 = vmatprep.mubr.msk.bf16.mxu1 %vm7519_vm13, %v7518_v17  ;;  %v2408_v16 = vcombine.low %v6786_v23, %v6787_v9  ;;  %v1634_v32 = vcombine.high %v1626_v0, %v1626_v0  ;;  %1139 = vst.msk [vmem:[#allocation2 + $0x10] sm:$0xf] %vm1135_vm14, %v1082_v42  ;;  %v1994_v21 = vunpack.i.h.s16 %v8074_v19 }
 0x1ad   : > { %1182 = vst [vmem:[#allocation2 + $0x60] sm:$0x1] %v1181_v20  ;;  %v2409_v37 = vcombine.low %v6788_v10, %v6789_v4  ;;  %v2416_v12 = vrot.slane %v6814_v29, %v7985_v41  ;;  %v2423_v31 = vrot.slane %v2407_v49, %v7985_v41  ;;  %v1635_v28 = vcombine.high %v8074_v19, %v8074_v19 }
 0x1ae   : > { %v2405_v34 = vcombine.low %v2397_v44, %v2404_v25  ;;  %v2430_v33 = vrot.slane %v2408_v16, %v7985_v41  ;;  %v1657_v35 = vcombine.high %v6753_v30, %v6753_v30  ;;  %v1664_v62 = vrot.slane %v6753_v30, %v7985_v41 }
 0x1af   : > { %v1159_v36 = vld [vmem:[#allocation2 + $0xc] sm:$0x1]  ;;  %v1084_v1 = vpop.permute.xlu1 %1083  ;;  %v2437_v0 = vrot.slane %v2409_v37, %v7985_v41  ;;  %v2438_v26 = vcombine.low %v2416_v12, %v2423_v31  ;;  %v8109_v40 = vrot.slane %v8097_v18, %v7985_v41  ;;  %v1110_v46 = vpop.permute.xlu0 %1109  ;;  %v1996_v61 = vunpack.i.h.s16 %v1634_v32 }
 0x1b0   : > { %v1160_v22 = vsel %vm7716_vm8, 0, %v1159_v36  ;;  %v1183_v43 = vld [vmem:[#allocation2 + $0x6c] sm:$0x1]  ;;  %1140 = vst.msk [vmem:[#allocation2 + $0x18] sm:$0xf] %vm1135_vm14, %v1084_v1  ;;  %v1671_v58 = vrot.slane %v1657_v35, %v7985_v41  ;;  %v1672_v59 = vcombine.high %v1664_v62, %v1664_v62  ;;  %v1998_v47 = vunpack.i.h.s16 %v1635_v28 }
 0x1b1   : > { %1161 = vst [vmem:[#allocation2 + $0xc] sm:$0x1] %v1160_v22  ;;  %v1184_v50 = vsel %vm7716_vm8, 0, %v1183_v43  ;;  %1153 = vst.msk [vmem:[#allocation2 + $0x64] sm:$0xf] %vm1135_vm14, %v1110_v46  ;;  %v2439_v2 = vcombine.low %v2430_v33, %v2437_v0  ;;  %v2446_v19 = vrot.slane %v2438_v26, %v7985_v41  ;;  %v6790_v6 = vpack.i.b16 %v1634_v32, %v1994_v21 }
 0x1b2   : > { %v6735_v60 = vld.sshfl [vmem:[#allocation2] sm:$0x33 pattern:$0x75316420]  ;;  %1185 = vst [vmem:[#allocation2 + $0x6c] sm:$0x1] %v1184_v50  ;;  %v1673_v5 = vcombine.high %v1671_v58, %v1671_v58  ;;  %v6791_v10 = vpack.i.b16 %v1635_v28, %v1996_v61  ;;  %v6792_v63 = vpack.i.b16 %v1649_v7, %v1998_v47  ;;  %v2457_v14 = vcombine.low %v1671_v58, %v1672_v59 }
 0x1b3   : > { %v1285_v3 = vcombine.high %v6735_v60, %v6735_v60  ;;  %v1292_v27 = vrot.slane %v6735_v60, %v7985_v41  ;;  %v1114_v38 = vpop.permute.xlu1 %1113  ;;  %7118 = vmatmul.mubr.msk.bf16.gmra.mrb[4].mxu1 %vm2690_vm15, %v2405_v34  ;;  %v2453_v23 = vrot.slane %v2439_v2, %v7985_v41  ;;  %v6736_v9 = vld.sshfl [vmem:[#allocation2 + $0x4] sm:$0x33 pattern:$0x75316420]  ;;  %v1696_v11 = vcombine.high %v8109_v40, %v8109_v40 }
 0x1b4   : > { %1155 = vst.msk [vmem:[#allocation2 + $0x70] sm:$0xf] %vm1135_vm14, %v1114_v38  ;;  %7121 = vmatprep.mubr.msk.bf16.mxu1 %vm7519_vm13, %v7518_v17  ;;  %v1309_v4 = vcombine.high %v6736_v9, %v6736_v9  ;;  %v1316_v29 = vrot.slane %v6736_v9, %v7985_v41  ;;  %v2458_v49 = vcombine.low %v1673_v5, %v8109_v40  ;;  %v6739_v30 = vld.sshfl [vmem:[#allocation2 + $0x10] sm:$0x33 pattern:$0x75316420] }
 0x1b5   : > { %v1299_v44 = vrot.slane %v1285_v3, %v7985_v41  ;;  %v2454_v20 = vcombine.low %v2446_v19, %v2453_v23  ;;  %v2455_v42 = vcombine.low %v6790_v6, %v6791_v10  ;;  %v2456_v25 = vcombine.low %v6792_v63, %v1664_v62 }
 0x1b6   : > { %v2479_v39 = vrot.slane %v2457_v14, %v7985_v41  ;;  %v1323_v7 = vrot.slane %v1309_v4, %v7985_v41  ;;  %v2486_v37 = vrot.slane %v2458_v49, %v7985_v41  ;;  %v1371_v34 = vcombine.high %v6739_v30, %v6739_v30 }
 0x1b7   : > { %v2161_v16 = vcombine.low %v1292_v27, %v1299_v44  ;;  %v6811_v32 = vcombine.high %v1292_v27, %v1299_v44  ;;  %v1162_v12 = vld [vmem:[#allocation2 + $0x18] sm:$0x1]  ;;  %v2465_v31 = vrot.slane %v2455_v42, %v7985_v41  ;;  %v2472_v28 = vrot.slane %v2456_v25, %v7985_v41 }
 0x1b8   : > { %v1378_v33 = vrot.slane %v6739_v30, %v7985_v41  ;;  %v1163_v35 = vsel %vm7716_vm8, 0, %v1162_v12  ;;  %v2163_v62 = vcombine.low %v1316_v29, %v1323_v7  ;;  %v6812_v36 = vcombine.high %v1316_v29, %v1323_v7  ;;  %v6738_v0 = vld.sshfl [vmem:[#allocation2 + $0xc] sm:$0x33 pattern:$0x75316420] }
 0x1b9   : > { %v2171_v1 = vrot.slane %v2161_v16, %v7985_v41  ;;  %1164 = vst [vmem:[#allocation2 + $0x18] sm:$0x1] %v1163_v35  ;;  %v2178_v26 = vrot.slane %v6811_v32, %v7985_v41  ;;  %v2487_v21 = vcombine.low %v2465_v31, %v2472_v28  ;;  %v2488_v22 = vcombine.low %v2479_v39, %v2486_v37  ;;  %v6756_v7 = vld.sshfl [vmem:[#allocation2 + $0x54] sm:$0x33 pattern:$0x75316420] }
 0x1ba   : > { %v1347_v43 = vcombine.high %v6738_v0, %v6738_v0  ;;  %v2185_v46 = vrot.slane %v2163_v62, %v7985_v41  ;;  %v2192_v58 = vrot.slane %v6812_v36, %v7985_v41  ;;  %v1354_v59 = vrot.slane %v6738_v0, %v7985_v41 }
 0x1bb   : > { %v1385_v61 = vrot.slane %v1371_v34, %v7985_v41  ;;  %7122 = vmatmul.mubr.msk.bf16.gmra.mrb[8].mxu1 %vm2690_vm15, %v2454_v20  ;;  %v2193_v50 = vcombine.low %v2171_v1, %v2178_v26  ;;  %v2495_v2 = vrot.slane %v2487_v21, %v7985_v41  ;;  %v2502_v19 = vrot.slane %v2488_v22, %v7985_v41  ;;  %v6757_v34 = vld.sshfl [vmem:[#allocation2 + $0x58] sm:$0x33 pattern:$0x75316420] }
 0x1bc   : > { %v1361_v60 = vrot.slane %v1347_v43, %v7985_v41  ;;  %v2194_v47 = vcombine.low %v2185_v46, %v2192_v58  ;;  %7125 = vmatprep.mubr.msk.bf16.mxu1 %vm7519_vm13, %v7518_v17  ;;  %v1362_v3 = vcombine.high %v1354_v59, %v1354_v59  ;;  %v1386_v27 = vcombine.high %v1378_v33, %v1378_v33 }
 0x1bd   : > { %v8152_v5 = vcombine.high %v1385_v61, %v1385_v61  ;;  %v2201_v6 = vrot.slane %v2193_v50, %v7985_v41  ;;  %v2503_v38 = vcombine.low %v2495_v2, %v2502_v19  ;;  %v1916_v9 = vunpack.i.h.s16 %v1354_v59 }
 0x1be   : > { %v1363_v23 = vcombine.high %v1361_v60, %v1361_v60  ;;  %v2208_v10 = vrot.slane %v2194_v47, %v7985_v41  ;;  %v1918_v63 = vunpack.i.h.s16 %v1361_v60  ;;  %v1920_v14 = vunpack.i.h.s16 %v1362_v3 }
 0x1bf   : > { %v1924_v44 = vunpack.i.h.s16 %v1378_v33  ;;  %v1926_v29 = vunpack.i.h.s16 %v1385_v61  ;;  %v1928_v49 = vunpack.i.h.s16 %v1386_v27  ;;  %v6766_v30 = vpack.i.b16 %v1354_v59, %v1339_v54 }
 0x1c0   : > { %v1922_v4 = vunpack.i.h.s16 %v1363_v23  ;;  %v2209_v20 = vcombine.low %v2201_v6, %v2208_v10  ;;  %v6767_v42 = vpack.i.b16 %v1361_v60, %v1916_v9  ;;  %v6768_v25 = vpack.i.b16 %v1362_v3, %v1918_v63  ;;  %v6741_v47 = vld.sshfl [vmem:[#allocation2 + $0x18] sm:$0x33 pattern:$0x75316420] }
 0x1c1   : > { %v6769_v39 = vpack.i.b16 %v1363_v23, %v1920_v14  ;;  %v6771_v32 = vpack.i.b16 %v1385_v61, %v1924_v44  ;;  %v6772_v37 = vpack.i.b16 %v1386_v27, %v1926_v29  ;;  %v6773_v12 = vpack.i.b16 %v8152_v5, %v1928_v49 }
 0x1c2   : > { %v6770_v16 = vpack.i.b16 %v1378_v33, %v1922_v4  ;;  %7102 = vmatmul.mubr.msk.bf16.vlgmr.msra.gmra.mrb[20].mxu0 %vm2690_vm15, %v2209_v20  ;;  %v2210_v31 = vcombine.low %v6766_v30, %v6767_v42  ;;  %v1681_v35 = vcombine.high %v8097_v18, %v8097_v18  ;;  %v1719_v62 = vcombine.high %v6756_v7, %v6756_v7 }
 0x1c3   : > { %v2211_v28 = vcombine.low %v6768_v25, %v6769_v39  ;;  %7126 = vmatmul.mubr.msk.bf16.gmra.mrb[12].mxu1 %vm2690_vm15, %v2503_v38  ;;  %7105 = vmatprep.mubr.msk.bf16.mxu0 %vm7519_vm13, %v7518_v17  ;;  %v2213_v33 = vcombine.low %v6772_v37, %v6773_v12  ;;  %v1930_v36 = vunpack.i.h.s16 %v8152_v5  ;;  %v1726_v40 = vrot.slane %v6756_v7, %v7985_v41  ;;  %v6759_v25 = vld.sshfl [vmem:[#allocation2 + $0x60] sm:$0x33 pattern:$0x75316420] }
 0x1c4   : > { %v2212_v54 = vcombine.low %v6770_v16, %v6771_v32  ;;  %v2220_v1 = vrot.slane %v2210_v31, %v7985_v41  ;;  %7129 = vmatprep.mubr.msk.bf16.mxu1 %vm7519_vm13, %v7518_v17  ;;  %v1695_v18 = vrot.slane %v1681_v35, %v7985_v41  ;;  %v1733_v22 = vrot.slane %v1719_v62, %v7985_v41 }
 0x1c5   : > { %v2227_v0 = vrot.slane %v2211_v28, %v7985_v41  ;;  %v2241_v21 = vrot.slane %v2213_v33, %v7985_v41  ;;  %v1750_v43 = vrot.slane %v6757_v34, %v7985_v41  ;;  %v1734_v59 = vcombine.high %v1726_v40, %v1726_v40 }
 0x1c6   : > { %v2234_v26 = vrot.slane %v2212_v54, %v7985_v41  ;;  %v1697_v58 = vcombine.high %v1695_v18, %v1695_v18  ;;  %v2018_v61 = vunpack.i.h.s16 %v1726_v40  ;;  %v1735_v2 = vcombine.high %v1733_v22, %v1733_v22 }
 0x1c7   : > { %v2242_v46 = vcombine.low %v2220_v1, %v2227_v0  ;;  %v2020_v19 = vunpack.i.h.s16 %v1733_v22  ;;  %v6793_v60 = vpack.i.b16 %v1726_v40, %v1711_v48  ;;  %v2022_v27 = vunpack.i.h.s16 %v1734_v59 }
 0x1c8   : > { %v2243_v50 = vcombine.low %v2234_v26, %v2241_v21  ;;  %v6794_v5 = vpack.i.b16 %v1733_v22, %v2018_v61  ;;  %v2504_v6 = vcombine.low %v1695_v18, %v1696_v11  ;;  %v2024_v23 = vunpack.i.h.s16 %v1735_v2 }
 0x1c9   : > { %v2250_v3 = vrot.slane %v2242_v46, %v7985_v41  ;;  %v6795_v9 = vpack.i.b16 %v1734_v59, %v2020_v19  ;;  %v2505_v10 = vcombine.low %v1697_v58, %v6793_v60  ;;  %v6796_v63 = vpack.i.b16 %v1735_v2, %v2022_v27 }
 0x1ca   : > { %v2257_v38 = vrot.slane %v2243_v50, %v7985_v41  ;;  %v2514_v14 = vrot.slane %v2504_v6, %v7985_v41  ;;  %v1409_v44 = vcombine.high %v6741_v47, %v6741_v47  ;;  %v1416_v4 = vrot.slane %v6741_v47, %v7985_v41  ;;  %v6760_v50 = vld.sshfl [vmem:[#allocation2 + $0x64] sm:$0x33 pattern:$0x75316420] }
 0x1cb   : > { %v6797_v45 = vpack.i.b16 %v1750_v43, %v2024_v23  ;;  %v2506_v48 = vcombine.low %v6794_v5, %v6795_v9  ;;  %v2521_v49 = vrot.slane %v2505_v10, %v7985_v41  ;;  %v6774_v42 = vpack.i.b16 %v1401_v13, %v1930_v36  ;;  %v6762_v47 = vld.sshfl [vmem:[#allocation2 + $0x6c] sm:$0x33 pattern:$0x75316420] }
 0x1cc   : > { %v2258_v29 = vcombine.low %v2250_v3, %v2257_v38  ;;  %v1423_v30 = vrot.slane %v1409_v44, %v7985_v41  ;;  %v1424_v20 = vcombine.high %v1416_v4, %v1416_v4  ;;  %v1743_v39 = vcombine.high %v6757_v34, %v6757_v34  ;;  %v6763_v38 = vld.sshfl [vmem:[#allocation2 + $0x70] sm:$0x33 pattern:$0x75316420] }
 0x1cd   : > { %v2507_v7 = vcombine.low %v6796_v63, %v6797_v45  ;;  %v2528_v16 = vrot.slane %v2506_v48, %v7985_v41  ;;  %v2536_v32 = vcombine.low %v2514_v14, %v2521_v49  ;;  %v1758_v37 = vcombine.high %v1750_v43, %v1750_v43 }
 0x1ce   : > { %7106 = vmatmul.mubr.msk.bf16.gmra.mrb[24].mxu0 %vm2690_vm15, %v2258_v29  ;;  %v1425_v12 = vcombine.high %v1423_v30, %v1423_v30  ;;  %v2259_v31 = vcombine.low %v6774_v42, %v1416_v4  ;;  %v2260_v28 = vcombine.low %v1423_v30, %v1424_v20  ;;  %v1757_v35 = vrot.slane %v1743_v39, %v7985_v41 }
 0x1cf   : > { %7109 = vmatprep.mubr.msk.bf16.mxu0 %vm7519_vm13, %v7518_v17  ;;  %v2535_v8 = vrot.slane %v2507_v7, %v7985_v41  ;;  %v2544_v13 = vrot.slane %v2536_v32, %v7985_v41  ;;  %v1781_v34 = vcombine.high %v6759_v25, %v6759_v25  ;;  %v1788_v11 = vrot.slane %v6759_v25, %v7985_v41 }
 0x1d0   : > { %v2261_v54 = vcombine.low %v1425_v12, %v7993_v56  ;;  %v2269_v33 = vrot.slane %v2259_v31, %v7985_v41  ;;  %v2276_v62 = vrot.slane %v2260_v28, %v7985_v41  ;;  %v1759_v36 = vcombine.high %v1757_v35, %v1757_v35 }
 0x1d1   : > { %v2537_v1 = vcombine.low %v2528_v16, %v2535_v8  ;;  %v1795_v0 = vrot.slane %v1781_v34, %v7985_v41  ;;  %v2026_v18 = vunpack.i.h.s16 %v1750_v43  ;;  %v2028_v40 = vunpack.i.h.s16 %v1757_v35 }
 0x1d2   : > { %v2283_v26 = vrot.slane %v2261_v54, %v7985_v41  ;;  %v2291_v21 = vcombine.low %v2269_v33, %v2276_v62  ;;  %v2030_v22 = vunpack.i.h.s16 %v1758_v37  ;;  %v2032_v46 = vunpack.i.h.s16 %v1759_v36 }
 0x1d3   : > { %v2551_v58 = vrot.slane %v2537_v1, %v7985_v41  ;;  %v6798_v59 = vpack.i.b16 %v1757_v35, %v2026_v18  ;;  %v6799_v61 = vpack.i.b16 %v1758_v37, %v2028_v40  ;;  %v2555_v56 = vcombine.low %v1788_v11, %v1795_v0  ;;  %v6764_v40 = vld.sshfl [vmem:[#allocation2 + $0x74] sm:$0x1 pattern:$0x75316420] }
 0x1d4   : > { %v2292_v2 = vcombine.low %v2283_v26, %v2290_v52  ;;  %v2299_v19 = vrot.slane %v2291_v21, %v7985_v41  ;;  %v6800_v60 = vpack.i.b16 %v1759_v36, %v2030_v22  ;;  %v6801_v43 = vpack.i.b16 %v1773_v24, %v2032_v46 }
 0x1d5   : > { %v2552_v3 = vcombine.low %v2544_v13, %v2551_v58  ;;  %v2553_v27 = vcombine.low %v6798_v59, %v6799_v61  ;;  %v6815_v5 = vcombine.high %v1788_v11, %v1795_v0  ;;  %v2577_v6 = vrot.slane %v2555_v56, %v7985_v41 }
 0x1d6   : > { %v2306_v23 = vrot.slane %v2292_v2, %v7985_v41  ;;  %v2554_v9 = vcombine.low %v6800_v60, %v6801_v43  ;;  %v1805_v10 = vcombine.high %v6760_v50, %v6760_v50  ;;  %v1812_v55 = vrot.slane %v6760_v50, %v7985_v41 }
 0x1d7   : > { %7130 = vmatmul.mubr.msk.bf16.gmra.mrb[16].mxu1 %vm2690_vm15, %v2552_v3  ;;  %v2563_v52 = vrot.slane %v2553_v27, %v7985_v41  ;;  %v2584_v15 = vrot.slane %v6815_v5, %v7985_v41  ;;  %v1843_v24 = vcombine.high %v6762_v47, %v6762_v47  ;;  %v1850_v63 = vrot.slane %v6762_v47, %v7985_v41 }
 0x1d8   : > { %v2307_v14 = vcombine.low %v2299_v19, %v2306_v23  ;;  %7133 = vmatprep.mubr.msk.bf16.mxu1 %vm7519_vm13, %v7518_v17  ;;  %v2570_v44 = vrot.slane %v2554_v9, %v7985_v41  ;;  %v1819_v4 = vrot.slane %v1805_v10, %v7985_v41  ;;  %v1867_v29 = vcombine.high %v6763_v38, %v6763_v38 }
 0x1d9   : > { %v2586_v45 = vcombine.low %v2577_v6, %v2584_v15  ;;  %v1857_v48 = vrot.slane %v1843_v24, %v7985_v41  ;;  %v1858_v49 = vcombine.high %v1850_v63, %v1850_v63  ;;  %v2052_v30 = vunpack.i.h.s16 %v1850_v63 }
 0x1da   : > { %7110 = vmatmul.mubr.msk.bf16.gmra.mrb[28].mxu0 %vm2690_vm15, %v2307_v14  ;;  %v2585_v20 = vcombine.low %v2563_v52, %v2570_v44  ;;  %v6802_v42 = vpack.i.b16 %v1850_v63, %v1835_v53  ;;  %v2602_v25 = vcombine.low %v1812_v55, %v1819_v4  ;;  %v6816_v39 = vcombine.high %v1812_v55, %v1819_v4  ;;  %v8254_v52 = vld [vmem:[%s9254_s6] ss:$0 sm:$0xff] }
 0x1db   : > { %v2600_v7 = vrot.slane %v2586_v45, %v7985_v41  ;;  %v1859_v16 = vcombine.high %v1857_v48, %v1857_v48  ;;  %v2054_v32 = vunpack.i.h.s16 %v1857_v48  ;;  %v2056_v37 = vunpack.i.h.s16 %v1858_v49 }
 0x1dc   : > { %v2593_v12 = vrot.slane %v2585_v20, %v7985_v41  ;;  %v6803_v31 = vpack.i.b16 %v1857_v48, %v2052_v30  ;;  %v2612_v28 = vrot.slane %v2602_v25, %v7985_v41  ;;  %v2619_v35 = vrot.slane %v6816_v39, %v7985_v41 }
 0x1dd   : > { %v6804_v8 = vpack.i.b16 %v1858_v49, %v2054_v32  ;;  %v6805_v13 = vpack.i.b16 %v1859_v16, %v2056_v37  ;;  %v1874_v34 = vrot.slane %v6763_v38, %v7985_v41  ;;  %v1881_v57 = vrot.slane %v1867_v29, %v7985_v41 }
 0x1de   : > { %v2601_v53 = vcombine.low %v2593_v12, %v2600_v7  ;;  %v2604_v11 = vcombine.low %v6802_v42, %v6803_v31  ;;  %v2058_v54 = vunpack.i.h.s16 %v1859_v16  ;;  %v2634_v18 = vcombine.low %v2612_v28, %v2619_v35 }
 0x1df   : > { %v2605_v33 = vcombine.low %v6804_v8, %v6805_v13  ;;  %v1882_v62 = vcombine.high %v1874_v34, %v1874_v34  ;;  %v1883_v36 = vcombine.high %v1881_v57, %v1881_v57  ;;  %v2060_v1 = vunpack.i.h.s16 %v1874_v34 }
 0x1e0   : > { %7134 = vmatmul.mubr.msk.bf16.gmra.mrb[20].mxu1 %vm2690_vm15, %v2601_v53  ;;  %v2626_v0 = vrot.slane %v2604_v11, %v7985_v41  ;;  %v2062_v26 = vunpack.i.h.s16 %v1881_v57  ;;  %v6806_v21 = vpack.i.b16 %v1874_v34, %v2058_v54  ;;  %v1897_v50 = vrot.slane %v6764_v40, %v7985_v41 }
 0x1e1   : > { %7137 = vmatprep.mubr.msk.bf16.mxu1 %vm7519_vm13, %v7518_v17  ;;  %v2633_v22 = vrot.slane %v2605_v33, %v7985_v41  ;;  %v2064_v46 = vunpack.i.h.s16 %v1882_v62  ;;  %v2066_v58 = vunpack.i.h.s16 %v1883_v36  ;;  %v6807_v59 = vpack.i.b16 %v1881_v57, %v2060_v1 }
 0x1e2   : > { %v6808_v61 = vpack.i.b16 %v1882_v62, %v2062_v26  ;;  %v2642_v60 = vrot.slane %v2634_v18, %v7985_v41 }
 0x1e3   : > { %v2635_v56 = vcombine.low %v2626_v0, %v2633_v22  ;;  %v6809_v2 = vpack.i.b16 %v1883_v36, %v2064_v46  ;;  %v2651_v19 = vcombine.low %v6806_v21, %v6807_v59  ;;  %v6810_v47 = vpack.i.b16 %v1897_v50, %v2066_v58 }
 0x1e5   : > { %v2649_v43 = vrot.slane %v2635_v56, %v7985_v41  ;;  %v2652_v3 = vcombine.low %v6808_v61, %v6809_v2  ;;  %v2659_v27 = vrot.slane %v2651_v19, %v7985_v41  ;;  %v2673_v38 = vrot.slane %v6810_v47, %v7985_v41 }
 0x1e7   : > { %v2650_v5 = vcombine.low %v2642_v60, %v2649_v43  ;;  %v2666_v6 = vrot.slane %v2652_v3, %v7985_v41  ;;  %v2688_v10 = vrot.slane %v2673_v38, %v7985_v41 }
 0x1e9   : > { %7138 = vmatmul.mubr.msk.bf16.gmra.mrb[24].mxu1 %vm2690_vm15, %v2650_v5  ;;  %v2674_v23 = vcombine.low %v2659_v27, %v2666_v6 }
 0x1ea   : > { %7141 = vmatprep.mubr.msk.bf16.mxu1 %vm7519_vm13, %v7518_v17 }
 0x1eb   : > { %v2681_v9 = vrot.slane %v2674_v23, %v7985_v41 }
 0x1ed   : > { %v2689_v55 = vcombine.low %v2681_v9, %v2688_v10 }
 0x1f1   : > { %7142 = vmatmul.mubr.msk.bf16.gmra.mrb[28].mxu1 %vm2690_vm15, %v2689_v55 }
 0x27e   : > { %v2786_v15 = vpop.f32.mrb[0].mxu1 }
 0x27f   : > { %v2787_v24 = vadd.f32 %v8254_v52, %v2786_v15  ;;  %v7115_v63 = vpop.f32.mrb[1].mxu1 }
 0x280   : > { %v2789_v14 = vpop.f32.mrb[2].mxu1 }
 0x281   : > { %v2855_v44 = vmax.f32 %v2787_v24, 0.0  ;;  %v2790_v17 = vadd.f32 %v8254_v52, %v2789_v14  ;;  %v7116_v4 = vpop.f32.mrb[3].mxu1 }
 0x283   : > { %v3187_v29 = vcombine.high %v2855_v44, %v2855_v44  ;;  %v3194_v45 = vrot.slane %v2855_v44, %v7985_v41  ;;  %v2856_v48 = vmax.f32 %v2790_v17, 0.0 }
 0x285   : > { %v3201_v49 = vrot.slane %v3187_v29, %v7985_v41  ;;  %v3202_v30 = vcombine.high %v3194_v45, %v3194_v45  ;;  %v3210_v20 = vrot.slane %v3194_v45, %v7985_v41  ;;  %v3236_v42 = vcombine.high %v2856_v48, %v2856_v48 }
 0x286   : > { %v3243_v25 = vrot.slane %v2856_v48, %v7985_v41  ;;  %v2794_v39 = vpop.f32.mrb[4].mxu1 }
 0x287   : > { %v3203_v7 = vcombine.high %v3201_v49, %v3201_v49  ;;  %v3217_v16 = vrot.slane %v3201_v49, %v7985_v41  ;;  %v3224_v32 = vrot.slane %v3202_v30, %v7985_v41  ;;  %v3232_v37 = vcombine.high %v3210_v20, %v3210_v20  ;;  %v7119_v12 = vpop.f32.mrb[5].mxu1 }
 0x288   : > { %v3250_v31 = vrot.slane %v3236_v42, %v7985_v41  ;;  %v3251_v28 = vcombine.high %v3243_v25, %v3243_v25  ;;  %v3259_v35 = vrot.slane %v3243_v25, %v7985_v41  ;;  %v2795_v8 = vadd.f32 %v8254_v52, %v2794_v39  ;;  %v2797_v13 = vpop.f32.mrb[6].mxu1 }
 0x289   : > { %v3231_v34 = vrot.slane %v3203_v7, %v7985_v41  ;;  %v3233_v57 = vcombine.high %v3217_v16, %v3217_v16  ;;  %v3234_v53 = vcombine.high %v3224_v32, %v3224_v32  ;;  %v4220_v11 = vcombine.low %v3210_v20, %v3224_v32  ;;  %v7120_v54 = vpop.f32.mrb[7].mxu1 }
 0x28a   : > { %v8269_v33 = vrot.slane %v3232_v37, %v7985_v41  ;;  %v3252_v62 = vcombine.high %v3250_v31, %v3250_v31  ;;  %v3266_v36 = vrot.slane %v3250_v31, %v7985_v41  ;;  %v3273_v1 = vrot.slane %v3251_v28, %v7985_v41 }
 0x28b   : > { %v8274_v0 = vrot.slane %v4220_v11, %v7985_v41  ;;  %v4280_v18 = vcombine.low %v3234_v53, %v3217_v16  ;;  %v4281_v40 = vcombine.low %v3231_v34, %v3233_v57  ;;  %v3235_v26 = vcombine.high %v3231_v34, %v3231_v34 }
 0x28c   : > { %v3280_v21 = vrot.slane %v3252_v62, %v7985_v41  ;;  %v3281_v22 = vcombine.high %v3259_v35, %v3259_v35  ;;  %v3282_v46 = vcombine.high %v3266_v36, %v3266_v36  ;;  %v3283_v58 = vcombine.high %v3273_v1, %v3273_v1 }
 0x28d   : > { %v4290_v59 = vrot.slane %v4280_v18, %v7985_v41  ;;  %v4297_v61 = vrot.slane %v4281_v40, %v7985_v41  ;;  %v4282_v56 = vcombine.low %v3235_v26, %v3259_v35  ;;  %v2857_v50 = vmax.f32 %v2795_v8, 0.0 }
 0x28e   : > { %v4283_v2 = vcombine.low %v3273_v1, %v3281_v22  ;;  %v4329_v19 = vcombine.low %v3283_v58, %v3266_v36  ;;  %v4330_v60 = vcombine.low %v3280_v21, %v3282_v46  ;;  %v3284_v43 = vcombine.high %v3280_v21, %v3280_v21  ;;  %v2802_v47 = vpop.f32.mrb[8].mxu1 }
 0x28f   : > { %v8279_v3 = vcombine.low %v4290_v59, %v4297_v61  ;;  %v4304_v27 = vrot.slane %v4282_v56, %v7985_v41  ;;  %v3285_v5 = vcombine.high %v2857_v50, %v2857_v50  ;;  %v3292_v6 = vrot.slane %v2857_v50, %v7985_v41  ;;  %v7123_v38 = vpop.f32.mrb[9].mxu1 }
 0x290   : > { %v4311_v23 = vrot.slane %v4283_v2, %v7985_v41  ;;  %v4339_v9 = vrot.slane %v4329_v19, %v7985_v41  ;;  %v4346_v10 = vrot.slane %v4330_v60, %v7985_v41  ;;  %v2798_v55 = vadd.f32 %v8254_v52, %v2797_v13  ;;  %v2805_v15 = vpop.f32.mrb[10].mxu1 }
 0x291   : > { %v3299_v63 = vrot.slane %v3285_v5, %v7985_v41  ;;  %v3300_v14 = vcombine.high %v3292_v6, %v3292_v6  ;;  %v3308_v44 = vrot.slane %v3292_v6, %v7985_v41  ;;  %v7124_v17 = vpop.f32.mrb[11].mxu1  ;;  %v2803_v48 = vadd.f32 %v8254_v52, %v2802_v47 }
 0x292   : > { %v8291_v4 = vcombine.low %v4304_v27, %v4311_v23  ;;  %v8293_v29 = vcombine.low %v4339_v9, %v4346_v10  ;;  %v2858_v45 = vmax.f32 %v2798_v55, 0.0  ;;  %v2806_v34 = vadd.f32 %v8254_v52, %v2805_v15 }
 0x293   : > { %v3301_v49 = vcombine.high %v3299_v63, %v3299_v63  ;;  %v3315_v30 = vrot.slane %v3299_v63, %v7985_v41  ;;  %v8298_v20 = vrot.slane %v3300_v14, %v7985_v41  ;;  %v3330_v42 = vcombine.high %v3308_v44, %v3308_v44 }
 0x294   : > { %v4331_v7 = vcombine.low %v3284_v43, %v3308_v44  ;;  %v3334_v16 = vcombine.high %v2858_v45, %v2858_v45  ;;  %v3341_v31 = vrot.slane %v2858_v45, %v7985_v41  ;;  %v2859_v13 = vmax.f32 %v2803_v48, 0.0 }
 0x295   : > { %v3329_v32 = vrot.slane %v3301_v49, %v7985_v41  ;;  %v4332_v12 = vcombine.low %v8298_v20, %v3330_v42  ;;  %v8309_v28 = vpop.f32.mrb[20].mxu0  ;;  %v2860_v47 = vmax.f32 %v2806_v34, 0.0 }
 0x296   : > { %v4353_v35 = vrot.slane %v4331_v7, %v7985_v41  ;;  %v3348_v8 = vrot.slane %v3334_v16, %v7985_v41  ;;  %v7103_v57 = vpop.f32.mrb[21].mxu0  ;;  %v8314_v53 = vpop.f32.mrb[12].mxu1  ;;  %v3349_v36 = vcombine.high %v3341_v31, %v3341_v31  ;;  %v3357_v26 = vrot.slane %v3341_v31, %v7985_v41 }
 0x297   : > { %v4360_v11 = vrot.slane %v4332_v12, %v7985_v41  ;;  %v4392_v54 = vcombine.low %v3315_v30, %v3329_v32  ;;  %v6836_v62 = vcombine.high %v3315_v30, %v3329_v32  ;;  %v2765_v1 = vpop.f32.mrb[22].mxu0  ;;  %v7127_v18 = vpop.f32.mrb[13].mxu1  ;;  %v3383_v22 = vcombine.high %v2859_v13, %v2859_v13 }
 0x298   : > { %v3350_v40 = vcombine.high %v3348_v8, %v3348_v8  ;;  %v3364_v21 = vrot.slane %v3348_v8, %v7985_v41  ;;  %v7104_v46 = vpop.f32.mrb[23].mxu0  ;;  %v8319_v58 = vpop.f32.mrb[14].mxu1  ;;  %v3371_v50 = vrot.slane %v3349_v36, %v7985_v41  ;;  %v3390_v60 = vrot.slane %v2859_v13, %v7985_v41 }
 0x299   : > { %v8321_v59 = vcombine.low %v4353_v35, %v4360_v11  ;;  %v4402_v61 = vrot.slane %v4392_v54, %v7985_v41  ;;  %v4409_v56 = vrot.slane %v6836_v62, %v7985_v41  ;;  %v7128_v2 = vpop.f32.mrb[15].mxu1  ;;  %v3397_v43 = vrot.slane %v3383_v22, %v7985_v41 }
 0x29a   : > { %v3378_v19 = vrot.slane %v3350_v40, %v7985_v41  ;;  %v4394_v6 = vcombine.low %v3357_v26, %v3371_v50  ;;  %v6837_v38 = vcombine.high %v3357_v26, %v3371_v50  ;;  %v3398_v10 = vcombine.high %v3390_v60, %v3390_v60 }
 0x29b   : > { %v4424_v5 = vcombine.low %v4402_v61, %v4409_v56  ;;  %v3399_v55 = vcombine.high %v3397_v43, %v3397_v43  ;;  %v3406_v44 = vrot.slane %v3390_v60, %v7985_v41  ;;  %v8340_v48 = vrot.slane %v3397_v43, %v7985_v41 }
 0x29c   : > { %v4441_v23 = vcombine.low %v3364_v21, %v3378_v19  ;;  %v6838_v9 = vcombine.high %v3364_v21, %v3378_v19  ;;  %v4416_v63 = vrot.slane %v4394_v6, %v7985_v41  ;;  %v4423_v14 = vrot.slane %v6837_v38, %v7985_v41 }
 0x29d   : > { %v8332_v15 = vrot.slane %v4424_v5, %v7985_v41  ;;  %v3420_v49 = vrot.slane %v3398_v10, %v7985_v41  ;;  %v3427_v42 = vrot.slane %v3399_v55, %v7985_v41  ;;  %v3432_v7 = vcombine.high %v2860_v47, %v2860_v47 }
 0x29e   : > { %v4451_v17 = vrot.slane %v4441_v23, %v7985_v41  ;;  %v4458_v45 = vrot.slane %v6838_v9, %v7985_v41  ;;  %v4425_v30 = vcombine.low %v4416_v63, %v4423_v14  ;;  %v3439_v16 = vrot.slane %v2860_v47, %v7985_v41 }
 0x29f   : > { %v3429_v12 = vcombine.high %v8340_v48, %v8340_v48  ;;  %v4443_v31 = vcombine.low %v3406_v44, %v3420_v49  ;;  %v6839_v35 = vcombine.high %v3406_v44, %v3420_v49  ;;  %v3431_v57 = vcombine.high %v3427_v42, %v3427_v42 }
 0x2a0   : > { %v4473_v32 = vcombine.low %v4451_v17, %v4458_v45  ;;  %v8350_v13 = vrot.slane %v4425_v30, %v7985_v41  ;;  %v3446_v11 = vrot.slane %v3432_v7, %v7985_v41  ;;  %v3447_v21 = vcombine.high %v3439_v16, %v3439_v16 }
 0x2a1   : > { %v8347_v8 = vpop.f32.mrb[24].mxu0  ;;  %v4465_v36 = vrot.slane %v4443_v31, %v7985_v41  ;;  %v4472_v18 = vrot.slane %v6839_v35, %v7985_v41  ;;  %v4504_v40 = vcombine.low %v3427_v42, %v3429_v12  ;;  %v3455_v46 = vrot.slane %v3439_v16, %v7985_v41 }
 0x2a2   : > { %v7107_v54 = vpop.f32.mrb[25].mxu0  ;;  %v8356_v62 = vrot.slane %v4473_v32, %v7985_v41  ;;  %v3448_v22 = vcombine.high %v3446_v11, %v3446_v11  ;;  %v3462_v61 = vrot.slane %v3446_v11, %v7985_v41  ;;  %v2763_v19 = vadd.f32 %v8254_v52, %v8309_v28 }
 0x2a3   : > { %v8360_v26 = vpop.f32.mrb[26].mxu0  ;;  %v4474_v50 = vcombine.low %v4465_v36, %v4472_v18  ;;  %v4514_v2 = vrot.slane %v4504_v40, %v7985_v41  ;;  %v2766_v60 = vadd.f32 %v8254_v52, %v2765_v1  ;;  %v3469_v43 = vrot.slane %v3447_v21, %v7985_v41 }
 0x2a4   : > { %v7108_v56 = vpop.f32.mrb[27].mxu0  ;;  %v8370_v47 = vrot.slane %v3448_v22, %v7985_v41  ;;  %v3477_v5 = vcombine.high %v3455_v46, %v3455_v46  ;;  %v3478_v6 = vcombine.high %v3462_v61, %v3462_v61  ;;  %v4505_v23 = vcombine.low %v3431_v57, %v3455_v46 }
 0x2a5   : > { %v8373_v38 = vrot.slane %v4474_v50, %v7985_v41  ;;  %v2849_v9 = vmax.f32 %v2763_v19, 0.0  ;;  %v2850_v10 = vmax.f32 %v2766_v60, 0.0  ;;  %v3479_v55 = vcombine.high %v3469_v43, %v3469_v43 }
 0x2a6   : > { %v4506_v63 = vcombine.low %v3469_v43, %v3477_v5  ;;  %v8376_v14 = vcombine.low %v8370_v47, %v3478_v6  ;;  %v2811_v28 = vadd.f32 %v8254_v52, %v8314_v53  ;;  %v4521_v1 = vrot.slane %v4505_v23, %v7985_v41 }
 0x2a7   : > { %v2893_v44 = vcombine.high %v2849_v9, %v2849_v9  ;;  %v2900_v17 = vrot.slane %v2849_v9, %v7985_v41  ;;  %v2942_v45 = vcombine.high %v2850_v10, %v2850_v10  ;;  %v4507_v49 = vcombine.low %v3479_v55, %v3462_v61 }
 0x2a8   : > { %v4528_v30 = vrot.slane %v4506_v63, %v7985_v41  ;;  %v2949_v42 = vrot.slane %v2850_v10, %v7985_v41  ;;  %v2861_v7 = vmax.f32 %v2811_v28, 0.0  ;;  %v8384_v16 = vcombine.low %v4514_v2, %v4521_v1 }
 0x2a9   : > { %v2907_v32 = vrot.slane %v2893_v44, %v7985_v41  ;;  %v2908_v12 = vcombine.high %v2900_v17, %v2900_v17  ;;  %v2916_v31 = vrot.slane %v2900_v17, %v7985_v41  ;;  %v4535_v35 = vrot.slane %v4507_v49, %v7985_v41 }
 0x2aa   : > { %v8388_v53 = vpop.f32.mrb[16].mxu1  ;;  %v2956_v57 = vrot.slane %v2942_v45, %v7985_v41  ;;  %v2957_v11 = vcombine.high %v2949_v42, %v2949_v42  ;;  %v2965_v54 = vrot.slane %v2949_v42, %v7985_v41  ;;  %v3480_v23 = vcombine.high %v8370_v47, %v8370_v47 }
 0x2ab   : > { %v7131_v36 = vpop.f32.mrb[17].mxu1  ;;  %v2909_v40 = vcombine.high %v2907_v32, %v2907_v32  ;;  %v2923_v21 = vrot.slane %v2907_v32, %v7985_v41  ;;  %v2930_v22 = vrot.slane %v2908_v12, %v7985_v41  ;;  %v8399_v61 = vcombine.low %v4528_v30, %v4535_v35 }
 0x2ac   : > { %v8397_v46 = vpop.f32.mrb[18].mxu1  ;;  %v2958_v56 = vcombine.high %v2956_v57, %v2956_v57  ;;  %v2972_v50 = vrot.slane %v2956_v57, %v7985_v41  ;;  %v2979_v2 = vrot.slane %v2957_v11, %v7985_v41  ;;  %v3481_v11 = vcombine.high %v2861_v7, %v2861_v7 }
 0x2ad   : > { %v7132_v19 = vpop.f32.mrb[19].mxu1  ;;  %v8403_v60 = vpop.f32.mrb[28].mxu0  ;;  %v2937_v43 = vrot.slane %v2909_v40, %v7985_v41  ;;  %v3944_v5 = vcombine.low %v2916_v31, %v2930_v22  ;;  %v6828_v6 = vcombine.high %v2916_v31, %v2930_v22 }
 0x2ae   : > { %v7111_v9 = vpop.f32.mrb[29].mxu0  ;;  %v2986_v55 = vrot.slane %v2958_v56, %v7985_v41  ;;  %v3993_v63 = vcombine.low %v2965_v54, %v2979_v2  ;;  %v6830_v28 = vcombine.high %v2965_v54, %v2979_v2  ;;  %v3495_v2 = vrot.slane %v3481_v11, %v7985_v41 }
 0x2af   : > { %v8411_v1 = vpop.f32.mrb[30].mxu0  ;;  %v3946_v44 = vcombine.low %v2923_v21, %v2937_v43  ;;  %v6829_v17 = vcombine.high %v2923_v21, %v2937_v43  ;;  %v3954_v45 = vrot.slane %v3944_v5, %v7985_v41  ;;  %v3961_v49 = vrot.slane %v6828_v6, %v7985_v41 }
 0x2b0   : > { %v7112_v30 = vpop.f32.mrb[31].mxu0  ;;  %v3995_v42 = vcombine.low %v2972_v50, %v2986_v55  ;;  %v6831_v32 = vcombine.high %v2972_v50, %v2986_v55  ;;  %v4003_v47 = vrot.slane %v3993_v63, %v7985_v41  ;;  %v4010_v12 = vrot.slane %v6830_v28, %v7985_v41 }
 0x2b1   : > { %v3968_v31 = vrot.slane %v3946_v44, %v7985_v41  ;;  %v3975_v35 = vrot.slane %v6829_v17, %v7985_v41  ;;  %v3976_v57 = vcombine.low %v3954_v45, %v3961_v49  ;;  %v3488_v21 = vrot.slane %v2861_v7, %v7985_v41 }
 0x2b2   : > { %v4017_v54 = vrot.slane %v3995_v42, %v7985_v41  ;;  %v4024_v36 = vrot.slane %v6831_v32, %v7985_v41  ;;  %v4025_v40 = vcombine.low %v4003_v47, %v4010_v12  ;;  %v4563_v19 = vrot.slane %v8376_v14, %v7985_v41 }
 0x2b3   : > { %v8422_v22 = vpop.f32.mrb[20].mxu1  ;;  %v3977_v56 = vcombine.low %v3968_v31, %v3975_v35  ;;  %v8425_v50 = vrot.slane %v3976_v57, %v7985_v41  ;;  %v3496_v9 = vcombine.high %v3488_v21, %v3488_v21  ;;  %v3504_v55 = vrot.slane %v3488_v21, %v7985_v41 }
 0x2b4   : > { %v7135_v43 = vpop.f32.mrb[21].mxu1  ;;  %v4026_v5 = vcombine.low %v4017_v54, %v4024_v36  ;;  %v8431_v6 = vrot.slane %v4025_v40, %v7985_v41  ;;  %v3497_v28 = vcombine.high %v3495_v2, %v3495_v2  ;;  %v3511_v44 = vrot.slane %v3495_v2, %v7985_v41 }
 0x2b5   : > { %v8434_v7 = vpop.f32.mrb[22].mxu1  ;;  %v8437_v63 = vrot.slane %v3977_v56, %v7985_v41  ;;  %v2814_v17 = vadd.f32 %v8254_v52, %v8319_v58  ;;  %v3518_v49 = vrot.slane %v3496_v9, %v7985_v41  ;;  %v3526_v30 = vcombine.high %v3504_v55, %v3504_v55 }
 0x2b6   : > { %v7136_v14 = vpop.f32.mrb[23].mxu1  ;;  %v8443_v45 = vrot.slane %v4026_v5, %v7985_v41  ;;  %v4554_v42 = vcombine.low %v3480_v23, %v3504_v55  ;;  %v8447_v32 = vrot.slane %v3497_v28, %v7985_v41  ;;  %v2771_v12 = vadd.f32 %v8254_v52, %v8347_v8 }
 0x2b7   : > { %v2862_v47 = vmax.f32 %v2814_v17, 0.0  ;;  %v2774_v31 = vadd.f32 %v8254_v52, %v8360_v26  ;;  %v3528_v35 = vcombine.high %v3518_v49, %v3518_v49  ;;  %v4555_v58 = vcombine.low %v3518_v49, %v3526_v30 }
 0x2b8   : > { %v4570_v57 = vrot.slane %v4554_v42, %v7985_v41  ;;  %v8456_v11 = vadd.f32 %v8254_v52, %v8388_v53  ;;  %v6840_v23 = vcombine.high %v3511_v44, %v8447_v32  ;;  %v2851_v40 = vmax.f32 %v2771_v12, 0.0 }
 0x2b9   : > { %v3530_v54 = vcombine.high %v2862_v47, %v2862_v47  ;;  %v3537_v36 = vrot.slane %v2862_v47, %v7985_v41  ;;  %v4556_v21 = vcombine.low %v3528_v35, %v3511_v44  ;;  %v4577_v8 = vrot.slane %v4555_v58, %v7985_v41 }
 0x2ba   : > { %v8461_v56 = vcombine.low %v4563_v19, %v4570_v57  ;;  %v2852_v26 = vmax.f32 %v2774_v31, 0.0  ;;  %v4626_v2 = vrot.slane %v6840_v23, %v7985_v41  ;;  %v2991_v44 = vcombine.high %v2851_v40, %v2851_v40 }
 0x2bb   : > { %v3544_v43 = vrot.slane %v3530_v54, %v7985_v41  ;;  %v3545_v5 = vcombine.high %v3537_v36, %v3537_v36  ;;  %v3553_v53 = vrot.slane %v3537_v36, %v7985_v41  ;;  %v4584_v55 = vrot.slane %v4556_v21, %v7985_v41 }
 0x2bc   : > { %v8466_v9 = vpop.f32.mrb[24].mxu1  ;;  %v2998_v17 = vrot.slane %v2851_v40, %v7985_v41  ;;  %v3040_v42 = vcombine.high %v2852_v26, %v2852_v26  ;;  %v3005_v31 = vrot.slane %v2991_v44, %v7985_v41  ;;  %v3047_v40 = vrot.slane %v2852_v26, %v7985_v41 }
 0x2bd   : > { %v7139_v19 = vpop.f32.mrb[25].mxu1  ;;  %v3546_v14 = vcombine.high %v3544_v43, %v3544_v43  ;;  %v3560_v49 = vrot.slane %v3544_v43, %v7985_v41  ;;  %v3567_v30 = vrot.slane %v3545_v5, %v7985_v41  ;;  %v8476_v12 = vcombine.low %v4577_v8, %v4584_v55 }
 0x2be   : > { %v8474_v47 = vpop.f32.mrb[26].mxu1  ;;  %v3006_v35 = vcombine.high %v2998_v17, %v2998_v17  ;;  %v8480_v58 = vrot.slane %v2998_v17, %v7985_v41  ;;  %v3007_v43 = vcombine.high %v3005_v31, %v3005_v31  ;;  %v3021_v8 = vrot.slane %v3005_v31, %v7985_v41 }
 0x2bf   : > { %v7140_v57 = vpop.f32.mrb[27].mxu1  ;;  %v3574_v23 = vrot.slane %v3546_v14, %v7985_v41  ;;  %v4617_v54 = vcombine.low %v3553_v53, %v3567_v30  ;;  %v6841_v36 = vcombine.high %v3553_v53, %v3567_v30  ;;  %v3063_v37 = vrot.slane %v3047_v40, %v7985_v41 }
 0x2c0   : > { %v3028_v5 = vrot.slane %v3006_v35, %v7985_v41  ;;  %v3035_v14 = vrot.slane %v3007_v43, %v7985_v41  ;;  %v3036_v53 = vcombine.high %v8480_v58, %v8480_v58  ;;  %v3037_v26 = vcombine.high %v3021_v8, %v3021_v8 }
 0x2c1   : > { %v4619_v55 = vcombine.low %v3560_v49, %v3574_v23  ;;  %v4633_v44 = vrot.slane %v4617_v54, %v7985_v41  ;;  %v4640_v17 = vrot.slane %v6841_v36, %v7985_v41  ;;  %v6842_v19 = vcombine.high %v3560_v49, %v3574_v23 }
 0x2c2   : > { %v3038_v30 = vcombine.high %v3028_v5, %v3028_v5  ;;  %v4056_v36 = vcombine.low %v3028_v5, %v3036_v53  ;;  %v4058_v23 = vcombine.low %v3035_v14, %v3037_v26  ;;  %v3039_v43 = vcombine.high %v3035_v14, %v3035_v14 }
 0x2c3   : > { %v4647_v57 = vrot.slane %v4619_v55, %v7985_v41  ;;  %v4648_v34 = vcombine.low %v4626_v2, %v4633_v44  ;;  %v8495_v31 = vrot.slane %v6842_v19, %v7985_v41  ;;  %v3054_v55 = vrot.slane %v3040_v42, %v7985_v41 }
 0x2c4   : > { %v8499_v54 = vpop.f32.mrb[28].mxu1  ;;  %v4057_v49 = vcombine.low %v3038_v30, %v3021_v8  ;;  %v3055_v2 = vcombine.high %v3047_v40, %v3047_v40  ;;  %v4066_v19 = vrot.slane %v4056_v36, %v7985_v41  ;;  %v4080_v8 = vrot.slane %v4058_v23, %v7985_v41 }
 0x2c5   : > { %v7143_v28 = vpop.f32.mrb[29].mxu1  ;;  %v4649_v21 = vcombine.low %v4640_v17, %v4647_v57  ;;  %v8502_v18 = vrot.slane %v4648_v34, %v7985_v41  ;;  %v3056_v17 = vcombine.high %v3054_v55, %v3054_v55  ;;  %v3070_v34 = vrot.slane %v3054_v55, %v7985_v41 }
 0x2c6   : > { %v8505_v44 = vpop.f32.mrb[30].mxu1  ;;  %v4073_v10 = vrot.slane %v4057_v49, %v7985_v41  ;;  %v3077_v42 = vrot.slane %v3055_v2, %v7985_v41  ;;  %v3085_v53 = vcombine.high %v3063_v37, %v3063_v37  ;;  %v4059_v26 = vcombine.low %v3039_v43, %v3063_v37 }
 0x2c7   : > { %v7144_v5 = vpop.f32.mrb[31].mxu1  ;;  %v8512_v28 = vrot.slane %v4649_v21, %v7985_v41  ;;  %v2863_v30 = vmax.f32 %v8456_v11, 0.0  ;;  %v8520_v57 = vrot.slane %v3056_v17, %v7985_v41  ;;  %v3086_v40 = vcombine.high %v3070_v34, %v3070_v34 }
 0x2c8   : > { %v8516_v14 = vcombine.low %v4066_v19, %v4073_v10  ;;  %v3087_v36 = vcombine.high %v3077_v42, %v3077_v42  ;;  %v2822_v21 = vadd.f32 %v8254_v52, %v8397_v46  ;;  %v4087_v23 = vrot.slane %v4059_v26, %v7985_v41 }
 0x2c9   : > { %v4105_v55 = vcombine.low %v3077_v42, %v3085_v53  ;;  %v3579_v10 = vcombine.high %v2863_v30, %v2863_v30  ;;  %v8528_v37 = vcombine.low %v8520_v57, %v3086_v40  ;;  %v3586_v11 = vrot.slane %v2863_v30, %v7985_v41 }
 0x2ca   : > { %v4106_v2 = vcombine.low %v3087_v36, %v3070_v34  ;;  %v2864_v43 = vmax.f32 %v2822_v21, 0.0  ;;  %v8531_v19 = vcombine.low %v4080_v8, %v4087_v23  ;;  %v2779_v17 = vadd.f32 %v8254_v52, %v8403_v60 }
 0x2cb   : > { %v4115_v5 = vrot.slane %v4105_v55, %v7985_v41  ;;  %v3593_v46 = vrot.slane %v3579_v10, %v7985_v41  ;;  %v3594_v42 = vcombine.high %v3586_v11, %v3586_v11  ;;  %v3602_v34 = vrot.slane %v3586_v11, %v7985_v41 }
 0x2cc   : > { %v4122_v26 = vrot.slane %v4106_v2, %v7985_v41  ;;  %v3628_v53 = vcombine.high %v2864_v43, %v2864_v43  ;;  %v3635_v36 = vrot.slane %v2864_v43, %v7985_v41  ;;  %v2853_v55 = vmax.f32 %v2779_v17, 0.0 }
 0x2cd   : > { %v3595_v30 = vcombine.high %v3593_v46, %v3593_v46  ;;  %v8542_v8 = vrot.slane %v3593_v46, %v7985_v41  ;;  %v3616_v23 = vrot.slane %v3594_v42, %v7985_v41 }
 0x2ce   : > { %v8545_v21 = vcombine.low %v4115_v5, %v4122_v26  ;;  %v3642_v60 = vrot.slane %v3628_v53, %v7985_v41  ;;  %v3643_v11 = vcombine.high %v3635_v36, %v3635_v36  ;;  %v3651_v39 = vrot.slane %v3635_v36, %v7985_v41 }
 0x2cf   : > { %9291 = vst [vmem:[#allocation16_spill] sm:$0xff] %v8542_v8  ;;  %v3623_v10 = vrot.slane %v3595_v30, %v7985_v41  ;;  %v4666_v27 = vcombine.low %v3602_v34, %v3616_v23  ;;  %v6843_v43 = vcombine.high %v3602_v34, %v3616_v23 }
 0x2d0   : > { %v3644_v5 = vcombine.high %v3642_v60, %v3642_v60  ;;  %v3658_v53 = vrot.slane %v3642_v60, %v7985_v41  ;;  %v3665_v17 = vrot.slane %v3643_v11, %v7985_v41  ;;  %v3673_v36 = vcombine.high %v3651_v39, %v3651_v39 }
 0x2d1   : > { %v4668_v26 = vcombine.low %v8542_v8, %v3623_v10  ;;  %v3627_v42 = vcombine.high %v3623_v10, %v3623_v10  ;;  %v4682_v30 = vrot.slane %v4666_v27, %v7985_v41  ;;  %v4689_v2 = vrot.slane %v6843_v43, %v7985_v41 }
 0x2d2   : > { %v8561_v24 = vrot.slane %v3644_v5, %v7985_v41  ;;  %v3674_v46 = vcombine.high %v3658_v53, %v3658_v53  ;;  %v3675_v34 = vcombine.high %v3665_v17, %v3665_v17  ;;  %v4729_v10 = vcombine.low %v3665_v17, %v3673_v36 }
 0x2d3   : > { %v4696_v25 = vrot.slane %v4668_v26, %v7985_v41  ;;  %v4728_v23 = vcombine.low %v3627_v42, %v3651_v39  ;;  %v4697_v49 = vcombine.low %v8495_v31, %v4682_v30  ;;  %v3088_v60 = vcombine.high %v8520_v57, %v8520_v57 }
 0x2d4   : > { %v3089_v11 = vcombine.high %v2853_v55, %v2853_v55  ;;  %v4730_v27 = vcombine.low %v3675_v34, %v3658_v53  ;;  %v4731_v43 = vcombine.low %v8561_v24, %v3674_v46  ;;  %v4745_v26 = vrot.slane %v4729_v10, %v7985_v41 }
 0x2d5   : > { %v4698_v40 = vcombine.low %v4689_v2, %v4696_v25  ;;  %v4738_v5 = vrot.slane %v4728_v23, %v7985_v41  ;;  %v8570_v35 = vrot.slane %v4697_v49, %v7985_v41  ;;  %v3096_v39 = vrot.slane %v2853_v55, %v7985_v41 }
 0x2d6   : > { %v3103_v31 = vrot.slane %v3089_v11, %v7985_v41  ;;  %v4752_v57 = vrot.slane %v4730_v27, %v7985_v41  ;;  %v4759_v25 = vrot.slane %v4731_v43, %v7985_v41  ;;  %v4129_v2 = vrot.slane %v8528_v37, %v7985_v41 }
 0x2d7   : > { %9292 = vst [vmem:[#allocation17_spill] sm:$0xff] %v8570_v35  ;;  %v8576_v42 = vrot.slane %v4698_v40, %v7985_v41  ;;  %v8582_v46 = vcombine.low %v4738_v5, %v4745_v26  ;;  %v3104_v49 = vcombine.high %v3096_v39, %v3096_v39  ;;  %v3112_v17 = vrot.slane %v3096_v39, %v7985_v41 }
 0x2d8   : > { %v3105_v53 = vcombine.high %v3103_v31, %v3103_v31  ;;  %v8585_v30 = vcombine.low %v4752_v57, %v4759_v25  ;;  %v3119_v55 = vrot.slane %v3103_v31, %v7985_v41  ;;  %v2782_v40 = vadd.f32 %v8254_v52, %v8411_v1 }
 0x2d9   : > { %9293 = vst [vmem:[#allocation18_spill] sm:$0xff] %v8576_v42  ;;  %v2827_v36 = vadd.f32 %v8254_v52, %v8422_v22  ;;  %v8595_v37 = vrot.slane %v3104_v49, %v7985_v41  ;;  %v4108_v10 = vcombine.low %v3088_v60, %v3112_v17  ;;  %v3676_v1 = vcombine.high %v8561_v24, %v8561_v24 }
 0x2da   : > { %v3133_v23 = vrot.slane %v3105_v53, %v7985_v41  ;;  %v2854_v27 = vmax.f32 %v2782_v40, 0.0 }
 0x2db   : > { %v2865_v43 = vmax.f32 %v2827_v36, 0.0  ;;  %v4136_v5 = vrot.slane %v4108_v10, %v7985_v41  ;;  %v6832_v26 = vcombine.high %v3112_v17, %v8595_v37 }
 0x2dc   : > { %v4169_v39 = vcombine.low %v3119_v55, %v3133_v23  ;;  %v6833_v31 = vcombine.high %v3119_v55, %v3133_v23  ;;  %v3138_v57 = vcombine.high %v2854_v27, %v2854_v27  ;;  %v3145_v60 = vrot.slane %v2854_v27, %v7985_v41 }
 0x2dd   : > { %v3677_v25 = vcombine.high %v2865_v43, %v2865_v43  ;;  %v8607_v49 = vcombine.low %v4129_v2, %v4136_v5  ;;  %v4178_v53 = vrot.slane %v6832_v26, %v7985_v41  ;;  %v3684_v24 = vrot.slane %v2865_v43, %v7985_v41 }
 0x2de   : > { %v4185_v40 = vrot.slane %v4169_v39, %v7985_v41  ;;  %v4192_v36 = vrot.slane %v6833_v31, %v7985_v41  ;;  %v3152_v10 = vrot.slane %v3138_v57, %v7985_v41  ;;  %v3153_v34 = vcombine.high %v3145_v60, %v3145_v60 }
 0x2df   : > { %v3161_v17 = vrot.slane %v3145_v60, %v7985_v41  ;;  %v3691_v2 = vrot.slane %v3677_v25, %v7985_v41  ;;  %v3692_v27 = vcombine.high %v3684_v24, %v3684_v24  ;;  %v3700_v43 = vrot.slane %v3684_v24, %v7985_v41 }
 0x2e0   : > { %v4200_v23 = vcombine.low %v4178_v53, %v4185_v40  ;;  %v3154_v5 = vcombine.high %v3152_v10, %v3152_v10  ;;  %v3168_v26 = vrot.slane %v3152_v10, %v7985_v41  ;;  %v3175_v39 = vrot.slane %v3153_v34, %v7985_v41 }
 0x2e1   : > { %v3693_v57 = vcombine.high %v3691_v2, %v3691_v2  ;;  %v3707_v60 = vrot.slane %v3691_v2, %v7985_v41  ;;  %v3714_v11 = vrot.slane %v3692_v27, %v7985_v41  ;;  %v3722_v22 = vcombine.high %v3700_v43, %v3700_v43 }
 0x2e2   : > { %v8622_v31 = vrot.slane %v4200_v23, %v7985_v41  ;;  %v3182_v53 = vrot.slane %v3154_v5, %v7985_v41  ;;  %v4171_v40 = vcombine.low %v3161_v17, %v3175_v39  ;;  %v6834_v25 = vcombine.high %v3161_v17, %v3175_v39 }
 0x2e3   : > { %v8628_v55 = vrot.slane %v3693_v57, %v7985_v41  ;;  %v3723_v10 = vcombine.high %v3707_v60, %v3707_v60  ;;  %v3724_v34 = vcombine.high %v3714_v11, %v3714_v11  ;;  %v4777_v51 = vcombine.low %v3676_v1, %v3700_v43 }
 0x2e4   : > { %v4199_v24 = vrot.slane %v4171_v40, %v7985_v41  ;;  %v4218_v23 = vcombine.low %v3168_v26, %v3182_v53  ;;  %v6835_v8 = vcombine.high %v3168_v26, %v3182_v53  ;;  %v4227_v35 = vrot.slane %v6834_v25, %v7985_v41 }
 0x2e5   : > { %v4778_v27 = vcombine.low %v3714_v11, %v3722_v22  ;;  %v4779_v5 = vcombine.low %v3724_v34, %v3707_v60  ;;  %v4780_v17 = vcombine.low %v8628_v55, %v3723_v10  ;;  %v4787_v1 = vrot.slane %v4777_v51, %v7985_v41 }
 0x2e6   : > { %v4201_v39 = vcombine.low %v4192_v36, %v4199_v24  ;;  %v4234_v57 = vrot.slane %v4218_v23, %v7985_v41  ;;  %v4241_v42 = vrot.slane %v6835_v8, %v7985_v41  ;;  %v2830_v40 = vadd.f32 %v8254_v52, %v8434_v7 }
 0x2e7   : > { %v4794_v43 = vrot.slane %v4778_v27, %v7985_v41  ;;  %v4801_v26 = vrot.slane %v4779_v5, %v7985_v41  ;;  %v4808_v53 = vrot.slane %v4780_v17, %v7985_v41  ;;  %v2835_v8 = vadd.f32 %v8254_v52, %v8466_v9 }
 0x2e8   : > { %v8644_v11 = vrot.slane %v4201_v39, %v7985_v41  ;;  %v4249_v22 = vcombine.low %v4227_v35, %v4234_v57  ;;  %v4250_v36 = vcombine.low %v4241_v42, %v8274_v0  ;;  %v2866_v25 = vmax.f32 %v2830_v40, 0.0 }
 0x2e9   : > { %v8649_v60 = vcombine.low %v4787_v1, %v4794_v43  ;;  %v8651_v51 = vcombine.low %v4801_v26, %v4808_v53  ;;  %v2838_v10 = vadd.f32 %v8254_v52, %v8474_v47  ;;  %v2867_v35 = vmax.f32 %v2835_v8, 0.0 }
 0x2ea   : > { %v8656_v34 = vrot.slane %v4249_v22, %v7985_v41  ;;  %v8659_v7 = vrot.slane %v4250_v36, %v7985_v41  ;;  %v3992_v0 = vcombine.low %v8425_v50, %v8437_v63  ;;  %v3726_v24 = vcombine.high %v2866_v25, %v2866_v25 }
 0x2eb   : > { %v4824_v42 = vrot.slane %v8651_v51, %v7985_v41  ;;  %v3733_v23 = vrot.slane %v2866_v25, %v7985_v41  ;;  %v3775_v52 = vcombine.high %v2867_v35, %v2867_v35  ;;  %v3782_v47 = vrot.slane %v2867_v35, %v7985_v41 }
 0x2ec   : > { %v2868_v27 = vmax.f32 %v2838_v10, 0.0  ;;  %v4041_v5 = vcombine.low %v8431_v6, %v8443_v45  ;;  %v3740_v17 = vrot.slane %v3726_v24, %v7985_v41  ;;  %v9294_v63 = vrot.slane %v8480_v58, %v7985_v41 }
 0x2ed   : > { %v3741_v39 = vcombine.high %v3733_v23, %v3733_v23  ;;  %v3749_v50 = vrot.slane %v3733_v23, %v7985_v41  ;;  %v3789_v1 = vrot.slane %v3775_v52, %v7985_v41  ;;  %v3790_v43 = vcombine.high %v3782_v47, %v3782_v47 }
 0x2ee   : > { %v4055_v57 = vrot.slane %v9294_v63, %v7985_v41  ;;  %v3798_v26 = vrot.slane %v3782_v47, %v7985_v41  ;;  %v3824_v53 = vcombine.high %v2868_v27, %v2868_v27  ;;  %v3742_v40 = vcombine.high %v3740_v17, %v3740_v17 }
 0x2ef   : > { %v3756_v22 = vrot.slane %v3740_v17, %v7985_v41  ;;  %v3763_v6 = vrot.slane %v3741_v39, %v7985_v41  ;;  %v3831_v45 = vrot.slane %v2868_v27, %v7985_v41  ;;  %v3791_v36 = vcombine.high %v3789_v1, %v3789_v1 }
 0x2f0   : > { %v3805_v8 = vrot.slane %v3789_v1, %v7985_v41  ;;  %v3812_v25 = vrot.slane %v3790_v43, %v7985_v41  ;;  %v3838_v58 = vrot.slane %v3824_v53, %v7985_v41  ;;  %v3770_v10 = vrot.slane %v3742_v40, %v7985_v41 }
 0x2f1   : > { %v4840_v35 = vcombine.low %v3749_v50, %v3763_v6  ;;  %v6844_v24 = vcombine.high %v3749_v50, %v3763_v6  ;;  %v3839_v23 = vcombine.high %v3831_v45, %v3831_v45  ;;  %v3819_v52 = vrot.slane %v3791_v36, %v7985_v41 }
 0x2f2   : > { %v4889_v47 = vcombine.low %v3798_v26, %v3812_v25  ;;  %v6846_v17 = vcombine.high %v3798_v26, %v3812_v25  ;;  %v3840_v63 = vcombine.high %v3838_v58, %v3838_v58  ;;  %v4842_v39 = vcombine.low %v3756_v22, %v3770_v10 }
 0x2f3   : > { %v6845_v2 = vcombine.high %v3756_v22, %v3770_v10  ;;  %v4850_v27 = vrot.slane %v4840_v35, %v7985_v41  ;;  %v4857_v1 = vrot.slane %v6844_v24, %v7985_v41  ;;  %v4891_v9 = vcombine.low %v3805_v8, %v3819_v52 }
 0x2f4   : > { %v6847_v43 = vcombine.high %v3805_v8, %v3819_v52  ;;  %v4899_v53 = vrot.slane %v4889_v47, %v7985_v41  ;;  %v4906_v40 = vrot.slane %v6846_v17, %v7985_v41  ;;  %v4864_v50 = vrot.slane %v4842_v39, %v7985_v41 }
 0x2f5   : > { %v4871_v6 = vrot.slane %v6845_v2, %v7985_v41  ;;  %v4872_v36 = vcombine.low %v4850_v27, %v4857_v1  ;;  %v8694_v26 = vrot.slane %v3831_v45, %v7985_v41  ;;  %v4913_v22 = vrot.slane %v4891_v9, %v7985_v41 }
 0x2f6   : > { %v4920_v25 = vrot.slane %v6847_v43, %v7985_v41  ;;  %v4921_v10 = vcombine.low %v4899_v53, %v4906_v40  ;;  %v3854_v35 = vrot.slane %v3838_v58, %v7985_v41  ;;  %v3861_v52 = vrot.slane %v3839_v23, %v7985_v41 }
 0x2f7   : > { %v4873_v8 = vcombine.low %v4864_v50, %v4871_v6  ;;  %v8700_v24 = vrot.slane %v4872_v36, %v7985_v41  ;;  %v3868_v47 = vrot.slane %v3840_v63, %v7985_v41  ;;  %v3869_v9 = vcombine.high %v8694_v26, %v8694_v26  ;;  %v7417_v36 = vld [vmem:[%s9254_s6] ss:$0 sm:$0xff] }
 0x2f8   : > { %v4922_v2 = vcombine.low %v4913_v22, %v4920_v25  ;;  %v8705_v17 = vrot.slane %v4921_v10, %v7985_v41  ;;  %v3870_v45 = vcombine.high %v3854_v35, %v3854_v35  ;;  %v3871_v58 = vcombine.high %v3861_v52, %v3861_v52 }
 0x2f9   : > { %v8710_v39 = vrot.slane %v4873_v8, %v7985_v41  ;;  %v4944_v27 = vrot.slane %v8694_v26, %v7985_v41  ;;  %v5094_v1 = vpack.c.bf16 %v4041_v5, %v3992_v0  ;;  %v4952_v63 = vcombine.low %v3861_v52, %v3869_v9 }
 0x2fa   : > { %v8715_v23 = vrot.slane %v4922_v2, %v7985_v41  ;;  %v4954_v43 = vcombine.low %v3868_v47, %v3870_v45  ;;  %v5095_v53 = vpack.c.bf16 %v4055_v57, %v4055_v57  ;;  %v4953_v40 = vcombine.low %v3871_v58, %v3854_v35 }
 0x2fb   : > { %v5126_v50 = vshrl.u32 %v5094_v1, 16  ;;  %v5128_v6 = vshll.u32 %v5094_v1, 16  ;;  %5114 = vst.msk [vmem:[#allocation3] sm:$0xff] %vm2690_vm15, %v5094_v1  ;;  %v2843_v22 = vadd.f32 %v7417_v36, %v8499_v54  ;;  %v4962_v25 = vrot.slane %v4952_v63, %v7985_v41 }
 0x2fc   : > { %v5133_v0 = vshll.u32 %v5095_v53, 16  ;;  %v3872_v5 = vcombine.high %v3868_v47, %v3868_v47  ;;  %v4976_v10 = vrot.slane %v4954_v43, %v7985_v41  ;;  %v4969_v8 = vrot.slane %v4953_v40, %v7985_v41 }
 0x2fd   : > { %v5130_v57 = vrot.slane %v5128_v6, 1  ;;  %v2869_v35 = vmax.f32 %v2843_v22, 0.0  ;;  %v2846_v52 = vadd.f32 %v7417_v36, %v8505_v44  ;;  %v9295_v9 = vrot.slane %v8531_v19, %v7985_v41 }
 0x2fe   : > { %v5135_v2 = vrot.slane %v5133_v0, 1  ;;  %v9296_v45 = vrot.slane %v8516_v14, %v7985_v41  ;;  %v9297_v58 = vrot.slane %v8607_v49, %v7985_v41  ;;  %v9298_v47 = vrot.slane %v8545_v21, %v7985_v41 }
 0x2ff   : > { %v9299_v63 = vrot.slane %v8595_v37, %v7985_v41  ;;  %v8742_v43 = vcombine.low %v4962_v25, %v4969_v8  ;;  %v5131_v53 = vor.u32 %v5130_v57, %v5126_v50  ;;  %v3873_v19 = vcombine.high %v2869_v35, %v2869_v35 }
 0x300   : > { %v4104_v54 = vcombine.low %v9296_v45, %v9295_v9  ;;  %v4153_v1 = vcombine.low %v9298_v47, %v9297_v58  ;;  %v3880_v40 = vrot.slane %v2869_v35, %v7985_v41  ;;  %v2870_v14 = vmax.f32 %v2846_v52, 0.0 }
 0x301   : > { %v4167_v44 = vrot.slane %v9299_v63, %v7985_v41  ;;  %v9300_v49 = vrot.slane %v8291_v4, %v7985_v41  ;;  %v9301_v21 = vrot.slane %v8279_v3, %v7985_v41  ;;  %v4992_v37 = vrot.slane %v8742_v43, %v7985_v41 }
 0x302   : > { %v5096_v6 = vpack.c.bf16 %v4153_v1, %v4104_v54  ;;  %v5136_v25 = vsel %vm5124_vm0, %v5131_v53, %v5135_v2  ;;  %v3887_v50 = vrot.slane %v3873_v19, %v7985_v41  ;;  %v3888_v0 = vcombine.high %v3880_v40, %v3880_v40 }
 0x303   : > { %v5097_v36 = vpack.c.bf16 %v4167_v44, %v4167_v44  ;;  %v4328_v22 = vcombine.low %v9301_v21, %v9300_v49  ;;  %5245 = vrot.lane.b32.xlu0 %v5136_v25, %s7521_s24  ;;  %v3896_v8 = vrot.slane %v3880_v40, %v7985_v41  ;;  %v3928_v57 = vrot.slane %v2870_v14, %v7985_v41 }
 0x304   : > { %v5138_v4 = vshrl.u32 %v5096_v6, 16  ;;  %v5140_v35 = vshll.u32 %v5096_v6, 16  ;;  %5115 = vst.msk [vmem:[#allocation3 + $0x8] sm:$0xff] %vm2690_vm15, %v5096_v6  ;;  %v3889_v3 = vcombine.high %v3887_v50, %v3887_v50  ;;  %v3903_v52 = vrot.slane %v3887_v50, %v7985_v41 }
 0x305   : > { %v3910_v9 = vrot.slane %v3888_v0, %v7985_v41  ;;  %v5145_v2 = vshll.u32 %v5097_v36, 16  ;;  %v3918_v45 = vcombine.high %v3896_v8, %v3896_v8  ;;  %v4955_v54 = vcombine.low %v3872_v5, %v3896_v8 }
 0x306   : > { %v3929_v58 = vcombine.high %v3928_v57, %v3928_v57  ;;  %v3936_v47 = vrot.slane %v3928_v57, %v7985_v41  ;;  %v3917_v1 = vrot.slane %v3889_v3, %v7985_v41  ;;  %v3919_v63 = vcombine.high %v3903_v52, %v3903_v52 }
 0x307   : > { %v3920_v44 = vcombine.high %v3910_v9, %v3910_v9  ;;  %v5142_v53 = vrot.slane %v5140_v35, 1  ;;  %v4983_v19 = vrot.slane %v4955_v54, %v7985_v41  ;;  %v5001_v40 = vcombine.low %v3910_v9, %v3918_v45 }
 0x308   : > { %v8765_v14 = vrot.slane %v3929_v58, %v7985_v41  ;;  %v5147_v6 = vrot.slane %v5145_v2, 1  ;;  %v5003_v21 = vcombine.low %v3917_v1, %v3919_v63  ;;  %v3921_v36 = vcombine.high %v3917_v1, %v3917_v1 }
 0x309   : > { %v5002_v49 = vcombine.low %v3920_v44, %v3903_v52  ;;  %v5143_v25 = vor.u32 %v5142_v53, %v5138_v4  ;;  %v8767_v5 = vcombine.low %v4976_v10, %v4983_v19  ;;  %v5011_v50 = vrot.slane %v5001_v40, %v7985_v41 }
 0x30a   : > { %v5056_v0 = vrot.slane %v8765_v14, %v7985_v41  ;;  %v9302_v8 = vrot.slane %v8321_v59, %v7985_v41  ;;  %v9303_v57 = vrot.slane %v8293_v29, %v7985_v41  ;;  %v5004_v52 = vcombine.low %v3921_v36, %v3936_v47 }
 0x30b   : > { %v5018_v3 = vrot.slane %v5002_v49, %v7985_v41  ;;  %v5025_v9 = vrot.slane %v5003_v21, %v7985_v41  ;;  %v5148_v10 = vsel %vm5124_vm0, %v5143_v25, %v5147_v6  ;;  %v4999_v4 = vrot.slane %v8767_v5, %v7985_v41 }
 0x30c   : > { %v4377_v35 = vcombine.low %v9303_v57, %v9302_v8  ;;  %5247 = vrot.lane.b32.xlu1 %v5148_v10, %s7521_s24  ;;  %v9304_v59 = vcombine.high %v8298_v20, %v8298_v20  ;;  %v4216_v29 = vcombine.low %v8622_v31, %v8644_v11  ;;  %v5032_v58 = vrot.slane %v5004_v52, %v7985_v41 }
 0x30d   : > { %v8790_v54 = vcombine.low %v5011_v50, %v5018_v3  ;;  %v4265_v47 = vcombine.low %v8656_v34, %v8659_v7  ;;  %v4279_v1 = vrot.slane %v8269_v33, %v7985_v41  ;;  %v9305_v20 = vrot.slane %v8399_v61, %v7985_v41 }
 0x30e   : > { %v4384_v2 = vrot.slane %v9304_v59, %v7985_v41  ;;  %v5100_v45 = vpack.c.bf16 %v4377_v35, %v4328_v22  ;;  %v9306_v31 = vrot.slane %v8384_v16, %v7985_v41  ;;  %v8807_v34 = vcombine.low %v5025_v9, %v5032_v58 }
 0x30f   : > { %v5041_v22 = vrot.slane %v8790_v54, %v7985_v41  ;;  %v5098_v7 = vpack.c.bf16 %v4265_v47, %v4216_v29  ;;  %v5099_v33 = vpack.c.bf16 %v4279_v1, %v4279_v1  ;;  %v9307_v6 = vrot.slane %v8476_v12, %v7985_v41 }
 0x310   : > { %v4391_v63 = vrot.slane %v4384_v2, %v7985_v41  ;;  %v5162_v44 = vshrl.u32 %v5100_v45, 16  ;;  %v5164_v53 = vshll.u32 %v5100_v45, 16  ;;  %5117 = vst.msk [vmem:[#allocation3 + $0x18] sm:$0xff] %vm2690_vm15, %v5100_v45  ;;  %v4552_v11 = vcombine.low %v9306_v31, %v9305_v20 }
 0x311   : > { %v9308_v49 = vrot.slane %v8461_v56, %v7985_v41  ;;  %v4608_v16 = vrot.slane %v8447_v32, %v7985_v41  ;;  %v5048_v21 = vrot.slane %v8807_v34, %v7985_v41  ;;  %v5150_v36 = vshrl.u32 %v5098_v7, 16  ;;  %5116 = vst.msk [vmem:[#allocation3 + $0x10] sm:$0xff] %vm2690_vm15, %v5098_v7 }
 0x312   : > { %v5101_v19 = vpack.c.bf16 %v4391_v63, %v4391_v63  ;;  %v5166_v40 = vrot.slane %v5164_v53, 1  ;;  %v5152_v25 = vshll.u32 %v5098_v7, 16  ;;  %v5157_v50 = vshll.u32 %v5099_v33, 16 }
 0x313   : > { %v4601_v61 = vcombine.low %v9308_v49, %v9307_v6  ;;  %v4615_v35 = vrot.slane %v4608_v16, %v7985_v41  ;;  %v4440_v56 = vcombine.low %v8332_v15, %v8350_v13  ;;  %v4489_v32 = vcombine.low %v8356_v62, %v8373_v38  ;;  %v9315_v6 = vld [vmem:[#allocation17_spill] sm:$0xff] }
 0x314   : > { %v5167_v8 = vor.u32 %v5166_v40, %v5162_v44  ;;  %v5169_v57 = vshll.u32 %v5101_v19, 16  ;;  %v5154_v3 = vrot.slane %v5152_v25, 1  ;;  %v5159_v52 = vrot.slane %v5157_v50, 1  ;;  %v9314_v40 = vld [vmem:[#allocation18_spill] sm:$0xff] }
 0x315   : > { %v5104_v12 = vpack.c.bf16 %v4601_v61, %v4552_v11  ;;  %v5105_v10 = vpack.c.bf16 %v4615_v35, %v4615_v35  ;;  %v9309_v29 = vrot.slane %v8340_v48, %v7985_v41  ;;  %v5102_v47 = vpack.c.bf16 %v4489_v32, %v4440_v56 }
 0x316   : > { %v5171_v9 = vrot.slane %v5169_v57, 1  ;;  %v5155_v45 = vor.u32 %v5154_v3, %v5150_v36  ;;  %v9310_v1 = vrot.slane %v8585_v30, %v7985_v41  ;;  %v9311_v15 = vrot.slane %v8582_v46, %v7985_v41 }
 0x317   : > { %v5186_v59 = vshrl.u32 %v5104_v12, 16  ;;  %v5188_v2 = vshll.u32 %v5104_v12, 16  ;;  %5119 = vst.msk [vmem:[#allocation3 + $0x28] sm:$0xff] %vm2690_vm15, %v5104_v12  ;;  %v4503_v58 = vrot.slane %v9309_v29, %v7985_v41  ;;  %v5193_v63 = vshll.u32 %v5105_v10, 16  ;;  %5118 = vst.msk [vmem:[#allocation3 + $0x20] sm:$0xff] %vm2690_vm15, %v5102_v47 }
 0x318   : > { %v4776_v13 = vcombine.low %v9311_v15, %v9310_v1  ;;  %v5172_v62 = vsel %vm5124_vm0, %v5167_v8, %v5171_v9  ;;  %v9312_v44 = vrot.slane %v8649_v60, %v7985_v41  ;;  %v5160_v53 = vsel %vm5124_vm0, %v5155_v45, %v5159_v52  ;;  %v9316_v8 = vld [vmem:[#allocation16_spill] sm:$0xff] }
 0x319   : > { %v5190_v38 = vrot.slane %v5188_v2, 1  ;;  %5251 = vrot.lane.b32.xlu1 %v5172_v62, %s7521_s24  ;;  %v5103_v30 = vpack.c.bf16 %v4503_v58, %v4503_v58  ;;  %v5174_v20 = vshrl.u32 %v5102_v47, 16  ;;  %v5176_v31 = vshll.u32 %v5102_v47, 16  ;;  %5249 = vrot.lane.b32.xlu0 %v5160_v53, %s7521_s24 }
 0x31a   : > { %v4825_v48 = vcombine.low %v9312_v44, %v4824_v42  ;;  %v5195_v11 = vrot.slane %v5193_v63, 1  ;;  %v9313_v51 = vcombine.high %v8628_v55, %v8628_v55  ;;  %v4664_v19 = vcombine.low %v8502_v18, %v8512_v28 }
 0x31b   : > { %v5191_v46 = vor.u32 %v5190_v38, %v5186_v59  ;;  %v5178_v42 = vrot.slane %v5176_v31, 1  ;;  %v5181_v33 = vshll.u32 %v5103_v30, 16  ;;  %v4713_v49 = vcombine.low %v9315_v6, %v9314_v40 }
 0x31c   : > { %v4832_v7 = vrot.slane %v9313_v51, %v7985_v41  ;;  %v5108_v60 = vpack.c.bf16 %v4825_v48, %v4776_v13  ;;  %v9317_v57 = vcombine.high %v9316_v8, %v9316_v8  ;;  %v4888_v3 = vcombine.low %v8700_v24, %v8710_v39 }
 0x31d   : > { %v5196_v61 = vsel %vm5124_vm0, %v5191_v46, %v5195_v11  ;;  %v5179_v55 = vor.u32 %v5178_v42, %v5174_v20  ;;  %v5183_v50 = vrot.slane %v5181_v33, 1  ;;  %v5106_v28 = vpack.c.bf16 %v4713_v49, %v4664_v19 }
 0x31e   : > { %v4839_v16 = vrot.slane %v4832_v7, %v7985_v41  ;;  %v5210_v36 = vshrl.u32 %v5108_v60, 16  ;;  %v5212_v25 = vshll.u32 %v5108_v60, 16  ;;  %5121 = vst.msk [vmem:[#allocation3 + $0x38] sm:$0xff] %vm2690_vm15, %v5108_v60  ;;  %5255 = vrot.lane.b32.xlu1 %v5196_v61, %s7521_s24  ;;  %v4720_v18 = vrot.slane %v9317_v57, %v7985_v41 }
 0x31f   : > { %v4937_v52 = vcombine.low %v8705_v17, %v8715_v23  ;;  %v5184_v56 = vsel %vm5124_vm0, %v5179_v55, %v5183_v50  ;;  %v5198_v9 = vshrl.u32 %v5106_v28, 16  ;;  %v5200_v10 = vshll.u32 %v5106_v28, 16  ;;  %5120 = vst.msk [vmem:[#allocation3 + $0x30] sm:$0xff] %vm2690_vm15, %v5106_v28 }
 0x320   : > { %v5109_v35 = vpack.c.bf16 %v4839_v16, %v4839_v16  ;;  %v5214_v12 = vrot.slane %v5212_v25, 1  ;;  %v4727_v32 = vrot.slane %v4720_v18, %v7985_v41  ;;  %5253 = vrot.lane.b32.xlu0 %v5184_v56, %s7521_s24  ;;  %v4951_v24 = vrot.slane %v4944_v27, %v7985_v41 }
 0x321   : > { %v5110_v39 = vpack.c.bf16 %v4937_v52, %v4888_v3  ;;  %v5202_v17 = vrot.slane %v5200_v10, 1  ;;  %v5000_v23 = vcombine.low %v4992_v37, %v4999_v4  ;;  %v5049_v29 = vcombine.low %v5041_v22, %v5048_v21 }
 0x322   : > { %v5215_v59 = vor.u32 %v5214_v12, %v5210_v36  ;;  %v5217_v2 = vshll.u32 %v5109_v35, 16  ;;  %v5107_v45 = vpack.c.bf16 %v4727_v32, %v4727_v32  ;;  %v5111_v26 = vpack.c.bf16 %v4951_v24, %v4951_v24 }
 0x323   : > { %v5224_v27 = vshll.u32 %v5110_v39, 16  ;;  %5122 = vst.msk [vmem:[#allocation3 + $0x40] sm:$0xff] %vm2690_vm15, %v5110_v39  ;;  %v5203_v47 = vor.u32 %v5202_v17, %v5198_v9  ;;  %v5063_v43 = vrot.slane %v5056_v0, %v7985_v41  ;;  %v5112_v37 = vpack.c.bf16 %v5049_v29, %v5000_v23 }
 0x324   : > { %v5219_v58 = vrot.slane %v5217_v2, 1  ;;  %v5205_v1 = vshll.u32 %v5107_v45, 16  ;;  %v5222_v4 = vshrl.u32 %v5110_v39, 16  ;;  %v5229_v15 = vshll.u32 %v5111_v26, 16 }
 0x325   : > { %v5226_v34 = vrot.slane %v5224_v27, 1  ;;  %v5113_v22 = vpack.c.bf16 %v5063_v43, %v5063_v43  ;;  %v5236_v21 = vshll.u32 %v5112_v37, 16  ;;  %5123 = vst.msk [vmem:[#allocation3 + $0x48] sm:$0xff] %vm2690_vm15, %v5112_v37  ;;  %v5234_v63 = vshrl.u32 %v5112_v37, 16 }
 0x326   : > { %v5220_v5 = vsel %vm5124_vm0, %v5215_v59, %v5219_v58  ;;  %v5207_v54 = vrot.slane %v5205_v1, 1  ;;  %v5231_v62 = vrot.slane %v5229_v15, 1 }
 0x327   : > { %5259 = vrot.lane.b32.xlu1 %v5220_v5, %s7521_s24  ;;  %v5227_v13 = vor.u32 %v5226_v34, %v5222_v4  ;;  %v5238_v14 = vrot.slane %v5236_v21, 1  ;;  %v5241_v41 = vshll.u32 %v5113_v22, 16  ;;  %v7522_v22 = vmov (!%p6848_p4), 0  }
 0x328   : > { %v5208_v38 = vsel %vm5124_vm0, %v5203_v47, %v5207_v54 }
 0x329   : > { %5257 = vrot.lane.b32.xlu0 %v5208_v38, %s7521_s24  ;;  %v5232_v0 = vsel %vm5124_vm0, %v5227_v13, %v5231_v62  ;;  %v5239_v44 = vor.u32 %v5238_v14, %v5234_v63  ;;  %v5243_v48 = vrot.slane %v5241_v41, 1 }
 0x32b   : > { %v5244_v53 = vsel %vm5124_vm0, %v5239_v44, %v5243_v48 }
 0x32c   : > { %5263 = vrot.lane.b32.xlu1 %v5244_v53, %s7521_s24 }
 0x32d   : > { %5261 = vrot.lane.b32.xlu0 %v5232_v0, %s7521_s24 }
 0x375   : > { %v5246_v30 = vpop.permute.xlu0 %5245 }
 0x376   : > { %5276 = vst.msk [vmem:[#allocation3] sm:$0xff] %vm5275_vm1, %v5246_v30 }
 0x37d   : > { %v5286_v31 = vld [vmem:[#allocation3] sm:$0x1]  ;;  %v5319_v46 = vld [vmem:[#allocation3] sm:$0x80] }
 0x37e   : > { %v5248_v11 = vpop.permute.xlu1 %5247  ;;  %v5287_v7 = vsel %vm7716_vm8, 0, %v5286_v31  ;;  %v5320_v60 = vsel %vm8902_vm4, 0, %v5319_v46 }
 0x37f   : > { %5277 = vst.msk [vmem:[#allocation3 + $0x8] sm:$0xff] %vm5275_vm1, %v5248_v11  ;;  %5288 = vst [vmem:[#allocation3] sm:$0x1] %v5287_v7 }
 0x380   : > { %5321 = vst [vmem:[#allocation3] sm:$0x80] %v5320_v60 }
 0x381   : > { %5354 = vst.msk [vmem:[#allocation3] sm:$0xff] (!%p6848_p4), %vm5353_vm5, %v7522_v22 }
 0x386   : > { %v5289_v42 = vld [vmem:[#allocation3 + $0x8] sm:$0x1]  ;;  %v5322_v33 = vld [vmem:[#allocation3 + $0x8] sm:$0x80] }
 0x387   : > { %v5290_v19 = vsel %vm7716_vm8, 0, %v5289_v42  ;;  %v5323_v40 = vsel %vm8902_vm4, 0, %v5322_v33 }
 0x388   : > { %5291 = vst [vmem:[#allocation3 + $0x8] sm:$0x1] %v5290_v19  ;;  %5324 = vst [vmem:[#allocation3 + $0x8] sm:$0x80] %v5323_v40 }
 0x38b   : > { %v5252_v6 = vpop.permute.xlu1 %5251  ;;  %v5250_v49 = vpop.permute.xlu0 %5249 }
 0x38c   : > { %5279 = vst.msk [vmem:[#allocation3 + $0x18] sm:$0xff] %vm5275_vm1, %v5252_v6  ;;  %5278 = vst.msk [vmem:[#allocation3 + $0x10] sm:$0xff] %vm5275_vm1, %v5250_v49 }
 0x390   : > { %v5256_v61 = vpop.permute.xlu1 %5255 }
 0x391   : > { %5281 = vst.msk [vmem:[#allocation3 + $0x28] sm:$0xff] %vm5275_vm1, %v5256_v61 }
 0x392   : > { %v5254_v16 = vpop.permute.xlu0 %5253 }
 0x393   : > { %v5295_v36 = vld [vmem:[#allocation3 + $0x18] sm:$0x1]  ;;  %v5328_v25 = vld [vmem:[#allocation3 + $0x18] sm:$0x80]  ;;  %5280 = vst.msk [vmem:[#allocation3 + $0x20] sm:$0xff] %vm5275_vm1, %v5254_v16 }
 0x394   : > { %v5296_v55 = vsel %vm7716_vm8, 0, %v5295_v36  ;;  %v5329_v50 = vsel %vm8902_vm4, 0, %v5328_v25  ;;  %v5292_v8 = vld [vmem:[#allocation3 + $0x10] sm:$0x1]  ;;  %v5325_v57 = vld [vmem:[#allocation3 + $0x10] sm:$0x80] }
 0x395   : > { %5297 = vst [vmem:[#allocation3 + $0x18] sm:$0x1] %v5296_v55  ;;  %5330 = vst [vmem:[#allocation3 + $0x18] sm:$0x80] %v5329_v50  ;;  %v5293_v18 = vsel %vm7716_vm8, 0, %v5292_v8  ;;  %v5326_v28 = vsel %vm8902_vm4, 0, %v5325_v57 }
 0x396   : > { %5294 = vst [vmem:[#allocation3 + $0x10] sm:$0x1] %v5293_v18  ;;  %5327 = vst [vmem:[#allocation3 + $0x10] sm:$0x80] %v5326_v28 }
 0x398   : > { %v5301_v35 = vld [vmem:[#allocation3 + $0x28] sm:$0x1]  ;;  %v5334_v12 = vld [vmem:[#allocation3 + $0x28] sm:$0x80] }
 0x399   : > { %v5260_v3 = vpop.permute.xlu1 %5259  ;;  %v5302_v52 = vsel %vm7716_vm8, 0, %v5301_v35  ;;  %v5335_v56 = vsel %vm8902_vm4, 0, %v5334_v12 }
 0x39a   : > { %5283 = vst.msk [vmem:[#allocation3 + $0x38] sm:$0xff] %vm5275_vm1, %v5260_v3  ;;  %5303 = vst [vmem:[#allocation3 + $0x28] sm:$0x1] %v5302_v52  ;;  %v5298_v32 = vld [vmem:[#allocation3 + $0x20] sm:$0x1] }
 0x39b   : > { %5336 = vst [vmem:[#allocation3 + $0x28] sm:$0x80] %v5335_v56  ;;  %v5331_v9 = vld [vmem:[#allocation3 + $0x20] sm:$0x80]  ;;  %v5258_v10 = vpop.permute.xlu0 %5257  ;;  %v5299_v59 = vsel %vm7716_vm8, 0, %v5298_v32 }
 0x39c   : > { %v5332_v2 = vsel %vm8902_vm4, 0, %v5331_v9  ;;  %5282 = vst.msk [vmem:[#allocation3 + $0x30] sm:$0xff] %vm5275_vm1, %v5258_v10  ;;  %5300 = vst [vmem:[#allocation3 + $0x20] sm:$0x1] %v5299_v59 }
 0x39d   : > { %5333 = vst [vmem:[#allocation3 + $0x20] sm:$0x80] %v5332_v2 }
 0x39e   : > { %v5264_v39 = vpop.permute.xlu1 %5263 }
 0x39f   : > { %v5262_v24 = vpop.permute.xlu0 %5261  ;;  %5285 = vst.msk [vmem:[#allocation3 + $0x48] sm:$0xff] %vm5275_vm1, %v5264_v39 }
 0x3a0   : > { %5284 = vst.msk [vmem:[#allocation3 + $0x40] sm:$0xff] %vm5275_vm1, %v5262_v24 }
 0x3a1   : > { %v5307_v45 = vld [vmem:[#allocation3 + $0x38] sm:$0x1]  ;;  %v5340_v17 = vld [vmem:[#allocation3 + $0x38] sm:$0x80] }
 0x3a2   : > { %v5308_v23 = vsel %vm7716_vm8, 0, %v5307_v45  ;;  %v5341_v29 = vsel %vm8902_vm4, 0, %v5340_v17 }
 0x3a3   : > { %5309 = vst [vmem:[#allocation3 + $0x38] sm:$0x1] %v5308_v23  ;;  %5342 = vst [vmem:[#allocation3 + $0x38] sm:$0x80] %v5341_v29  ;;  %v5304_v58 = vld [vmem:[#allocation3 + $0x30] sm:$0x1] }
 0x3a4   : > { %v5337_v26 = vld [vmem:[#allocation3 + $0x30] sm:$0x80]  ;;  %v5305_v27 = vsel %vm7716_vm8, 0, %v5304_v58  ;;  %5352 = sbr.rel (%p6848_p4) target bundleno = 939 (0x3ab), region = 60 }
 0x3a5   : > { %v5338_v47 = vsel %vm8902_vm4, 0, %v5337_v26  ;;  %5306 = vst [vmem:[#allocation3 + $0x30] sm:$0x1] %v5305_v27 }
 0x3a6   : > { %5339 = vst [vmem:[#allocation3 + $0x30] sm:$0x80] %v5338_v47  ;;  %v5313_v37 = vld [vmem:[#allocation3 + $0x48] sm:$0x1]  ;;  %v5346_v15 = vld [vmem:[#allocation3 + $0x48] sm:$0x80] }
 0x3a7   : > { %v5310_v1 = vld [vmem:[#allocation3 + $0x40] sm:$0x1]  ;;  %v5343_v43 = vld [vmem:[#allocation3 + $0x40] sm:$0x80]  ;;  %v5314_v34 = vsel %vm7716_vm8, 0, %v5313_v37  ;;  %v5347_v54 = vsel %vm8902_vm4, 0, %v5346_v15 }
 0x3a8   : > { %v5311_v5 = vsel %vm7716_vm8, 0, %v5310_v1  ;;  %v5344_v4 = vsel %vm8902_vm4, 0, %v5343_v43  ;;  %5315 = vst [vmem:[#allocation3 + $0x48] sm:$0x1] %v5314_v34  ;;  %5348 = vst [vmem:[#allocation3 + $0x48] sm:$0x80] %v5347_v54 }
 0x3a9   : > { %5312 = vst [vmem:[#allocation3 + $0x40] sm:$0x1] %v5311_v5  ;;  %5345 = vst [vmem:[#allocation3 + $0x40] sm:$0x80] %v5344_v4 }
 0x3ab PF: > { %p6849_p5 = scmp.ne.s32.totalorder %s7499_s12, 1 }
 0x3ac   : > { %vm5360_vm6 = vcmask (!%p6849_p5), 130048   ;;  %v7523_v21 = vmov (!%p6849_p5), 0  }
 0x3ad   : > { %5358 = sbr.rel (%p6849_p5) target bundleno = 948 (0x3b4), region = 64  ;;  %5361 = vst.msk [vmem:[#allocation3 + $0x48] sm:$0xff] (!%p6849_p5), %vm5360_vm6, %v7523_v21 }
 0x3b4 PF: > { %v5376_v13 = vld [vmem:[#allocation3 + $0x8] sm:$0xff]  ;;  %v8960_v62 = vld [vmem:[#allocation3 + $0x18] sm:$0xff]  ;;  %s7524_s15 = smov 124   ;;  %vm5389_vm7 = vcmask 97280   ;;  %v5377_v38 = vld [vmem:[#allocation3 + $0x10] sm:$0xff]  ;;  %vm5414_vm8 = vcmask 1045504  }
 0x3b5   : > { %5652 = vrot.lane.b32.xlu0 %v5376_v13, %s7524_s15  ;;  %5656 = vrot.lane.b32.xlu1 %v8960_v62, %s7524_s15  ;;  %v8965_v63 = vld [vmem:[#allocation3 + $0x20] sm:$0xff]  ;;  %v7418_v14 = vld [vmem:[%s9255_s7 + $0x8] sm:$0x3f]   ;;  %v7419_v41 = vld [vmem:[%s9255_s7] sm:$0x3f]   ;;  %vm6387_vm9 = vcmask 125952  }
 0x3b6   : > { %7147 = vmatprep.mubr.msk.bf16.mxu0 %vm5389_vm7, %v5376_v13  ;;  %v5380_v0 = vld [vmem:[#allocation3 + $0x28] sm:$0xff]  ;;  %v5381_v44 = vld [vmem:[#allocation3 + $0x30] sm:$0xff]  ;;  %7322 = vmatprep.subr.msk.bf16.mxu1 %vm5414_vm8, %v7418_v14  ;;  %v5416_v48 = vsel %vm5414_vm8, %v7418_v14, 0  ;;  %v5382_v53 = vld [vmem:[#allocation3 + $0x38] sm:$0xff]  ;;  %v5545_v20 = vsel %vm5414_vm8, %v7419_v41, 0  ;;  %s7525_s28 = smov 16  }
 0x3b7   : > { %7320 = vmatprep.subr.msk.bf16.mxu0 %vm5414_vm8, %v7418_v14  ;;  %7182 = vmatpush3.bf16.msra.mxu1 %v5416_v48  ;;  %v5383_v30 = vld [vmem:[#allocation3 + $0x40] sm:$0xff]  ;;  %v7420_v46 = vld [vmem:[%s9255_s7 + $0x10] sm:$0x3f]   ;;  %v5945_v11 = vld [vmem:[#allocation3 + $0x48] sm:$0xff]  ;;  %vm6500_vm10 = vcmask 257152   ;;  %s6999_s25 = sshll.u32 %s7499_s12, 4 }
 0x3b8   : > { %7146 = vmatpush3.bf16.msra.mxu0 %v5416_v48  ;;  %7323 = vmatprep.subr.msk.bf16.mxu1 %vm5414_vm8, %v7419_v41  ;;  %v5364_v31 = vld [vmem:[#allocation3] sm:$0xff]  ;;  %v5976_v51 = vsel %vm5414_vm8, %v7420_v46, 0  ;;  %v9069_v9 = vld [vmem:[%s9256_s8] ss:$0 sm:$0xff]  ;;  %s6941_s26 = sshll.u32 %s7503_s13, 5  ;;  %s6534_s24 = sshll.u32 %s8956_s19, 4  ;;  %s9189_s24 = int_to_ptr.vmem [resolvable:$true] %s6534_s24 }
 0x3b9   : > { %5654 = vrot.lane.b32.xlu0 %v5377_v38, %s7524_s15  ;;  %5658 = vrot.lane.b32.xlu1 %v8965_v63, %s7524_s15  ;;  %s6531_s17 = sadd.s32 %s6999_s25, %s6941_s26  ;;  %s9321_s20 = sand.u32 1, %s7491_s10  }
 0x3ba   : > { %7321 = vmatprep.subr.msk.bf16.mxu0 %vm5414_vm8, %v7419_v41  ;;  %s6942_s21 = sshll.u32 %s6531_s17, 6  ;;  %s9195_s18 = scalar_lea.sflag [#allocation5], %s9321_s20 }
 0x3bb   : > { %7148 = vmatmul.mubr.msk.bf16.vlgmr.msra.gmra.mrb[32].mxu0 %vm5389_vm7, %v5377_v38  ;;  %s7421_s3 = scalar_lea.vmem %s9189_s24, 1024  ;;  %s7526_s14 = smov [#allocation4]  }
 0x3bc   : > { %7151 = vmatprep.mubr.msk.bf16.mxu0 %vm5389_vm7, %v8960_v62  ;;  %7164 = vmatpush3.bf16.msra.mxu0 %v5545_v20  ;;  %p7422_p6 = scmp.ne.s32.totalorder %s9189_s24, %s7421_s3  ;;  %s7425_s29 = sshll.u32 %s7526_s14, 4  ;;  %s7426_s29 = int_to_ptr.vmem [resolvable:$false] %s7425_s29 }
 0x3bd   : > { %5660 = vrot.lane.b32.xlu0 %v5380_v0, %s7524_s15  ;;  %5662 = vrot.lane.b32.xlu1 %v5381_v44, %s7524_s15  ;;  %s7427_s30 = scalar_lea.vmem %s7426_s29, 2048  ;;  %p7428_p10 = scmp.lt.s32.totalorder %s9189_s24, %s7426_s29 }
 0x3be   : > { %7324 = vmatprep.subr.msk.bf16.mxu0 %vm5414_vm8, %v7420_v46  ;;  %p7423_p7 = pnand %p7422_p6, %p7629_p3  ;;  %p7429_p11 = scmp.lt.s32.totalorder %s7427_s30, %s7421_s3 }
 0x3c0   : > { %p7424_p9 = pneg %p7423_p7  ;;  %p7430_p12 = por %p7429_p11, %p7428_p10 }
 0x3c1   : > { %5664 = vrot.lane.b32.xlu0 %v5382_v53, %s7524_s15  ;;  %5666 = vrot.lane.b32.xlu1 %v5383_v30, %s7524_s15 }
 0x3c2   : > { %p7431_p13 = pnand %p7430_p12, %p7424_p9 }
 0x3c3   : > { %7152 = vmatmul.mubr.msk.bf16.gmra.mrb[36].mxu0 %vm5389_vm7, %v8965_v63 }
 0x3c4   : > { %7155 = vmatprep.mubr.msk.bf16.mxu0 %vm5389_vm7, %v5380_v0 }
 0x3c5   : > { %5797 = vrot.lane.b32.xlu0 %v5364_v31, %s7524_s15  ;;  %5799 = vrot.lane.b32.xlu1 %v5376_v13, %s7524_s15 }
 0x3c9   : > { %5801 = vrot.lane.b32.xlu0 %v5377_v38, %s7524_s15  ;;  %5803 = vrot.lane.b32.xlu1 %v8960_v62, %s7524_s15 }
 0x3cb   : > { %7156 = vmatmul.mubr.msk.bf16.gmra.mrb[40].mxu0 %vm5389_vm7, %v5381_v44 }
 0x3cc   : > { %7159 = vmatprep.mubr.msk.bf16.mxu0 %vm5389_vm7, %v5382_v53 }
 0x3cd   : > { %5805 = vrot.lane.b32.xlu0 %v8965_v63, %s7524_s15  ;;  %5807 = vrot.lane.b32.xlu1 %v5380_v0, %s7524_s15 }
 0x3d1   : > { %5809 = vrot.lane.b32.xlu0 %v5381_v44, %s7524_s15  ;;  %5811 = vrot.lane.b32.xlu1 %v5382_v53, %s7524_s15 }
 0x3d3   : > { %7160 = vmatmul.mubr.msk.bf16.gmra.mrb[44].mxu0 %vm5389_vm7, %v5383_v30 }
 0x3d4   : > { %7165 = vmatprep.mubr.msk.bf16.mxu0 %vm5389_vm7, %v5364_v31 }
 0x3d5   : > { %6099 = vrot.lane.b32.xlu0 %v5377_v38, %s7524_s15  ;;  %6101 = vrot.lane.b32.xlu1 %v8960_v62, %s7524_s15 }
 0x3d9   : > { %6103 = vrot.lane.b32.xlu0 %v8965_v63, %s7524_s15  ;;  %6105 = vrot.lane.b32.xlu1 %v5380_v0, %s7524_s15 }
 0x3db   : > { %7166 = vmatmul.mubr.msk.bf16.vlgmr.msra.gmra.mrb[32].mxu0 %vm5389_vm7, %v5376_v13 }
 0x3dc   : > { %7169 = vmatprep.mubr.msk.bf16.mxu0 %vm5389_vm7, %v5377_v38  ;;  %7218 = vmatpush3.bf16.msra.mxu0 %v5976_v51 }
 0x3dd   : > { %6107 = vrot.lane.b32.xlu0 %v5381_v44, %s7524_s15  ;;  %6109 = vrot.lane.b32.xlu1 %v5382_v53, %s7524_s15 }
 0x3e1   : > { %6111 = vrot.lane.b32.xlu0 %v5383_v30, %s7524_s15  ;;  %6113 = vrot.lane.b32.xlu1 %v5945_v11, %s7524_s15  ;;  %s9185_s15 = scalar_lea.hbm %s9257_s9, %s6942_s21 }
 0x3e3   : > { %7170 = vmatmul.mubr.msk.bf16.gmra.mrb[36].mxu0 %vm5389_vm7, %v8960_v62 }
 0x3e4   : > { %7173 = vmatprep.mubr.msk.bf16.mxu0 %vm5389_vm7, %v8965_v63 }
 0x3eb   : > { %7174 = vmatmul.mubr.msk.bf16.gmra.mrb[40].mxu0 %vm5389_vm7, %v5380_v0 }
 0x3ec   : > { %7177 = vmatprep.mubr.msk.bf16.mxu0 %vm5389_vm7, %v5381_v44 }
 0x3f3   : > { %7178 = vmatmul.mubr.msk.bf16.gmra.mrb[44].mxu0 %vm5389_vm7, %v5382_v53 }
 0x3f4   : > { %7219 = vmatprep.mubr.msk.bf16.mxu0 %vm5389_vm7, %v5377_v38 }
 0x3fb   : > { %7220 = vmatmul.mubr.msk.bf16.vlgmr.msra.gmra.mrb[32].mxu0 %vm5389_vm7, %v8960_v62 }
 0x3fc   : > { %7223 = vmatprep.mubr.msk.bf16.mxu0 %vm5389_vm7, %v8965_v63 }
 0x403   : > { %7224 = vmatmul.mubr.msk.bf16.gmra.mrb[36].mxu0 %vm5389_vm7, %v5380_v0 }
 0x404   : > { %7227 = vmatprep.mubr.msk.bf16.mxu0 %vm5389_vm7, %v5381_v44 }
 0x40b   : > { %7228 = vmatmul.mubr.msk.bf16.gmra.mrb[40].mxu0 %vm5389_vm7, %v5382_v53 }
 0x40c   : > { %7231 = vmatprep.mubr.msk.bf16.mxu0 %vm5389_vm7, %v5383_v30 }
 0x413   : > { %7232 = vmatmul.mubr.msk.bf16.gmra.mrb[44].mxu0 %vm5389_vm7, %v5945_v11 }
 0x427   : > { %v5653_v7 = vpop.permute.xlu0 %5652  ;;  %v5657_v60 = vpop.permute.xlu1 %5656 }
 0x428   : > { %7183 = vmatprep.mubr.msk.bf16.mxu1 %vm5389_vm7, %v5653_v7 }
 0x42b   : > { %v5655_v42 = vpop.permute.xlu0 %5654  ;;  %v5659_v33 = vpop.permute.xlu1 %5658 }
 0x42c   : > { %7184 = vmatmul.mubr.msk.bf16.vlgmr.msra.gmra.mrb[32].mxu1 %vm5389_vm7, %v5655_v42 }
 0x42d   : > { %7200 = vmatpush3.bf16.msra.mxu1 %v5545_v20  ;;  %7187 = vmatprep.mubr.msk.bf16.mxu1 %vm5389_vm7, %v5657_v60 }
 0x42e   : > { %7325 = vmatprep.subr.msk.bf16.mxu1 %vm5414_vm8, %v7420_v46 }
 0x42f   : > { %v5661_v19 = vpop.permute.xlu0 %5660  ;;  %v5663_v40 = vpop.permute.xlu1 %5662 }
 0x433   : > { %v5665_v6 = vpop.permute.xlu0 %5664  ;;  %v5667_v49 = vpop.permute.xlu1 %5666 }
 0x434   : > { %7188 = vmatmul.mubr.msk.bf16.gmra.mrb[36].mxu1 %vm5389_vm7, %v5659_v33 }
 0x435   : > { %7191 = vmatprep.mubr.msk.bf16.mxu1 %vm5389_vm7, %v5661_v19 }
 0x437   : > { %v5798_v61 = vpop.permute.xlu0 %5797  ;;  %v5800_v16 = vpop.permute.xlu1 %5799 }
 0x43b   : > { %v5802_v36 = vpop.permute.xlu0 %5801  ;;  %v5804_v25 = vpop.permute.xlu1 %5803 }
 0x43c   : > { %7192 = vmatmul.mubr.msk.bf16.gmra.mrb[40].mxu1 %vm5389_vm7, %v5663_v40 }
 0x43d   : > { %7195 = vmatprep.mubr.msk.bf16.mxu1 %vm5389_vm7, %v5665_v6 }
 0x43f   : > { %v5806_v55 = vpop.permute.xlu0 %5805  ;;  %v5808_v50 = vpop.permute.xlu1 %5807 }
 0x443   : > { %v5810_v8 = vpop.permute.xlu0 %5809  ;;  %v5812_v57 = vpop.permute.xlu1 %5811 }
 0x444   : > { %7196 = vmatmul.mubr.msk.bf16.gmra.mrb[44].mxu1 %vm5389_vm7, %v5667_v49 }
 0x445   : > { %7201 = vmatprep.mubr.msk.bf16.mxu1 %vm5389_vm7, %v5798_v61 }
 0x447   : > { %v6100_v18 = vpop.permute.xlu0 %6099  ;;  %v6102_v28 = vpop.permute.xlu1 %6101 }
 0x44b   : > { %v6104_v35 = vpop.permute.xlu0 %6103  ;;  %v6106_v12 = vpop.permute.xlu1 %6105 }
 0x44c   : > { %7202 = vmatmul.mubr.msk.bf16.vlgmr.msra.gmra.mrb[32].mxu1 %vm5389_vm7, %v5800_v16 }
 0x44d   : > { %7236 = vmatpush3.bf16.msra.mxu1 %v5976_v51  ;;  %7205 = vmatprep.mubr.msk.bf16.mxu1 %vm5389_vm7, %v5802_v36 }
 0x44f   : > { %v6108_v3 = vpop.permute.xlu0 %6107  ;;  %v6110_v52 = vpop.permute.xlu1 %6109 }
 0x453   : > { %v6112_v56 = vpop.permute.xlu0 %6111  ;;  %v6114_v32 = vpop.permute.xlu1 %6113 }
 0x454   : > { %7206 = vmatmul.mubr.msk.bf16.gmra.mrb[36].mxu1 %vm5389_vm7, %v5804_v25 }
 0x455   : > { %7209 = vmatprep.mubr.msk.bf16.mxu1 %vm5389_vm7, %v5806_v55 }
 0x45c   : > { %7210 = vmatmul.mubr.msk.bf16.gmra.mrb[40].mxu1 %vm5389_vm7, %v5808_v50 }
 0x45d   : > { %7213 = vmatprep.mubr.msk.bf16.mxu1 %vm5389_vm7, %v5810_v8 }
 0x464   : > { %7214 = vmatmul.mubr.msk.bf16.gmra.mrb[44].mxu1 %vm5389_vm7, %v5812_v57 }
 0x465   : > { %7237 = vmatprep.mubr.msk.bf16.mxu1 %vm5389_vm7, %v6100_v18 }
 0x46c   : > { %7238 = vmatmul.mubr.msk.bf16.vlgmr.msra.gmra.mrb[32].mxu1 %vm5389_vm7, %v6102_v28 }
 0x46d   : > { %7241 = vmatprep.mubr.msk.bf16.mxu1 %vm5389_vm7, %v6104_v35 }
 0x474   : > { %7242 = vmatmul.mubr.msk.bf16.gmra.mrb[36].mxu1 %vm5389_vm7, %v6106_v12 }
 0x475   : > { %7245 = vmatprep.mubr.msk.bf16.mxu1 %vm5389_vm7, %v6108_v3 }
 0x47c   : > { %7246 = vmatmul.mubr.msk.bf16.gmra.mrb[40].mxu1 %vm5389_vm7, %v6110_v52 }
 0x47d   : > { %7249 = vmatprep.mubr.msk.bf16.mxu1 %vm5389_vm7, %v6112_v56 }
 0x484   : > { %7250 = vmatmul.mubr.msk.bf16.gmra.mrb[44].mxu1 %vm5389_vm7, %v6114_v32 }
 0x4ce   : > { %v7221_v10 = vpop.f32.mrb[32].mxu0 }
 0x4cf   : > { %v6261_v59 = vadd.f32 %v7221_v10, %v9069_v9  ;;  %v6012_v2 = vpop.f32.mrb[33].mxu0 }
 0x4d0   : > { %v6259_v24 = vadd.f32 %v9069_v9, %v6012_v2  ;;  %v7222_v39 = vpop.f32.mrb[34].mxu0 }
 0x4d1   : > { %v6277_v45 = vmax.f32 %v6261_v59, 0.0  ;;  %v6262_v17 = vadd.f32 %v7222_v39, %v9069_v9  ;;  %v6015_v23 = vpop.f32.mrb[35].mxu0 }
 0x4d2   : > { %v6275_v29 = vmax.f32 %v6259_v24, 0.0  ;;  %v6260_v58 = vadd.f32 %v9069_v9, %v6015_v23 }
 0x4d3   : > { %v6969_v27 = vpack.c.bf16 %v6277_v45, %v6277_v45  ;;  %v6278_v47 = vmax.f32 %v6262_v17, 0.0 }
 0x4d4   : > { %v6967_v37 = vpack.c.bf16 %v6275_v29, %v6275_v29  ;;  %v6276_v5 = vmax.f32 %v6260_v58, 0.0 }
 0x4d5   : > { %6390 = vst.msk [vmem:[%s8956_s19 + $0x8] sm:$0xf] %vm6387_vm9, %v6969_v27  ;;  %v6970_v15 = vpack.c.bf16 %v6278_v47, %v6278_v47 }
 0x4d6   : > { %v7225_v26 = vpop.f32.mrb[36].mxu0  ;;  %6388 = vst.msk [vmem:[%s8956_s19] sm:$0xf] %vm6387_vm9, %v6967_v37  ;;  %v6968_v13 = vpack.c.bf16 %v6276_v5, %v6276_v5 }
 0x4d7   : > { %v6265_v1 = vadd.f32 %v7225_v26, %v9069_v9  ;;  %v6028_v43 = vpop.f32.mrb[37].mxu0  ;;  %6391 = vst.msk [vmem:[%s8956_s19 + $0xc] sm:$0xf] %vm6387_vm9, %v6970_v15 }
 0x4d8   : > { %v6263_v4 = vadd.f32 %v9069_v9, %v6028_v43  ;;  %v7226_v34 = vpop.f32.mrb[38].mxu0  ;;  %6389 = vst.msk [vmem:[%s8956_s19 + $0x4] sm:$0xf] %vm6387_vm9, %v6968_v13 }
 0x4d9   : > { %v6281_v54 = vmax.f32 %v6265_v1, 0.0  ;;  %v6266_v22 = vadd.f32 %v7226_v34, %v9069_v9  ;;  %v6031_v21 = vpop.f32.mrb[39].mxu0 }
 0x4da   : > { %v6279_v62 = vmax.f32 %v6263_v4, 0.0  ;;  %v6264_v38 = vadd.f32 %v9069_v9, %v6031_v21 }
 0x4db   : > { %v6973_v14 = vpack.c.bf16 %v6281_v54, %v6281_v54  ;;  %v6282_v41 = vmax.f32 %v6266_v22, 0.0 }
 0x4dc   : > { %v6971_v48 = vpack.c.bf16 %v6279_v62, %v6279_v62  ;;  %v6280_v53 = vmax.f32 %v6264_v38, 0.0 }
 0x4dd   : > { %6394 = vst.msk [vmem:[%s8956_s19 + $0x18] sm:$0xf] %vm6387_vm9, %v6973_v14  ;;  %v6974_v31 = vpack.c.bf16 %v6282_v41, %v6282_v41 }
 0x4de   : > { %v7229_v63 = vpop.f32.mrb[40].mxu0  ;;  %6392 = vst.msk [vmem:[%s8956_s19 + $0x10] sm:$0xf] %vm6387_vm9, %v6971_v48  ;;  %v6972_v7 = vpack.c.bf16 %v6280_v53, %v6280_v53 }
 0x4df   : > { %v6269_v0 = vadd.f32 %v7229_v63, %v9069_v9  ;;  %v6044_v44 = vpop.f32.mrb[41].mxu0  ;;  %6395 = vst.msk [vmem:[%s8956_s19 + $0x1c] sm:$0xf] %vm6387_vm9, %v6974_v31 }
 0x4e0   : > { %v6267_v30 = vadd.f32 %v9069_v9, %v6044_v44  ;;  %v7230_v20 = vpop.f32.mrb[42].mxu0  ;;  %6393 = vst.msk [vmem:[%s8956_s19 + $0x14] sm:$0xf] %vm6387_vm9, %v6972_v7 }
 0x4e1   : > { %v6285_v46 = vmax.f32 %v6269_v0, 0.0  ;;  %v6270_v11 = vadd.f32 %v7230_v20, %v9069_v9  ;;  %v6047_v51 = vpop.f32.mrb[43].mxu0 }
 0x4e2   : > { %v6283_v60 = vmax.f32 %v6267_v30, 0.0  ;;  %v6268_v42 = vadd.f32 %v9069_v9, %v6047_v51 }
 0x4e3   : > { %v6977_v19 = vpack.c.bf16 %v6285_v46, %v6285_v46  ;;  %v6286_v40 = vmax.f32 %v6270_v11, 0.0 }
 0x4e4   : > { %v6975_v61 = vpack.c.bf16 %v6283_v60, %v6283_v60  ;;  %v6284_v16 = vmax.f32 %v6268_v42, 0.0 }
 0x4e5   : > { %6398 = vst.msk [vmem:[%s8956_s19 + $0x28] sm:$0xf] %vm6387_vm9, %v6977_v19  ;;  %v6978_v55 = vpack.c.bf16 %v6286_v40, %v6286_v40 }
 0x4e6   : > { %v7233_v33 = vpop.f32.mrb[44].mxu0  ;;  %6396 = vst.msk [vmem:[%s8956_s19 + $0x20] sm:$0xf] %vm6387_vm9, %v6975_v61  ;;  %v6976_v18 = vpack.c.bf16 %v6284_v16, %v6284_v16 }
 0x4e7   : > { %v6273_v6 = vadd.f32 %v7233_v33, %v9069_v9  ;;  %v6060_v49 = vpop.f32.mrb[45].mxu0  ;;  %6399 = vst.msk [vmem:[%s8956_s19 + $0x2c] sm:$0xf] %vm6387_vm9, %v6978_v55 }
 0x4e8   : > { %v6271_v36 = vadd.f32 %v9069_v9, %v6060_v49  ;;  %v7234_v25 = vpop.f32.mrb[46].mxu0  ;;  %6397 = vst.msk [vmem:[%s8956_s19 + $0x24] sm:$0xf] %vm6387_vm9, %v6976_v18 }
 0x4e9   : > { %v6289_v50 = vmax.f32 %v6273_v6, 0.0  ;;  %v6274_v8 = vadd.f32 %v7234_v25, %v9069_v9  ;;  %v6063_v57 = vpop.f32.mrb[47].mxu0 }
 0x4ea   : > { %v6287_v28 = vmax.f32 %v6271_v36, 0.0  ;;  %v6272_v35 = vadd.f32 %v9069_v9, %v6063_v57 }
 0x4eb   : > { %v6981_v12 = vpack.c.bf16 %v6289_v50, %v6289_v50  ;;  %v6290_v3 = vmax.f32 %v6274_v8, 0.0 }
 0x4ec   : > { %v6979_v52 = vpack.c.bf16 %v6287_v28, %v6287_v28  ;;  %v6288_v56 = vmax.f32 %v6272_v35, 0.0 }
 0x4ed   : > { %6402 = vst.msk [vmem:[%s8956_s19 + $0x38] sm:$0xf] %vm6387_vm9, %v6981_v12  ;;  %v6982_v32 = vpack.c.bf16 %v6290_v3, %v6290_v3 }
 0x4ee   : > { %6400 = vst.msk [vmem:[%s8956_s19 + $0x30] sm:$0xf] %vm6387_vm9, %v6979_v52  ;;  %v6980_v10 = vpack.c.bf16 %v6288_v56, %v6288_v56 }
 0x4ef   : > { %6403 = vst.msk [vmem:[%s8956_s19 + $0x3c] sm:$0xf] %vm6387_vm9, %v6982_v32 }
 0x4f0   : > { %6401 = vst.msk [vmem:[%s8956_s19 + $0x34] sm:$0xf] %vm6387_vm9, %v6980_v10 }
 0x53f   : > { %v7239_v59 = vpop.f32.mrb[32].mxu1 }
 0x540   : > { %v6293_v2 = vadd.f32 %v7239_v59, %v9069_v9  ;;  %v6173_v24 = vpop.f32.mrb[33].mxu1 }
 0x541   : > { %v6291_v39 = vadd.f32 %v9069_v9, %v6173_v24  ;;  %v7240_v45 = vpop.f32.mrb[34].mxu1 }
 0x542   : > { %v6309_v17 = vmax.f32 %v6293_v2, 0.0  ;;  %v6294_v23 = vadd.f32 %v7240_v45, %v9069_v9  ;;  %v6176_v29 = vpop.f32.mrb[35].mxu1 }
 0x543   : > { %v6292_v58 = vadd.f32 %v9069_v9, %v6176_v29  ;;  %v6307_v27 = vmax.f32 %v6291_v39, 0.0 }
 0x544   : > { %v6985_v26 = vpack.c.bf16 %v6309_v17, %v6309_v17  ;;  %v6310_v47 = vmax.f32 %v6294_v23, 0.0 }
 0x545   : > { %v6308_v43 = vmax.f32 %v6292_v58, 0.0  ;;  %v6983_v5 = vpack.c.bf16 %v6307_v27, %v6307_v27 }
 0x546   : > { %v6986_v1 = vpack.c.bf16 %v6310_v47, %v6310_v47  ;;  %6456 = vrot.lane.b32.xlu0 %v6985_v26, %s7525_s28 }
 0x547   : > { %v7243_v37 = vpop.f32.mrb[36].mxu1  ;;  %v6984_v22 = vpack.c.bf16 %v6308_v43, %v6308_v43 }
 0x548   : > { %v6297_v4 = vadd.f32 %v7243_v37, %v9069_v9  ;;  %6458 = vrot.lane.b32.xlu1 %v6986_v1, %s7525_s28  ;;  %v6189_v34 = vpop.f32.mrb[37].mxu1 }
 0x549   : > { %v6295_v15 = vadd.f32 %v9069_v9, %v6189_v34  ;;  %v7244_v54 = vpop.f32.mrb[38].mxu1 }
 0x54a   : > { %v6313_v21 = vmax.f32 %v6297_v4, 0.0  ;;  %v6298_v13 = vadd.f32 %v7244_v54, %v9069_v9  ;;  %6452 = vrot.lane.b32.xlu0 %v6983_v5, %s7525_s28  ;;  %v6192_v62 = vpop.f32.mrb[39].mxu1 }
 0x54b   : > { %v6296_v38 = vadd.f32 %v9069_v9, %v6192_v62  ;;  %v6311_v14 = vmax.f32 %v6295_v15, 0.0 }
 0x54c   : > { %v6989_v63 = vpack.c.bf16 %v6313_v21, %v6313_v21  ;;  %v6314_v41 = vmax.f32 %v6298_v13, 0.0  ;;  %6454 = vrot.lane.b32.xlu1 %v6984_v22, %s7525_s28 }
 0x54d   : > { %v6312_v44 = vmax.f32 %v6296_v38, 0.0  ;;  %v6987_v53 = vpack.c.bf16 %v6311_v14, %v6311_v14 }
 0x54e   : > { %v6990_v0 = vpack.c.bf16 %v6314_v41, %v6314_v41  ;;  %6464 = vrot.lane.b32.xlu0 %v6989_v63, %s7525_s28 }
 0x54f   : > { %v7247_v48 = vpop.f32.mrb[40].mxu1  ;;  %v6988_v11 = vpack.c.bf16 %v6312_v44, %v6312_v44 }
 0x550   : > { %v6301_v30 = vadd.f32 %v7247_v48, %v9069_v9  ;;  %6466 = vrot.lane.b32.xlu1 %v6990_v0, %s7525_s28  ;;  %v6205_v20 = vpop.f32.mrb[41].mxu1 }
 0x551   : > { %v6299_v31 = vadd.f32 %v9069_v9, %v6205_v20  ;;  %v7248_v46 = vpop.f32.mrb[42].mxu1 }
 0x552   : > { %v6317_v51 = vmax.f32 %v6301_v30, 0.0  ;;  %v6302_v7 = vadd.f32 %v7248_v46, %v9069_v9  ;;  %6460 = vrot.lane.b32.xlu0 %v6987_v53, %s7525_s28  ;;  %v6208_v60 = vpop.f32.mrb[43].mxu1 }
 0x553   : > { %v6300_v42 = vadd.f32 %v9069_v9, %v6208_v60  ;;  %v6315_v19 = vmax.f32 %v6299_v31, 0.0 }
 0x554   : > { %v6993_v33 = vpack.c.bf16 %v6317_v51, %v6317_v51  ;;  %v6318_v40 = vmax.f32 %v6302_v7, 0.0  ;;  %6462 = vrot.lane.b32.xlu1 %v6988_v11, %s7525_s28 }
 0x555   : > { %v6316_v49 = vmax.f32 %v6300_v42, 0.0  ;;  %v6991_v16 = vpack.c.bf16 %v6315_v19, %v6315_v19 }
 0x556   : > { %v6994_v6 = vpack.c.bf16 %v6318_v40, %v6318_v40  ;;  %6472 = vrot.lane.b32.xlu0 %v6993_v33, %s7525_s28 }
 0x557   : > { %v7251_v61 = vpop.f32.mrb[44].mxu1  ;;  %v6992_v8 = vpack.c.bf16 %v6316_v49, %v6316_v49 }
 0x558   : > { %6474 = vrot.lane.b32.xlu1 %v6994_v6, %s7525_s28  ;;  %v6221_v36 = vpop.f32.mrb[45].mxu1  ;;  %v6305_v25 = vadd.f32 %v7251_v61, %v9069_v9 }
 0x559   : > { %v6303_v55 = vadd.f32 %v9069_v9, %v6221_v36  ;;  %v7252_v50 = vpop.f32.mrb[46].mxu1 }
 0x55a   : > { %6468 = vrot.lane.b32.xlu0 %v6991_v16, %s7525_s28  ;;  %v6224_v57 = vpop.f32.mrb[47].mxu1  ;;  %v6306_v28 = vadd.f32 %v7252_v50, %v9069_v9  ;;  %v6321_v12 = vmax.f32 %v6305_v25, 0.0 }
 0x55b   : > { %v6319_v18 = vmax.f32 %v6303_v55, 0.0  ;;  %v6304_v35 = vadd.f32 %v9069_v9, %v6224_v57 }
 0x55c   : > { %6470 = vrot.lane.b32.xlu1 %v6992_v8, %s7525_s28  ;;  %v6322_v56 = vmax.f32 %v6306_v28, 0.0  ;;  %v6997_v10 = vpack.c.bf16 %v6321_v12, %v6321_v12 }
 0x55d   : > { %v6995_v3 = vpack.c.bf16 %v6319_v18, %v6319_v18  ;;  %v6320_v52 = vmax.f32 %v6304_v35, 0.0 }
 0x55e   : > { %v6998_v59 = vpack.c.bf16 %v6322_v56, %v6322_v56 }
 0x55f   : > { %v6996_v32 = vpack.c.bf16 %v6320_v52, %v6320_v52  ;;  %6476 = vrot.lane.b32.xlu0 %v6995_v3, %s7525_s28 }
 0x561   : > { %6478 = vrot.lane.b32.xlu1 %v6996_v32, %s7525_s28 }
 0x563   : > { %6480 = vrot.lane.b32.xlu0 %v6997_v10, %s7525_s28 }
 0x565   : > { %6482 = vrot.lane.b32.xlu1 %v6998_v59, %s7525_s28 }
 0x5b8   : > { %v6457_v9 = vpop.permute.xlu0 %6456 }
 0x5b9   : > { %6503 = vst.msk [vmem:[%s8956_s19 + $0x8] sm:$0xf] %vm6500_vm10, %v6457_v9 }
 0x5ba   : > { %v6459_v2 = vpop.permute.xlu1 %6458 }
 0x5bb   : > { %6504 = vst.msk [vmem:[%s8956_s19 + $0xc] sm:$0xf] %vm6500_vm10, %v6459_v2 }
 0x5bc   : > { %v6453_v24 = vpop.permute.xlu0 %6452 }
 0x5bd   : > { %6501 = vst.msk [vmem:[%s8956_s19] sm:$0xf] %vm6500_vm10, %v6453_v24 }
 0x5be   : > { %v6455_v39 = vpop.permute.xlu1 %6454 }
 0x5bf   : > { %6502 = vst.msk [vmem:[%s8956_s19 + $0x4] sm:$0xf] %vm6500_vm10, %v6455_v39 }
 0x5c0   : > { %v6465_v45 = vpop.permute.xlu0 %6464 }
 0x5c1   : > { %6507 = vst.msk [vmem:[%s8956_s19 + $0x18] sm:$0xf] %vm6500_vm10, %v6465_v45 }
 0x5c2   : > { %v6467_v17 = vpop.permute.xlu1 %6466 }
 0x5c3   : > { %6508 = vst.msk [vmem:[%s8956_s19 + $0x1c] sm:$0xf] %vm6500_vm10, %v6467_v17 }
 0x5c4   : > { %v6461_v23 = vpop.permute.xlu0 %6460 }
 0x5c5   : > { %6505 = vst.msk [vmem:[%s8956_s19 + $0x10] sm:$0xf] %vm6500_vm10, %v6461_v23 }
 0x5c6   : > { %v6463_v29 = vpop.permute.xlu1 %6462 }
 0x5c7   : > { %6506 = vst.msk [vmem:[%s8956_s19 + $0x14] sm:$0xf] %vm6500_vm10, %v6463_v29 }
 0x5c8   : > { %v6473_v58 = vpop.permute.xlu0 %6472 }
 0x5c9   : > { %6511 = vst.msk [vmem:[%s8956_s19 + $0x28] sm:$0xf] %vm6500_vm10, %v6473_v58 }
 0x5ca   : > { %v6475_v26 = vpop.permute.xlu1 %6474 }
 0x5cb   : > { %6512 = vst.msk [vmem:[%s8956_s19 + $0x2c] sm:$0xf] %vm6500_vm10, %v6475_v26 }
 0x5cc   : > { %v6469_v27 = vpop.permute.xlu0 %6468 }
 0x5cd   : > { %6509 = vst.msk [vmem:[%s8956_s19 + $0x20] sm:$0xf] %vm6500_vm10, %v6469_v27 }
 0x5ce   : > { %v6471_v47 = vpop.permute.xlu1 %6470 }
 0x5cf   : > { %6510 = vst.msk [vmem:[%s8956_s19 + $0x24] sm:$0xf] %vm6500_vm10, %v6471_v47 }
 0x5d1   : > { %v6477_v1 = vpop.permute.xlu0 %6476 }
 0x5d2   : > { %6513 = vst.msk [vmem:[%s8956_s19 + $0x30] sm:$0xf] %vm6500_vm10, %v6477_v1 }
 0x5d3   : > { %v6479_v43 = vpop.permute.xlu1 %6478 }
 0x5d4   : > { %6514 = vst.msk [vmem:[%s8956_s19 + $0x34] sm:$0xf] %vm6500_vm10, %v6479_v43 }
 0x5d5   : > { %v6481_v37 = vpop.permute.xlu0 %6480 }
 0x5d6   : > { %6515 = vst.msk [vmem:[%s8956_s19 + $0x38] sm:$0xf] %vm6500_vm10, %v6481_v37 }
 0x5d7   : > { %v6483_v5 = vpop.permute.xlu1 %6482 }
 0x5d8   : > { %6516 = vst.msk [vmem:[%s8956_s19 + $0x3c] sm:$0xf] %vm6500_vm10, %v6483_v5 }
 0x5d9   : > { %7434 = shalt.err (!%p7431_p13)
}
 0x5da   : > { %s7435_s19 = scalar_lea.hbm %s9185_s15, 1024  ;;  %s7439_s28 = scalar_lea.hbm %s9257_s9, 4096 }
 0x5db   : > { %p7436_p0 = scmp.ne.s32.totalorder %s9185_s15, %s7435_s19  ;;  %p7440_p4 = scmp.lt.u32.totalorder %s9185_s15, %s9257_s9 }
 0x5dc   : > { %p7441_p5 = scmp.lt.u32.totalorder %s7439_s28, %s7435_s19  ;;  %p7443_p7 = scmp.lt.u32.totalorder %s7435_s19, %s9185_s15 }
 0x5dd   : > { %p7437_p1 = pnand %p7436_p0, %p7629_p3 }
 0x5de   : > { %p7442_p6 = por %p7441_p5, %p7440_p4 }
 0x5df   : > { %p7438_p2 = pneg %p7437_p1 }
 0x5e0   : > { %p7444_p9 = por %p7443_p7, %p7442_p6 }
 0x5e2   : > { %p7445_p10 = pnand %p7444_p9, %p7438_p2 }
 0x5e4   : > { %7448 = shalt.err (!%p7445_p10)
}
 0x5e5   : > { %s7527_s17 = smov 64  }
 0x5e6   : > { %7326 = dma.vmem_to_hbm [thread:$0]  (%p7629_p3), %s9189_s24, 1024, %s9185_s15, %s9195_s18, %s7527_s17, %s7527_s17, %s7517_s23  }
 0x5e7 PF: > { %s9322_s21 = sld [smem:[#allocation7_spill]]  ;;  %p7332_p11 = scmp.ge.s32.totalorder %s7515_s16, 2 }
 0x5e9   : > { %p7329_p12 = pnand %p7332_p11, %p7638_p8 }
 0x5ed   : > { %s6549_s13 = sand.u32 1, %s9322_s21  }
 0x5ee   : > { %s6550_s20 = scalar_lea.sflag [#allocation5], %s6549_s13 }
 0x5ef   : > { %7482 = dma.done.wait (!%p7329_p12), %s6550_s20, 1024  }
 0x5f0   : > { %7484 = vsyncadd (!%p7329_p12), %s6550_s20, 4294966272  ;;  %s22_s16 = sadd.s32 1, %s7515_s16   ;;  %s9324_s22 = sld [smem:[#allocation8_spill]] }
 0x5f1   : > { %p19_p13 = scmp.ge.s32.totalorder %s22_s16, 6   ;;  %s9325_s11 = sld [smem:[#allocation14_spill]] }
 0x5f2   : > { %s9326_s12 = sld [smem:[#allocation9_spill]]  ;;  %s9327_s13 = sld [smem:[#allocation10_spill]] }
 0x5f3   : > { %s9328_s14 = sld [smem:[#allocation11_spill]]  ;;  %s9329_s15 = sld [smem:[#allocation12_spill]] }
 0x5f4   : > { %s9330_s30 = smov %s7491_s10  ;;  %21 = sbr.rel (!%p19_p13) target bundleno = 7 (0x7), region = 110 }
 0x5f6   : > { %s9331_s10 = smov %s9324_s22 }
 0x5fb   :  { %6555 = vsyncpa [#allocation5], 1 }
 0x5fc   :  { %6557 = vsyncpa [#allocation5 + $0x1], 1 }

</bundles_post_ra>
